<compile_context>
chip_gen: v7x
topology: tpu7x:2x2x1
jax: 0.10.0
libtpu: 0.0.40
codegen_flags: <defaults>
</compile_context>

<pallas_src>
import jax
import jax.numpy as jnp
from jax import lax
from jax.experimental import pallas as pl
from jax.experimental.pallas import tpu as pltpu

EPS = 1e-5
LANE = 128
# One-line throughput knob: set to jnp.bfloat16 on v6e/v7x for ~4x MXU throughput at
# production channel counts (keep accumulation / bias / BN math in f32; loosen the
# self-test tolerance to ~3e-2 if enabled).
DOT_DTYPE = jnp.float32


def _round_up(n, m):
    return (n + m - 1) // m * m


def _down_block_kernel(x_ref, w1_ref, b1_ref, g1_ref, be1_ref,
                       w2_ref, b2_ref, g2_ref, be2_ref,
                       out_ref, pad_ref):
    # x_ref   : (2, 2, B, H2, W2, Cin)   pool taps pre-split -> pure leading-dim indices
    # w*_ref  : (9*Cpad, Cpad)           zero-padded, (kh*3+kw) major along K
    # b/g/be  : (1, Cpad)                zero-padded (gamma/beta tail = 0)
    # out_ref : (B*H2*W2, Cpad)          lane-dense (Cpad = 128)
    # pad_ref : (B, H2+2, Wp, Cpad)      zero-bordered activation scratch, tile-aligned
    _, _, B, H2, W2, Cin = x_ref.shape
    Cpad = w1_ref.shape[-1]
    Wp = pad_ref.shape[2]
    M = B * H2 * W2
    inv_m = 1.0 / M

    # ---- zero only what must be zero: 1-pixel border + conv1's channel tail ----------
    zrow = jnp.zeros((B, 1, Wp, Cpad), jnp.float32)
    pad_ref[:, 0:1, :, :] = zrow                         # top border row
    pad_ref[:, H2 + 1:H2 + 2, :, :] = zrow               # bottom border row
    zcol = jnp.zeros((B, H2, 1, Cpad), jnp.float32)
    pad_ref[:, 1:H2 + 1, 0:1, :] = zcol                  # left border col
    pad_ref[:, 1:H2 + 1, W2 + 1:W2 + 2, :] = zcol        # right border col
    if Cin < Cpad:                                       # channel tail read by conv1's K
        pad_ref[:, 1:H2 + 1, 1:W2 + 1, Cin:] = jnp.zeros((B, H2, W2, Cpad - Cin),
                                                         jnp.float32)

    # ---- MaxPool2d(kernel=2, stride=2): leading-dim taps, pure VPU max ----------------
    pooled = jnp.maximum(jnp.maximum(x_ref[0, 0], x_ref[0, 1]),
                         jnp.maximum(x_ref[1, 0], x_ref[1, 1]))      # (B, H2, W2, Cin)
    pad_ref[:, 1:H2 + 1, 1:W2 + 1, :Cin] = pooled

    def conv3x3_bias_relu(w_ref, b_ref):
        # 3x3 conv (padding=1) as ONE matmul: mini-im2col along K = 9*Cpad.
        # Each tap view is a full-lane (M, Cpad) slab -> the concat is vreg placement.
        taps = [pad_ref[:, kh:kh + H2, kw:kw + W2, :].reshape(M, Cpad)
                for kh in range(3) for kw in range(3)]
        patches = jnp.concatenate(taps, axis=-1)                     # (M, 9*Cpad)
        y = jnp.dot(patches.astype(DOT_DTYPE), w_ref[...].astype(DOT_DTYPE),
                    preferred_element_type=jnp.float32)
        return jnp.maximum(y + b_ref[...], 0.0)                      # bias + ReLU, once

    def bn_scale_shift(y, g_ref, be_ref):
        # train-mode BatchNorm2d (biased batch stats over M = N*H*W rows, per channel),
        # single streaming pass: sum / sum-of-squares -> scale s, shift t; y_bn = y*s + t
        mean = jnp.sum(y, axis=0, keepdims=True) * inv_m
        var = jnp.sum(y * y, axis=0, keepdims=True) * inv_m - mean * mean
        s = g_ref[...] * lax.rsqrt(var + EPS)
        t = be_ref[...] - mean * s
        return s, t

    # conv1 -> ReLU -> BN1, fused into the single write of conv2's padded input.
    # (padded gamma/beta are 0, so channels Cout..Cpad are written back as exact zeros)
    y1 = conv3x3_bias_relu(w1_ref, b1_ref)
    s1, t1 = bn_scale_shift(y1, g1_ref, be1_ref)
    pad_ref[:, 1:H2 + 1, 1:W2 + 1, :] = (y1 * s1 + t1).reshape(B, H2, W2, Cpad)

    # conv2 -> ReLU -> BN2 -> output (lane-dense (M, Cpad) stores).
    y2 = conv3x3_bias_relu(w2_ref, b2_ref)
    s2, t2 = bn_scale_shift(y2, g2_ref, be2_ref)
    out_ref[...] = y2 * s2 + t2
    # TODO(synk): BatchNorm running_mean/running_var buffer updates (training-time side
    # effect, not part of the returned forward value) are not modeled.
    # TODO(synk): for production sizes this should be row-tiled over H2 (1-row halo) with
    # a multi-phase grid (conv1+ReLU+stat accumulation, BN1+conv2+stat accumulation,
    # BN2 normalize) so tiles fit v7x's 64 MiB VMEM, the DMA pipeline stays active and the
    # tile axis can be marked "parallel" for both v7x TensorCores; batch-statistics BN
    # couples every row, so the single-invocation form is kept at these self-test sizes.


def down_block_forward(x_nchw, params):
    w1, b1, g1, be1, w2, b2, g2, be2 = params
    B, Cin, H, W = x_nchw.shape
    H2, W2 = H // 2, W // 2
    Cout = w1.shape[-1]
    Cpad = _round_up(max(Cin, Cout), LANE)
    Wp = _round_up(W2 + 2, 8)
    M = B * H2 * W2

    # Single input-side layout pass: NCHW -> (ih, iw, B, H2, W2, C).  This folds the
    # NCHW->NHWC conversion and the 2x2 pool-tap split into one XLA transpose, so the
    # kernel's pool taps are pure leading-dim indices (no unaligned lane slices).
    x6 = jnp.transpose(x_nchw.astype(jnp.float32).reshape(B, Cin, H2, 2, W2, 2),
                       (3, 5, 0, 2, 4, 1))
    # TODO(synk): keep the surrounding model NHWC to drop this (and the output-side)
    # layout pass entirely; NCHW is retained here only to match the PyTorch interface.

    def pad_w(w, ci, co):
        wk = jnp.pad(w.astype(jnp.float32).reshape(9, ci, co),
                     ((0, 0), (0, Cpad - ci), (0, Cpad - co)))
        return wk.reshape(9 * Cpad, Cpad)                 # (kh*3+kw) major along K

    def pad_v(v):
        return jnp.pad(v.astype(jnp.float32), (0, Cpad - v.shape[0])).reshape(1, Cpad)

    w1k = pad_w(w1, Cin, Cout)
    w2k = pad_w(w2, Cout, Cout)

    def full(shape):
        n = len(shape)
        return pl.BlockSpec(shape, lambda i, _n=n: (0,) * _n)

    out2d = pl.pallas_call(
        _down_block_kernel,
        out_shape=jax.ShapeDtypeStruct((M, Cpad), jnp.float32),
        grid=(1,),
        in_specs=[full((2, 2, B, H2, W2, Cin)),
                  full((9 * Cpad, Cpad)), full((1, Cpad)), full((1, Cpad)), full((1, Cpad)),
                  full((9 * Cpad, Cpad)), full((1, Cpad)), full((1, Cpad)), full((1, Cpad))],
        out_specs=full((M, Cpad)),
        scratch_shapes=[pltpu.VMEM((B, H2 + 2, Wp, Cpad), jnp.float32)],
        compiler_params=pltpu.CompilerParams(
            dimension_semantics=("arbitrary",),
            # sized to stay under v7x's 64 MiB VMEM; can be raised toward ~96 MiB on
            # v5e/v6e for larger resident tiles.
            vmem_limit_bytes=48 * 1024 * 1024),
    )(x6, w1k, pad_v(b1), pad_v(g1), pad_v(be1),
      w2k, pad_v(b2), pad_v(g2), pad_v(be2))

    # Single output-side pass: strip channel padding + NHWC -> NCHW.
    return jnp.transpose(out2d.reshape(B, H2, W2, Cpad)[..., :Cout], (0, 3, 1, 2))


def down_block_reference(x_nchw, params):
    """Pure-JAX reference mirroring the PyTorch forward (train-mode BN)."""
    w1, b1, g1, be1, w2, b2, g2, be2 = params
    x = jnp.transpose(x_nchw, (0, 2, 3, 1)).astype(jnp.float32)
    B, H, W, C = x.shape
    p = jnp.max(x.reshape(B, H // 2, 2, W // 2, 2, C), axis=(2, 4))

    def conv(inp, w, b):
        y = lax.conv_general_dilated(
            inp, w, window_strides=(1, 1), padding="SAME",
            dimension_numbers=("NHWC", "HWIO", "NHWC"),
            precision=lax.Precision.HIGHEST)
        return y + b

    def bn(y, g, be):
        m = jnp.mean(y, axis=(0, 1, 2), keepdims=True)
        v = jnp.mean((y - m) ** 2, axis=(0, 1, 2), keepdims=True)
        return (y - m) / jnp.sqrt(v + EPS) * g + be

    y = jnp.maximum(conv(p, w1, b1), 0.0)
    y = bn(y, g1, be1)
    y = jnp.maximum(conv(y, w2, b2), 0.0)
    y = bn(y, g2, be2)
    return jnp.transpose(y, (0, 3, 1, 2))


if __name__ == "__main__":
    key = jax.random.PRNGKey(0)
    B, Cin, Cout, H, W = 2, 4, 8, 16, 16

    ks = jax.random.split(key, 5)
    x = jax.random.normal(ks[0], (B, Cin, H, W), dtype=jnp.float32)     # NCHW like PyTorch
    # deterministic synthetic parameters (shapes from nn.Conv2d / nn.BatchNorm2d __init__)
    w1 = 0.2 * jax.random.normal(ks[1], (3, 3, Cin, Cout), jnp.float32)   # HWIO
    b1 = 0.1 * jax.random.normal(ks[2], (Cout,), jnp.float32)
    w2 = 0.2 * jax.random.normal(ks[3], (3, 3, Cout, Cout), jnp.float32)
    b2 = 0.1 * jax.random.normal(ks[4], (Cout,), jnp.float32)
    g1 = jnp.ones((Cout,), jnp.float32)
    be1 = jnp.zeros((Cout,), jnp.float32)
    g2 = jnp.ones((Cout,), jnp.float32)
    be2 = jnp.zeros((Cout,), jnp.float32)
    params = (w1, b1, g1, be1, w2, b2, g2, be2)

    out = jax.jit(down_block_forward)(x, params)
    out = jax.block_until_ready(out)

    assert out.shape == (B, Cout, H // 2, W // 2), out.shape
    ref = down_block_reference(x, params)
    err = float(jnp.max(jnp.abs(out - ref)))
    if err > 2e-3:
        raise AssertionError(f"kernel mismatch vs reference: max abs err = {err}")
    print("KERNEL_OK")
</pallas_src>

<mosaic_0001>
module attributes {stable_mosaic.version = 11 : i64} {
  func.func @_down_block_kernel(%arg0: i32, %arg1: memref<2x2x2x8x8x4xf32, #tpu.memory_space<vmem>>, %arg2: memref<1152x128xf32, #tpu.memory_space<vmem>>, %arg3: memref<1x128xf32, #tpu.memory_space<vmem>>, %arg4: memref<1x128xf32, #tpu.memory_space<vmem>>, %arg5: memref<1x128xf32, #tpu.memory_space<vmem>>, %arg6: memref<1152x128xf32, #tpu.memory_space<vmem>>, %arg7: memref<1x128xf32, #tpu.memory_space<vmem>>, %arg8: memref<1x128xf32, #tpu.memory_space<vmem>>, %arg9: memref<1x128xf32, #tpu.memory_space<vmem>>, %arg10: memref<128x128xf32, #tpu.memory_space<vmem>>, %arg11: memref<2x10x16x128xf32, #tpu.memory_space<vmem>>) attributes {dimension_semantics = [#tpu.dimension_semantics<arbitrary>], iteration_bounds = array<i64: 1>, scalar_prefetch = 0 : i64, scratch_operands = 1 : i64, tpu.core_type = #tpu.core_type<tc>, window_params = [{pipeline_mode = #tpu.pipeline_mode<synchronous>, transform_indices = @transform_0, window_bounds = array<i64: 2, 2, 2, 8, 8, 4>}, {pipeline_mode = #tpu.pipeline_mode<synchronous>, transform_indices = @transform_1, window_bounds = array<i64: 1152, 128>}, {pipeline_mode = #tpu.pipeline_mode<synchronous>, transform_indices = @transform_2, window_bounds = array<i64: 1, 128>}, {pipeline_mode = #tpu.pipeline_mode<synchronous>, transform_indices = @transform_3, window_bounds = array<i64: 1, 128>}, {pipeline_mode = #tpu.pipeline_mode<synchronous>, transform_indices = @transform_4, window_bounds = array<i64: 1, 128>}, {pipeline_mode = #tpu.pipeline_mode<synchronous>, transform_indices = @transform_5, window_bounds = array<i64: 1152, 128>}, {pipeline_mode = #tpu.pipeline_mode<synchronous>, transform_indices = @transform_6, window_bounds = array<i64: 1, 128>}, {pipeline_mode = #tpu.pipeline_mode<synchronous>, transform_indices = @transform_7, window_bounds = array<i64: 1, 128>}, {pipeline_mode = #tpu.pipeline_mode<synchronous>, transform_indices = @transform_8, window_bounds = array<i64: 1, 128>}, {pipeline_mode = #tpu.pipeline_mode<synchronous>, transform_indices = @transform_9, window_bounds = array<i64: 128, 128>}]} {
    %cst = arith.constant 0.000000e+00 : f32
    %0 = vector.broadcast %cst : f32 to vector<2x1x16x128xf32>
    %c0 = arith.constant 0 : index
    %c0_0 = arith.constant 0 : index
    %c0_1 = arith.constant 0 : index
    %c0_2 = arith.constant 0 : index
    %1 = vector.load %arg11[%c0, %c0_0, %c0_1, %c0_2] : memref<2x10x16x128xf32, #tpu.memory_space<vmem>>, vector<2x1x16x128xf32>
    tpu.vector_store %arg11[%c0, %c0_0, %c0_1, %c0_2], %0 {strides = array<i32>} : memref<2x10x16x128xf32, #tpu.memory_space<vmem>>, vector<2x1x16x128xf32>,
    %c0_3 = arith.constant 0 : index
    %c9 = arith.constant 9 : index
    %c0_4 = arith.constant 0 : index
    %c0_5 = arith.constant 0 : index
    %2 = vector.load %arg11[%c0_3, %c9, %c0_4, %c0_5] : memref<2x10x16x128xf32, #tpu.memory_space<vmem>>, vector<2x1x16x128xf32>
    tpu.vector_store %arg11[%c0_3, %c9, %c0_4, %c0_5], %0 {strides = array<i32>} : memref<2x10x16x128xf32, #tpu.memory_space<vmem>>, vector<2x1x16x128xf32>,
    %cst_6 = arith.constant 0.000000e+00 : f32
    %3 = vector.broadcast %cst_6 : f32 to vector<2x8x1x128xf32>
    %c0_7 = arith.constant 0 : index
    %c1 = arith.constant 1 : index
    %c0_8 = arith.constant 0 : index
    %c0_9 = arith.constant 0 : index
    %4 = vector.load %arg11[%c0_7, %c1, %c0_8, %c0_9] : memref<2x10x16x128xf32, #tpu.memory_space<vmem>>, vector<2x8x1x128xf32>
    tpu.vector_store %arg11[%c0_7, %c1, %c0_8, %c0_9], %3 {strides = array<i32>} : memref<2x10x16x128xf32, #tpu.memory_space<vmem>>, vector<2x8x1x128xf32>,
    %c0_10 = arith.constant 0 : index
    %c1_11 = arith.constant 1 : index
    %c9_12 = arith.constant 9 : index
    %c0_13 = arith.constant 0 : index
    %5 = vector.load %arg11[%c0_10, %c1_11, %c9_12, %c0_13] : memref<2x10x16x128xf32, #tpu.memory_space<vmem>>, vector<2x8x1x128xf32>
    tpu.vector_store %arg11[%c0_10, %c1_11, %c9_12, %c0_13], %3 {strides = array<i32>} : memref<2x10x16x128xf32, #tpu.memory_space<vmem>>, vector<2x8x1x128xf32>,
    %cst_14 = arith.constant 0.000000e+00 : f32
    %6 = vector.broadcast %cst_14 : f32 to vector<2x8x8x124xf32>
    %c0_15 = arith.constant 0 : index
    %c1_16 = arith.constant 1 : index
    %c1_17 = arith.constant 1 : index
    %c4 = arith.constant 4 : index
    %7 = vector.load %arg11[%c0_15, %c1_16, %c1_17, %c4] : memref<2x10x16x128xf32, #tpu.memory_space<vmem>>, vector<2x8x8x124xf32>
    tpu.vector_store %arg11[%c0_15, %c1_16, %c1_17, %c4], %6 {strides = array<i32>} : memref<2x10x16x128xf32, #tpu.memory_space<vmem>>, vector<2x8x8x124xf32>,
    %c0_18 = arith.constant 0 : index
    %c0_19 = arith.constant 0 : index
    %c0_20 = arith.constant 0 : index
    %c0_21 = arith.constant 0 : index
    %c0_22 = arith.constant 0 : index
    %c0_23 = arith.constant 0 : index
    %8 = vector.load %arg1[%c0_18, %c0_19, %c0_20, %c0_21, %c0_22, %c0_23] : memref<2x2x2x8x8x4xf32, #tpu.memory_space<vmem>>, vector<1x1x2x8x8x4xf32>
    %9 = vector.shape_cast %8 : vector<1x1x2x8x8x4xf32> to vector<2x8x8x4xf32>
    %c0_24 = arith.constant 0 : index
    %c1_25 = arith.constant 1 : index
    %c0_26 = arith.constant 0 : index
    %c0_27 = arith.constant 0 : index
    %c0_28 = arith.constant 0 : index
    %c0_29 = arith.constant 0 : index
    %10 = vector.load %arg1[%c0_24, %c1_25, %c0_26, %c0_27, %c0_28, %c0_29] : memref<2x2x2x8x8x4xf32, #tpu.memory_space<vmem>>, vector<1x1x2x8x8x4xf32>
    %11 = vector.shape_cast %10 : vector<1x1x2x8x8x4xf32> to vector<2x8x8x4xf32>
    %12 = arith.maximumf %9, %11 : vector<2x8x8x4xf32>
    %c1_30 = arith.constant 1 : index
    %c0_31 = arith.constant 0 : index
    %c0_32 = arith.constant 0 : index
    %c0_33 = arith.constant 0 : index
    %c0_34 = arith.constant 0 : index
    %c0_35 = arith.constant 0 : index
    %13 = vector.load %arg1[%c1_30, %c0_31, %c0_32, %c0_33, %c0_34, %c0_35] : memref<2x2x2x8x8x4xf32, #tpu.memory_space<vmem>>, vector<1x1x2x8x8x4xf32>
    %14 = vector.shape_cast %13 : vector<1x1x2x8x8x4xf32> to vector<2x8x8x4xf32>
    %c1_36 = arith.constant 1 : index
    %c1_37 = arith.constant 1 : index
    %c0_38 = arith.constant 0 : index
    %c0_39 = arith.constant 0 : index
    %c0_40 = arith.constant 0 : index
    %c0_41 = arith.constant 0 : index
    %15 = vector.load %arg1[%c1_36, %c1_37, %c0_38, %c0_39, %c0_40, %c0_41] : memref<2x2x2x8x8x4xf32, #tpu.memory_space<vmem>>, vector<1x1x2x8x8x4xf32>
    %16 = vector.shape_cast %15 : vector<1x1x2x8x8x4xf32> to vector<2x8x8x4xf32>
    %17 = arith.maximumf %14, %16 : vector<2x8x8x4xf32>
    %18 = arith.maximumf %12, %17 : vector<2x8x8x4xf32>
    %c0_42 = arith.constant 0 : index
    %c1_43 = arith.constant 1 : index
    %c1_44 = arith.constant 1 : index
    %c0_45 = arith.constant 0 : index
    %19 = vector.load %arg11[%c0_42, %c1_43, %c1_44, %c0_45] : memref<2x10x16x128xf32, #tpu.memory_space<vmem>>, vector<2x8x8x4xf32>
    tpu.vector_store %arg11[%c0_42, %c1_43, %c1_44, %c0_45], %18 {strides = array<i32>} : memref<2x10x16x128xf32, #tpu.memory_space<vmem>>, vector<2x8x8x4xf32>,
    %c0_46 = arith.constant 0 : index
    %c0_47 = arith.constant 0 : index
    %c0_48 = arith.constant 0 : index
    %c0_49 = arith.constant 0 : index
    %20 = vector.load %arg11[%c0_46, %c0_47, %c0_48, %c0_49] : memref<2x10x16x128xf32, #tpu.memory_space<vmem>>, vector<2x8x8x128xf32>
    %21 = vector.shape_cast %20 : vector<2x8x8x128xf32> to vector<128x128xf32>
    %c0_50 = arith.constant 0 : index
    %c0_51 = arith.constant 0 : index
    %c1_52 = arith.constant 1 : index
    %c0_53 = arith.constant 0 : index
    %22 = vector.load %arg11[%c0_50, %c0_51, %c1_52, %c0_53] : memref<2x10x16x128xf32, #tpu.memory_space<vmem>>, vector<2x8x8x128xf32>
    %23 = vector.shape_cast %22 : vector<2x8x8x128xf32> to vector<128x128xf32>
    %c0_54 = arith.constant 0 : index
    %c0_55 = arith.constant 0 : index
    %c2 = arith.constant 2 : index
    %c0_56 = arith.constant 0 : index
    %24 = vector.load %arg11[%c0_54, %c0_55, %c2, %c0_56] : memref<2x10x16x128xf32, #tpu.memory_space<vmem>>, vector<2x8x8x128xf32>
    %25 = vector.shape_cast %24 : vector<2x8x8x128xf32> to vector<128x128xf32>
    %c0_57 = arith.constant 0 : index
    %c1_58 = arith.constant 1 : index
    %c0_59 = arith.constant 0 : index
    %c0_60 = arith.constant 0 : index
    %26 = vector.load %arg11[%c0_57, %c1_58, %c0_59, %c0_60] : memref<2x10x16x128xf32, #tpu.memory_space<vmem>>, vector<2x8x8x128xf32>
    %27 = vector.shape_cast %26 : vector<2x8x8x128xf32> to vector<128x128xf32>
    %c0_61 = arith.constant 0 : index
    %c1_62 = arith.constant 1 : index
    %c1_63 = arith.constant 1 : index
    %c0_64 = arith.constant 0 : index
    %28 = vector.load %arg11[%c0_61, %c1_62, %c1_63, %c0_64] : memref<2x10x16x128xf32, #tpu.memory_space<vmem>>, vector<2x8x8x128xf32>
    %29 = vector.shape_cast %28 : vector<2x8x8x128xf32> to vector<128x128xf32>
    %c0_65 = arith.constant 0 : index
    %c1_66 = arith.constant 1 : index
    %c2_67 = arith.constant 2 : index
    %c0_68 = arith.constant 0 : index
    %30 = vector.load %arg11[%c0_65, %c1_66, %c2_67, %c0_68] : memref<2x10x16x128xf32, #tpu.memory_space<vmem>>, vector<2x8x8x128xf32>
    %31 = vector.shape_cast %30 : vector<2x8x8x128xf32> to vector<128x128xf32>
    %c0_69 = arith.constant 0 : index
    %c2_70 = arith.constant 2 : index
    %c0_71 = arith.constant 0 : index
    %c0_72 = arith.constant 0 : index
    %32 = vector.load %arg11[%c0_69, %c2_70, %c0_71, %c0_72] : memref<2x10x16x128xf32, #tpu.memory_space<vmem>>, vector<2x8x8x128xf32>
    %33 = vector.shape_cast %32 : vector<2x8x8x128xf32> to vector<128x128xf32>
    %c0_73 = arith.constant 0 : index
    %c2_74 = arith.constant 2 : index
    %c1_75 = arith.constant 1 : index
    %c0_76 = arith.constant 0 : index
    %34 = vector.load %arg11[%c0_73, %c2_74, %c1_75, %c0_76] : memref<2x10x16x128xf32, #tpu.memory_space<vmem>>, vector<2x8x8x128xf32>
    %35 = vector.shape_cast %34 : vector<2x8x8x128xf32> to vector<128x128xf32>
    %c0_77 = arith.constant 0 : index
    %c2_78 = arith.constant 2 : index
    %c2_79 = arith.constant 2 : index
    %c0_80 = arith.constant 0 : index
    %36 = vector.load %arg11[%c0_77, %c2_78, %c2_79, %c0_80] : memref<2x10x16x128xf32, #tpu.memory_space<vmem>>, vector<2x8x8x128xf32>
    %37 = vector.shape_cast %36 : vector<2x8x8x128xf32> to vector<128x128xf32>
    %38 = tpu.concatenate %21, %23, %25, %27, %29, %31, %33, %35, %37 in 1 : vector<128x128xf32>, vector<128x128xf32>, vector<128x128xf32>, vector<128x128xf32>, vector<128x128xf32>, vector<128x128xf32>, vector<128x128xf32>, vector<128x128xf32>, vector<128x128xf32> -> vector<128x1152xf32>
    %c0_81 = arith.constant 0 : index
    %c0_82 = arith.constant 0 : index
    %39 = vector.load %arg2[%c0_81, %c0_82] : memref<1152x128xf32, #tpu.memory_space<vmem>>, vector<1152x128xf32>
    %cst_83 = arith.constant dense<0.000000e+00> : vector<128x128xf32>
    %40 = tpu.matmul %38, %39, %cst_83 {dimension_numbers = #tpu.dot_dimension_numbers<[1], [0], [0], [1], [0, 0, 1, 1], [], []>} : vector<128x1152xf32>, vector<1152x128xf32>, vector<128x128xf32> -> vector<128x128xf32>
    %c0_84 = arith.constant 0 : index
    %c0_85 = arith.constant 0 : index
    %41 = vector.load %arg3[%c0_84, %c0_85] : memref<1x128xf32, #tpu.memory_space<vmem>>, vector<1x128xf32>
    %42 = vector.broadcast %41 : vector<1x128xf32> to vector<128x128xf32>
    %43 = arith.addf %40, %42 : vector<128x128xf32>
    %cst_86 = arith.constant 0.000000e+00 : f32
    %44 = vector.broadcast %cst_86 : f32 to vector<128x128xf32>
    %45 = arith.maximumf %43, %44 : vector<128x128xf32>
    %cst_87 = arith.constant dense<0.000000e+00> : vector<128xf32>
    %46 = vector.multi_reduction <add>, %45, %cst_87 [0] : vector<128x128xf32> to vector<128xf32>
    %47 = vector.shape_cast %46 : vector<128xf32> to vector<1x128xf32>
    %cst_88 = arith.constant 7.812500e-03 : f32
    %48 = vector.broadcast %cst_88 : f32 to vector<1x128xf32>
    %49 = arith.mulf %47, %48 : vector<1x128xf32>
    %50 = arith.mulf %45, %45 : vector<128x128xf32>
    %cst_89 = arith.constant dense<0.000000e+00> : vector<128xf32>
    %51 = vector.multi_reduction <add>, %50, %cst_89 [0] : vector<128x128xf32> to vector<128xf32>
    %52 = vector.shape_cast %51 : vector<128xf32> to vector<1x128xf32>
    %cst_90 = arith.constant 7.812500e-03 : f32
    %53 = vector.broadcast %cst_90 : f32 to vector<1x128xf32>
    %54 = arith.mulf %52, %53 : vector<1x128xf32>
    %55 = arith.mulf %49, %49 : vector<1x128xf32>
    %56 = arith.subf %54, %55 : vector<1x128xf32>
    %c0_91 = arith.constant 0 : index
    %c0_92 = arith.constant 0 : index
    %57 = vector.load %arg4[%c0_91, %c0_92] : memref<1x128xf32, #tpu.memory_space<vmem>>, vector<1x128xf32>
    %cst_93 = arith.constant 9.99999974E-6 : f32
    %58 = vector.broadcast %cst_93 : f32 to vector<1x128xf32>
    %59 = arith.addf %56, %58 : vector<1x128xf32>
    %60 = math.rsqrt %59 : vector<1x128xf32>
    %61 = arith.mulf %57, %60 : vector<1x128xf32>
    %c0_94 = arith.constant 0 : index
    %c0_95 = arith.constant 0 : index
    %62 = vector.load %arg5[%c0_94, %c0_95] : memref<1x128xf32, #tpu.memory_space<vmem>>, vector<1x128xf32>
    %63 = arith.mulf %49, %61 : vector<1x128xf32>
    %64 = arith.subf %62, %63 : vector<1x128xf32>
    %65 = vector.broadcast %61 : vector<1x128xf32> to vector<128x128xf32>
    %66 = arith.mulf %45, %65 : vector<128x128xf32>
    %67 = vector.broadcast %64 : vector<1x128xf32> to vector<128x128xf32>
    %68 = arith.addf %66, %67 : vector<128x128xf32>
    %69 = vector.shape_cast %68 : vector<128x128xf32> to vector<2x8x8x128xf32>
    %c0_96 = arith.constant 0 : index
    %c1_97 = arith.constant 1 : index
    %c1_98 = arith.constant 1 : index
    %c0_99 = arith.constant 0 : index
    %70 = vector.load %arg11[%c0_96, %c1_97, %c1_98, %c0_99] : memref<2x10x16x128xf32, #tpu.memory_space<vmem>>, vector<2x8x8x128xf32>
    tpu.vector_store %arg11[%c0_96, %c1_97, %c1_98, %c0_99], %69 {strides = array<i32>} : memref<2x10x16x128xf32, #tpu.memory_space<vmem>>, vector<2x8x8x128xf32>,
    %c0_100 = arith.constant 0 : index
    %c0_101 = arith.constant 0 : index
    %c0_102 = arith.constant 0 : index
    %c0_103 = arith.constant 0 : index
    %71 = vector.load %arg11[%c0_100, %c0_101, %c0_102, %c0_103] : memref<2x10x16x128xf32, #tpu.memory_space<vmem>>, vector<2x8x8x128xf32>
    %72 = vector.shape_cast %71 : vector<2x8x8x128xf32> to vector<128x128xf32>
    %c0_104 = arith.constant 0 : index
    %c0_105 = arith.constant 0 : index
    %c1_106 = arith.constant 1 : index
    %c0_107 = arith.constant 0 : index
    %73 = vector.load %arg11[%c0_104, %c0_105, %c1_106, %c0_107] : memref<2x10x16x128xf32, #tpu.memory_space<vmem>>, vector<2x8x8x128xf32>
    %74 = vector.shape_cast %73 : vector<2x8x8x128xf32> to vector<128x128xf32>
    %c0_108 = arith.constant 0 : index
    %c0_109 = arith.constant 0 : index
    %c2_110 = arith.constant 2 : index
    %c0_111 = arith.constant 0 : index
    %75 = vector.load %arg11[%c0_108, %c0_109, %c2_110, %c0_111] : memref<2x10x16x128xf32, #tpu.memory_space<vmem>>, vector<2x8x8x128xf32>
    %76 = vector.shape_cast %75 : vector<2x8x8x128xf32> to vector<128x128xf32>
    %c0_112 = arith.constant 0 : index
    %c1_113 = arith.constant 1 : index
    %c0_114 = arith.constant 0 : index
    %c0_115 = arith.constant 0 : index
    %77 = vector.load %arg11[%c0_112, %c1_113, %c0_114, %c0_115] : memref<2x10x16x128xf32, #tpu.memory_space<vmem>>, vector<2x8x8x128xf32>
    %78 = vector.shape_cast %77 : vector<2x8x8x128xf32> to vector<128x128xf32>
    %c0_116 = arith.constant 0 : index
    %c1_117 = arith.constant 1 : index
    %c1_118 = arith.constant 1 : index
    %c0_119 = arith.constant 0 : index
    %79 = vector.load %arg11[%c0_116, %c1_117, %c1_118, %c0_119] : memref<2x10x16x128xf32, #tpu.memory_space<vmem>>, vector<2x8x8x128xf32>
    %80 = vector.shape_cast %79 : vector<2x8x8x128xf32> to vector<128x128xf32>
    %c0_120 = arith.constant 0 : index
    %c1_121 = arith.constant 1 : index
    %c2_122 = arith.constant 2 : index
    %c0_123 = arith.constant 0 : index
    %81 = vector.load %arg11[%c0_120, %c1_121, %c2_122, %c0_123] : memref<2x10x16x128xf32, #tpu.memory_space<vmem>>, vector<2x8x8x128xf32>
    %82 = vector.shape_cast %81 : vector<2x8x8x128xf32> to vector<128x128xf32>
    %c0_124 = arith.constant 0 : index
    %c2_125 = arith.constant 2 : index
    %c0_126 = arith.constant 0 : index
    %c0_127 = arith.constant 0 : index
    %83 = vector.load %arg11[%c0_124, %c2_125, %c0_126, %c0_127] : memref<2x10x16x128xf32, #tpu.memory_space<vmem>>, vector<2x8x8x128xf32>
    %84 = vector.shape_cast %83 : vector<2x8x8x128xf32> to vector<128x128xf32>
    %c0_128 = arith.constant 0 : index
    %c2_129 = arith.constant 2 : index
    %c1_130 = arith.constant 1 : index
    %c0_131 = arith.constant 0 : index
    %85 = vector.load %arg11[%c0_128, %c2_129, %c1_130, %c0_131] : memref<2x10x16x128xf32, #tpu.memory_space<vmem>>, vector<2x8x8x128xf32>
    %86 = vector.shape_cast %85 : vector<2x8x8x128xf32> to vector<128x128xf32>
    %c0_132 = arith.constant 0 : index
    %c2_133 = arith.constant 2 : index
    %c2_134 = arith.constant 2 : index
    %c0_135 = arith.constant 0 : index
    %87 = vector.load %arg11[%c0_132, %c2_133, %c2_134, %c0_135] : memref<2x10x16x128xf32, #tpu.memory_space<vmem>>, vector<2x8x8x128xf32>
    %88 = vector.shape_cast %87 : vector<2x8x8x128xf32> to vector<128x128xf32>
    %89 = tpu.concatenate %72, %74, %76, %78, %80, %82, %84, %86, %88 in 1 : vector<128x128xf32>, vector<128x128xf32>, vector<128x128xf32>, vector<128x128xf32>, vector<128x128xf32>, vector<128x128xf32>, vector<128x128xf32>, vector<128x128xf32>, vector<128x128xf32> -> vector<128x1152xf32>
    %c0_136 = arith.constant 0 : index
    %c0_137 = arith.constant 0 : index
    %90 = vector.load %arg6[%c0_136, %c0_137] : memref<1152x128xf32, #tpu.memory_space<vmem>>, vector<1152x128xf32>
    %cst_138 = arith.constant dense<0.000000e+00> : vector<128x128xf32>
    %91 = tpu.matmul %89, %90, %cst_138 {dimension_numbers = #tpu.dot_dimension_numbers<[1], [0], [0], [1], [0, 0, 1, 1], [], []>} : vector<128x1152xf32>, vector<1152x128xf32>, vector<128x128xf32> -> vector<128x128xf32>
    %c0_139 = arith.constant 0 : index
    %c0_140 = arith.constant 0 : index
    %92 = vector.load %arg7[%c0_139, %c0_140] : memref<1x128xf32, #tpu.memory_space<vmem>>, vector<1x128xf32>
    %93 = vector.broadcast %92 : vector<1x128xf32> to vector<128x128xf32>
    %94 = arith.addf %91, %93 : vector<128x128xf32>
    %cst_141 = arith.constant 0.000000e+00 : f32
    %95 = vector.broadcast %cst_141 : f32 to vector<128x128xf32>
    %96 = arith.maximumf %94, %95 : vector<128x128xf32>
    %cst_142 = arith.constant dense<0.000000e+00> : vector<128xf32>
    %97 = vector.multi_reduction <add>, %96, %cst_142 [0] : vector<128x128xf32> to vector<128xf32>
    %98 = vector.shape_cast %97 : vector<128xf32> to vector<1x128xf32>
    %cst_143 = arith.constant 7.812500e-03 : f32
    %99 = vector.broadcast %cst_143 : f32 to vector<1x128xf32>
    %100 = arith.mulf %98, %99 : vector<1x128xf32>
    %101 = arith.mulf %96, %96 : vector<128x128xf32>
    %cst_144 = arith.constant dense<0.000000e+00> : vector<128xf32>
    %102 = vector.multi_reduction <add>, %101, %cst_144 [0] : vector<128x128xf32> to vector<128xf32>
    %103 = vector.shape_cast %102 : vector<128xf32> to vector<1x128xf32>
    %cst_145 = arith.constant 7.812500e-03 : f32
    %104 = vector.broadcast %cst_145 : f32 to vector<1x128xf32>
    %105 = arith.mulf %103, %104 : vector<1x128xf32>
    %106 = arith.mulf %100, %100 : vector<1x128xf32>
    %107 = arith.subf %105, %106 : vector<1x128xf32>
    %c0_146 = arith.constant 0 : index
    %c0_147 = arith.constant 0 : index
    %108 = vector.load %arg8[%c0_146, %c0_147] : memref<1x128xf32, #tpu.memory_space<vmem>>, vector<1x128xf32>
    %cst_148 = arith.constant 9.99999974E-6 : f32
    %109 = vector.broadcast %cst_148 : f32 to vector<1x128xf32>
    %110 = arith.addf %107, %109 : vector<1x128xf32>
    %111 = math.rsqrt %110 : vector<1x128xf32>
    %112 = arith.mulf %108, %111 : vector<1x128xf32>
    %c0_149 = arith.constant 0 : index
    %c0_150 = arith.constant 0 : index
    %113 = vector.load %arg9[%c0_149, %c0_150] : memref<1x128xf32, #tpu.memory_space<vmem>>, vector<1x128xf32>
    %114 = arith.mulf %100, %112 : vector<1x128xf32>
    %115 = arith.subf %113, %114 : vector<1x128xf32>
    %116 = vector.broadcast %112 : vector<1x128xf32> to vector<128x128xf32>
    %117 = arith.mulf %96, %116 : vector<128x128xf32>
    %118 = vector.broadcast %115 : vector<1x128xf32> to vector<128x128xf32>
    %119 = arith.addf %117, %118 : vector<128x128xf32>
    %c0_151 = arith.constant 0 : index
    %c0_152 = arith.constant 0 : index
    %120 = vector.load %arg10[%c0_151, %c0_152] : memref<128x128xf32, #tpu.memory_space<vmem>>, vector<128x128xf32>
    tpu.vector_store %arg10[%c0_151, %c0_152], %119 {strides = array<i32>} : memref<128x128xf32, #tpu.memory_space<vmem>>, vector<128x128xf32>,
    return
  }
  func.func @transform_0(%arg0: i32) -> (i32, i32, i32, i32, i32, i32) {
    %c0_i32 = arith.constant 0 : i32
    %c0_i32_0 = arith.constant 0 : i32
    %c0_i32_1 = arith.constant 0 : i32
    %c0_i32_2 = arith.constant 0 : i32
    %c0_i32_3 = arith.constant 0 : i32
    %c0_i32_4 = arith.constant 0 : i32
    %c0_i32_5 = arith.constant 0 : i32
    return %c0_i32, %c0_i32_0, %c0_i32_1, %c0_i32_2, %c0_i32_3, %c0_i32_4 : i32, i32, i32, i32, i32, i32
  }
  func.func @transform_1(%arg0: i32) -> (i32, i32) {
    %c0_i32 = arith.constant 0 : i32
    %c0_i32_0 = arith.constant 0 : i32
    %c0_i32_1 = arith.constant 0 : i32
    return %c0_i32, %c0_i32_0 : i32, i32
  }
  func.func @transform_2(%arg0: i32) -> (i32, i32) {
    %c0_i32 = arith.constant 0 : i32
    %c0_i32_0 = arith.constant 0 : i32
    %c0_i32_1 = arith.constant 0 : i32
    return %c0_i32, %c0_i32_0 : i32, i32
  }
  func.func @transform_3(%arg0: i32) -> (i32, i32) {
    %c0_i32 = arith.constant 0 : i32
    %c0_i32_0 = arith.constant 0 : i32
    %c0_i32_1 = arith.constant 0 : i32
    return %c0_i32, %c0_i32_0 : i32, i32
  }
  func.func @transform_4(%arg0: i32) -> (i32, i32) {
    %c0_i32 = arith.constant 0 : i32
    %c0_i32_0 = arith.constant 0 : i32
    %c0_i32_1 = arith.constant 0 : i32
    return %c0_i32, %c0_i32_0 : i32, i32
  }
  func.func @transform_5(%arg0: i32) -> (i32, i32) {
    %c0_i32 = arith.constant 0 : i32
    %c0_i32_0 = arith.constant 0 : i32
    %c0_i32_1 = arith.constant 0 : i32
    return %c0_i32, %c0_i32_0 : i32, i32
  }
  func.func @transform_6(%arg0: i32) -> (i32, i32) {
    %c0_i32 = arith.constant 0 : i32
    %c0_i32_0 = arith.constant 0 : i32
    %c0_i32_1 = arith.constant 0 : i32
    return %c0_i32, %c0_i32_0 : i32, i32
  }
  func.func @transform_7(%arg0: i32) -> (i32, i32) {
    %c0_i32 = arith.constant 0 : i32
    %c0_i32_0 = arith.constant 0 : i32
    %c0_i32_1 = arith.constant 0 : i32
    return %c0_i32, %c0_i32_0 : i32, i32
  }
  func.func @transform_8(%arg0: i32) -> (i32, i32) {
    %c0_i32 = arith.constant 0 : i32
    %c0_i32_0 = arith.constant 0 : i32
    %c0_i32_1 = arith.constant 0 : i32
    return %c0_i32, %c0_i32_0 : i32, i32
  }
  func.func @transform_9(%arg0: i32) -> (i32, i32) {
    %c0_i32 = arith.constant 0 : i32
    %c0_i32_0 = arith.constant 0 : i32
    %c0_i32_1 = arith.constant 0 : i32
    return %c0_i32, %c0_i32_0 : i32, i32
  }
}

</mosaic_0001>

<bundles_post_ra>
// kernel: down_block_forward.1
= control target key start
LH: loop header
LB: loop body
LE: loop exit
PB: predicated region body
PF: predicated region fallthrough
CT: control target
= control target key end

     0   :  { %vm74_vm0 = vcmask 1047584   ;;  %v3751_v3 = vmov 0.0   ;;  %vm206_vm1 = vcmask 31744   ;;  %s5866_s1 = inlined_call_operand.vmem [shape: f32[1152,128], index: 1, kind: input, shape index: {}]   ;;  %s5867_s0 = inlined_call_operand.vmem [shape: f32[2,2,2,8,8,4], index: 0, kind: input, shape index: {}]   ;;  %s5868_s2 = inlined_call_operand.vmem [shape: f32[1,128], index: 2, kind: input, shape index: {}]   ;;  %s5869_s5 = inlined_call_operand.vmem [shape: f32[1152,128], index: 5, kind: input, shape index: {}]   ;;  %s5870_s3 = inlined_call_operand.vmem [shape: f32[1,128], index: 3, kind: input, shape index: {}]   ;;  %s5871_s4 = inlined_call_operand.vmem [shape: f32[1,128], index: 4, kind: input, shape index: {}]   ;;  %s5872_s6 = inlined_call_operand.vmem [shape: f32[1,128], index: 6, kind: input, shape index: {}]   ;;  %s5873_s7 = inlined_call_operand.vmem [shape: f32[1,128], index: 7, kind: input, shape index: {}]   ;;  %s5874_s8 = inlined_call_operand.vmem [shape: f32[1,128], index: 8, kind: input, shape index: {}]   ;;  %s5875_s9 = inlined_call_operand.vmem [shape: f32[128,128], index: 9, kind: output, shape index: {}]  }
   0x1   :  { %v3805_v0 = vld [vmem:[%s5866_s1 + $0x80] sm:$0xff]  ;;  %v3810_v1 = vld [vmem:[%s5866_s1 + $0x88] sm:$0xff]  ;;  %32 = vst [vmem:[#allocation2] sm:$0xff] %v3751_v3  ;;  %33 = vst [vmem:[#allocation2 + $0x8] sm:$0xff] %v3751_v3 }
   0x2   :  { %v3815_v2 = vld [vmem:[%s5866_s1] sm:$0xff]  ;;  %34 = vst [vmem:[#allocation2 + $0xa0] sm:$0xff] %v3751_v3  ;;  %35 = vst [vmem:[#allocation2 + $0xa8] sm:$0xff] %v3751_v3  ;;  %v3424_v4 = vpack.c.bf16 %v3810_v1, %v3805_v0  ;;  %v369_v5 = vld [vmem:[%s5866_s1 + $0x8] sm:$0xff] }
   0x3   :  { %37 = vst [vmem:[#allocation2 + $0x90] sm:$0xff] %v3751_v3  ;;  %38 = vst [vmem:[#allocation2 + $0x98] sm:$0xff] %v3751_v3  ;;  %v416_v6 = vld [vmem:[%s5866_s1 + $0x180] sm:$0xff]  ;;  %v417_v7 = vld [vmem:[%s5866_s1 + $0x188] sm:$0xff]  ;;  %v3426_v8 = vpack.c.bf16 %v369_v5, %v3815_v2 }
   0x4   :  { %39 = vst [vmem:[#allocation2 + $0x130] sm:$0xff] %v3751_v3  ;;  %40 = vst [vmem:[#allocation2 + $0x138] sm:$0xff] %v3751_v3  ;;  %v3456_v9 = vpack.c.bf16 %v417_v7, %v416_v6  ;;  %v400_v10 = vld [vmem:[%s5866_s1 + $0x100] sm:$0xff]  ;;  %v401_v11 = vld [vmem:[%s5866_s1 + $0x108] sm:$0xff]  ;;  %3425 = vmatprep.subr.bf16.mxu0 %v3424_v4 }
   0x5   :  { %42 = vst [vmem:[#allocation2 + $0x10] sm:$0x1] %v3751_v3  ;;  %43 = vst [vmem:[#allocation2 + $0x20] sm:$0x1] %v3751_v3  ;;  %v386_v12 = vld [vmem:[%s5866_s1 + $0x90] sm:$0xff]  ;;  %v3458_v13 = vpack.c.bf16 %v401_v11, %v400_v10  ;;  %v387_v14 = vld [vmem:[%s5866_s1 + $0x98] sm:$0xff]  ;;  %3427 = vmatpush3.bf16.msra.mxu0 %v3426_v8 }
   0x6   :  { %44 = vst [vmem:[#allocation2 + $0x30] sm:$0x1] %v3751_v3  ;;  %45 = vst [vmem:[#allocation2 + $0x40] sm:$0x1] %v3751_v3  ;;  %v370_v15 = vld [vmem:[%s5866_s1 + $0x10] sm:$0xff]  ;;  %v371_v16 = vld [vmem:[%s5866_s1 + $0x18] sm:$0xff]  ;;  %3457 = vmatprep.subr.bf16.mxu1 %v3456_v9  ;;  %v3428_v17 = vpack.c.bf16 %v387_v14, %v386_v12 }
   0x7   :  { %46 = vst [vmem:[#allocation2 + $0x50] sm:$0x1] %v3751_v3  ;;  %47 = vst [vmem:[#allocation2 + $0x60] sm:$0x1] %v3751_v3  ;;  %v3430_v18 = vpack.c.bf16 %v371_v16, %v370_v15  ;;  %v418_v19 = vld [vmem:[%s5866_s1 + $0x190] sm:$0xff]  ;;  %v419_v20 = vld [vmem:[%s5866_s1 + $0x198] sm:$0xff]  ;;  %3459 = vmatpush3.bf16.msra.mxu1 %v3458_v13 }
   0x8   :  { %48 = vst [vmem:[#allocation2 + $0x70] sm:$0x1] %v3751_v3  ;;  %49 = vst [vmem:[#allocation2 + $0x80] sm:$0x1] %v3751_v3  ;;  %v402_v21 = vld [vmem:[%s5866_s1 + $0x110] sm:$0xff]  ;;  %v3460_v22 = vpack.c.bf16 %v419_v20, %v418_v19  ;;  %v403_v23 = vld [vmem:[%s5866_s1 + $0x118] sm:$0xff]  ;;  %3429 = vmatprep.subr.bf16.mxu0 %v3428_v17 }
   0x9   :  { %50 = vst [vmem:[#allocation2 + $0xb0] sm:$0x1] %v3751_v3  ;;  %51 = vst [vmem:[#allocation2 + $0xc0] sm:$0x1] %v3751_v3  ;;  %v388_v24 = vld [vmem:[%s5866_s1 + $0xa0] sm:$0xff]  ;;  %v389_v25 = vld [vmem:[%s5866_s1 + $0xa8] sm:$0xff]  ;;  %v3462_v26 = vpack.c.bf16 %v403_v23, %v402_v21  ;;  %3431 = vmatpush3.bf16.msra.mxu0 %v3430_v18 }
   0xa   :  { %52 = vst [vmem:[#allocation2 + $0xd0] sm:$0x1] %v3751_v3  ;;  %53 = vst [vmem:[#allocation2 + $0xe0] sm:$0x1] %v3751_v3  ;;  %v3432_v27 = vpack.c.bf16 %v389_v25, %v388_v24  ;;  %v372_v28 = vld [vmem:[%s5866_s1 + $0x20] sm:$0xff]  ;;  %v373_v29 = vld [vmem:[%s5866_s1 + $0x28] sm:$0xff]  ;;  %3461 = vmatprep.subr.bf16.mxu1 %v3460_v22 }
   0xb   :  { %54 = vst [vmem:[#allocation2 + $0xf0] sm:$0x1] %v3751_v3  ;;  %55 = vst [vmem:[#allocation2 + $0x100] sm:$0x1] %v3751_v3  ;;  %v420_v30 = vld [vmem:[%s5866_s1 + $0x1a0] sm:$0xff]  ;;  %v421_v31 = vld [vmem:[%s5866_s1 + $0x1a8] sm:$0xff]  ;;  %v3434_v34 = vpack.c.bf16 %v373_v29, %v372_v28  ;;  %3463 = vmatpush3.bf16.msra.mxu1 %v3462_v26 }
   0xc   :  { %56 = vst [vmem:[#allocation2 + $0x110] sm:$0x1] %v3751_v3  ;;  %57 = vst [vmem:[#allocation2 + $0x120] sm:$0x1] %v3751_v3  ;;  %v404_v32 = vld [vmem:[%s5866_s1 + $0x120] sm:$0xff]  ;;  %v405_v33 = vld [vmem:[%s5866_s1 + $0x128] sm:$0xff]  ;;  %v3464_v35 = vpack.c.bf16 %v421_v31, %v420_v30  ;;  %3433 = vmatprep.subr.bf16.mxu0 %v3432_v27 }
   0xd   :  { %58 = vst [vmem:[#allocation2 + $0x19] sm:$0x1] %v3751_v3  ;;  %59 = vst [vmem:[#allocation2 + $0x29] sm:$0x1] %v3751_v3  ;;  %v390_v36 = vld [vmem:[%s5866_s1 + $0xb0] sm:$0xff]  ;;  %v391_v37 = vld [vmem:[%s5866_s1 + $0xb8] sm:$0xff]  ;;  %v3466_v39 = vpack.c.bf16 %v405_v33, %v404_v32  ;;  %3435 = vmatpush3.bf16.msra.mxu0 %v3434_v34 }
   0xe   :  { %60 = vst [vmem:[#allocation2 + $0x39] sm:$0x1] %v3751_v3  ;;  %61 = vst [vmem:[#allocation2 + $0x49] sm:$0x1] %v3751_v3  ;;  %v374_v38 = vld [vmem:[%s5866_s1 + $0x30] sm:$0xff]  ;;  %v3436_v40 = vpack.c.bf16 %v391_v37, %v390_v36  ;;  %v375_v41 = vld [vmem:[%s5866_s1 + $0x38] sm:$0xff]  ;;  %3465 = vmatprep.subr.bf16.mxu1 %v3464_v35 }
   0xf   :  { %62 = vst [vmem:[#allocation2 + $0x59] sm:$0x1] %v3751_v3  ;;  %63 = vst [vmem:[#allocation2 + $0x69] sm:$0x1] %v3751_v3  ;;  %v422_v42 = vld [vmem:[%s5866_s1 + $0x1b0] sm:$0xff]  ;;  %v423_v43 = vld [vmem:[%s5866_s1 + $0x1b8] sm:$0xff]  ;;  %v3438_v49 = vpack.c.bf16 %v375_v41, %v374_v38  ;;  %3467 = vmatpush3.bf16.msra.mxu1 %v3466_v39 }
  0x10   :  { %64 = vst [vmem:[#allocation2 + $0x79] sm:$0x1] %v3751_v3  ;;  %65 = vst [vmem:[#allocation2 + $0x89] sm:$0x1] %v3751_v3  ;;  %v3468_v44 = vpack.c.bf16 %v423_v43, %v422_v42  ;;  %v406_v45 = vld [vmem:[%s5866_s1 + $0x130] sm:$0xff]  ;;  %v407_v46 = vld [vmem:[%s5866_s1 + $0x138] sm:$0xff]  ;;  %3437 = vmatprep.subr.bf16.mxu0 %v3436_v40 }
  0x11   :  { %66 = vst [vmem:[#allocation2 + $0xb9] sm:$0x1] %v3751_v3  ;;  %67 = vst [vmem:[#allocation2 + $0xc9] sm:$0x1] %v3751_v3  ;;  %v392_v47 = vld [vmem:[%s5866_s1 + $0xc0] sm:$0xff]  ;;  %v393_v48 = vld [vmem:[%s5866_s1 + $0xc8] sm:$0xff]  ;;  %v3470_v52 = vpack.c.bf16 %v407_v46, %v406_v45  ;;  %3439 = vmatpush3.bf16.msra.mxu0 %v3438_v49 }
  0x12   :  { %68 = vst [vmem:[#allocation2 + $0xd9] sm:$0x1] %v3751_v3  ;;  %69 = vst [vmem:[#allocation2 + $0xe9] sm:$0x1] %v3751_v3  ;;  %v424_v50 = vld [vmem:[%s5866_s1 + $0x1c0] sm:$0xff]  ;;  %v425_v51 = vld [vmem:[%s5866_s1 + $0x1c8] sm:$0xff]  ;;  %v3440_v53 = vpack.c.bf16 %v393_v48, %v392_v47  ;;  %3469 = vmatprep.subr.bf16.mxu1 %v3468_v44 }
  0x13   :  { %70 = vst [vmem:[#allocation2 + $0xf9] sm:$0x1] %v3751_v3  ;;  %71 = vst [vmem:[#allocation2 + $0x109] sm:$0x1] %v3751_v3  ;;  %v376_v54 = vld [vmem:[%s5866_s1 + $0x40] sm:$0xff]  ;;  %v377_v55 = vld [vmem:[%s5866_s1 + $0x48] sm:$0xff]  ;;  %v3472_v57 = vpack.c.bf16 %v425_v51, %v424_v50  ;;  %3471 = vmatpush3.bf16.msra.mxu1 %v3470_v52 }
  0x14   :  { %72 = vst [vmem:[#allocation2 + $0x119] sm:$0x1] %v3751_v3  ;;  %73 = vst [vmem:[#allocation2 + $0x129] sm:$0x1] %v3751_v3  ;;  %v408_v56 = vld [vmem:[%s5866_s1 + $0x140] sm:$0xff]  ;;  %v409_v58 = vld [vmem:[%s5866_s1 + $0x148] sm:$0xff]  ;;  %v3442_v63 = vpack.c.bf16 %v377_v55, %v376_v54  ;;  %3441 = vmatprep.subr.bf16.mxu0 %v3440_v53 }
  0x15   :  { %75 = vst.msk [vmem:[#allocation2 + $0x11] sm:$0xff] %vm74_vm0, %v3751_v3  ;;  %76 = vst.msk [vmem:[#allocation2 + $0x21] sm:$0xff] %vm74_vm0, %v3751_v3  ;;  %v394_v59 = vld [vmem:[%s5866_s1 + $0xd0] sm:$0xff]  ;;  %v395_v60 = vld [vmem:[%s5866_s1 + $0xd8] sm:$0xff]  ;;  %v3474_v0 = vpack.c.bf16 %v409_v58, %v408_v56  ;;  %3473 = vmatprep.subr.bf16.mxu1 %v3472_v57 }
  0x16   :  { %77 = vst.msk [vmem:[#allocation2 + $0x31] sm:$0xff] %vm74_vm0, %v3751_v3  ;;  %78 = vst.msk [vmem:[#allocation2 + $0x41] sm:$0xff] %vm74_vm0, %v3751_v3  ;;  %v426_v61 = vld [vmem:[%s5866_s1 + $0x1d0] sm:$0xff]  ;;  %v427_v62 = vld [vmem:[%s5866_s1 + $0x1d8] sm:$0xff]  ;;  %v3444_v1 = vpack.c.bf16 %v395_v60, %v394_v59  ;;  %3443 = vmatpush3.bf16.msra.mxu0 %v3442_v63 }
  0x17   :  { %79 = vst.msk [vmem:[#allocation2 + $0x51] sm:$0xff] %vm74_vm0, %v3751_v3  ;;  %80 = vst.msk [vmem:[#allocation2 + $0x61] sm:$0xff] %vm74_vm0, %v3751_v3  ;;  %v378_v2 = vld [vmem:[%s5866_s1 + $0x50] sm:$0xff]  ;;  %v379_v4 = vld [vmem:[%s5866_s1 + $0x58] sm:$0xff]  ;;  %v3476_v6 = vpack.c.bf16 %v427_v62, %v426_v61  ;;  %3475 = vmatpush3.bf16.msra.mxu1 %v3474_v0 }
  0x18   :  { %81 = vst.msk [vmem:[#allocation2 + $0x71] sm:$0xff] %vm74_vm0, %v3751_v3  ;;  %82 = vst.msk [vmem:[#allocation2 + $0x81] sm:$0xff] %vm74_vm0, %v3751_v3  ;;  %v410_v5 = vld [vmem:[%s5866_s1 + $0x150] sm:$0xff]  ;;  %v411_v7 = vld [vmem:[%s5866_s1 + $0x158] sm:$0xff]  ;;  %v3446_v13 = vpack.c.bf16 %v379_v4, %v378_v2  ;;  %3445 = vmatprep.subr.bf16.mxu0 %v3444_v1 }
  0x19   :  { %83 = vst.msk [vmem:[#allocation2 + $0xb1] sm:$0xff] %vm74_vm0, %v3751_v3  ;;  %84 = vst.msk [vmem:[#allocation2 + $0xc1] sm:$0xff] %vm74_vm0, %v3751_v3  ;;  %v396_v8 = vld [vmem:[%s5866_s1 + $0xe0] sm:$0xff]  ;;  %v397_v9 = vld [vmem:[%s5866_s1 + $0xe8] sm:$0xff]  ;;  %v3478_v17 = vpack.c.bf16 %v411_v7, %v410_v5  ;;  %3477 = vmatprep.subr.bf16.mxu1 %v3476_v6 }
  0x1a   :  { %85 = vst.msk [vmem:[#allocation2 + $0xd1] sm:$0xff] %vm74_vm0, %v3751_v3  ;;  %86 = vst.msk [vmem:[#allocation2 + $0xe1] sm:$0xff] %vm74_vm0, %v3751_v3  ;;  %v380_v10 = vld [vmem:[%s5866_s1 + $0x60] sm:$0xff]  ;;  %v429_v12 = vld [vmem:[%s5866_s1 + $0x1e8] sm:$0xff]  ;;  %v3448_v18 = vpack.c.bf16 %v397_v9, %v396_v8  ;;  %3447 = vmatpush3.bf16.msra.mxu0 %v3446_v13 }
  0x1b   :  { %87 = vst.msk [vmem:[#allocation2 + $0xf1] sm:$0xff] %vm74_vm0, %v3751_v3  ;;  %88 = vst.msk [vmem:[#allocation2 + $0x101] sm:$0xff] %vm74_vm0, %v3751_v3  ;;  %v428_v11 = vld [vmem:[%s5866_s1 + $0x1e0] sm:$0xff]  ;;  %v381_v14 = vld [vmem:[%s5866_s1 + $0x68] sm:$0xff]  ;;  %3479 = vmatpush3.bf16.msra.mxu1 %v3478_v17 }
  0x1c   :  { %89 = vst.msk [vmem:[#allocation2 + $0x111] sm:$0xff] %vm74_vm0, %v3751_v3  ;;  %90 = vst.msk [vmem:[#allocation2 + $0x121] sm:$0xff] %vm74_vm0, %v3751_v3  ;;  %v412_v15 = vld [vmem:[%s5866_s1 + $0x160] sm:$0xff]  ;;  %v413_v19 = vld [vmem:[%s5866_s1 + $0x168] sm:$0xff]  ;;  %v3480_v22 = vpack.c.bf16 %v429_v12, %v428_v11  ;;  %v3450_v32 = vpack.c.bf16 %v381_v14, %v380_v10  ;;  %3449 = vmatprep.subr.bf16.mxu0 %v3448_v18 }
  0x1d   :  { %v239_v16 = vld [vmem:[#allocation2 + $0x1] sm:$0xff]  ;;  %v398_v20 = vld [vmem:[%s5866_s1 + $0xf0] sm:$0xff]  ;;  %v399_v21 = vld [vmem:[%s5866_s1 + $0xf8] sm:$0xff]  ;;  %v3482_v37 = vpack.c.bf16 %v413_v19, %v412_v15 }
  0x1e   :  { %v430_v23 = vld [vmem:[%s5866_s1 + $0x1f0] sm:$0xff]  ;;  %583 = vmatprep.mubr.f32.mxu0 %v239_v16  ;;  %v91_v24 = vld [vmem:[%s5867_s0] sm:$0xff]  ;;  %v383_v27 = vld [vmem:[%s5866_s1 + $0x78] sm:$0xff]  ;;  %v3452_v38 = vpack.c.bf16 %v399_v21, %v398_v20  ;;  %3481 = vmatprep.subr.bf16.mxu1 %v3480_v22 }
  0x1f   :  { %v2558_v25 = vld [vmem:[%s5867_s0 + $0x80] sm:$0xff]  ;;  %v382_v26 = vld [vmem:[%s5866_s1 + $0x70] sm:$0xff]  ;;  %v431_v28 = vld [vmem:[%s5866_s1 + $0x1f8] sm:$0xff]  ;;  %3451 = vmatpush3.bf16.msra.mxu0 %v3450_v32  ;;  %3483 = vmatpush3.bf16.msra.mxu1 %v3482_v37 }
  0x20   :  { %v124_v29 = vmax.f32 %v91_v24, %v2558_v25  ;;  %v2574_v30 = vld [vmem:[%s5867_s0 + $0x100] sm:$0xff]  ;;  %v414_v33 = vld [vmem:[%s5866_s1 + $0x170] sm:$0xff]  ;;  %v415_v34 = vld [vmem:[%s5866_s1 + $0x178] sm:$0xff]  ;;  %v3484_v42 = vpack.c.bf16 %v431_v28, %v430_v23  ;;  %v3454_v52 = vpack.c.bf16 %v383_v27, %v382_v26  ;;  %3453 = vmatprep.subr.bf16.mxu0 %v3452_v38 }
  0x21   :  { %v2590_v31 = vld [vmem:[%s5867_s0 + $0x180] sm:$0xff]  ;;  %v92_v36 = vld [vmem:[%s5867_s0 + $0x8] sm:$0xff]  ;;  %v93_v48 = vld [vmem:[%s5867_s0 + $0x10] sm:$0xff]  ;;  %v3486_v59 = vpack.c.bf16 %v415_v34, %v414_v33 }
  0x22   :  { %v174_v35 = vmax.f32 %v2574_v30, %v2590_v31  ;;  %v2559_v39 = vld [vmem:[%s5867_s0 + $0x88] sm:$0xff]  ;;  %v448_v43 = vld [vmem:[%s5866_s1 + $0x280] sm:$0xff]  ;;  %v2560_v49 = vld [vmem:[%s5867_s0 + $0x90] sm:$0xff]  ;;  %3485 = vmatprep.subr.bf16.mxu1 %v3484_v42 }
  0x23   :  { %v2575_v40 = vld [vmem:[%s5867_s0 + $0x108] sm:$0xff]  ;;  %v125_v46 = vmax.f32 %v92_v36, %v2559_v39  ;;  %v2576_v50 = vld [vmem:[%s5867_s0 + $0x110] sm:$0xff]  ;;  %v432_v53 = vld [vmem:[%s5866_s1 + $0x200] sm:$0xff]  ;;  %v126_v56 = vmax.f32 %v93_v48, %v2560_v49  ;;  %3455 = vmatpush3.bf16.msra.mxu0 %v3454_v52  ;;  %3487 = vmatpush3.bf16.msra.mxu1 %v3486_v59 }
  0x24   :  { %v2591_v41 = vld [vmem:[%s5867_s0 + $0x188] sm:$0xff]  ;;  %v190_v45 = vmax.f32 %v124_v29, %v174_v35  ;;  %v2592_v51 = vld [vmem:[%s5867_s0 + $0x190] sm:$0xff]  ;;  %v94_v58 = vld [vmem:[%s5867_s0 + $0x18] sm:$0xff] }
  0x25   :  { %v449_v44 = vld [vmem:[%s5866_s1 + $0x288] sm:$0xff]  ;;  %v175_v47 = vmax.f32 %v2575_v40, %v2591_v41  ;;  %v176_v57 = vmax.f32 %v2576_v50, %v2592_v51  ;;  %v2561_v61 = vld [vmem:[%s5867_s0 + $0x98] sm:$0xff]  ;;  %v450_v0 = vld [vmem:[%s5866_s1 + $0x290] sm:$0xff] }
  0x26   :  { %207 = vst.msk [vmem:[#allocation2 + $0x11] sm:$0xff] %vm206_vm1, %v190_v45  ;;  %v433_v54 = vld [vmem:[%s5866_s1 + $0x208] sm:$0xff]  ;;  %v3488_v60 = vpack.c.bf16 %v449_v44, %v448_v43  ;;  %v2577_v62 = vld [vmem:[%s5867_s0 + $0x118] sm:$0xff]  ;;  %v127_v4 = vmax.f32 %v94_v58, %v2561_v61  ;;  %v95_v6 = vld [vmem:[%s5867_s0 + $0x20] sm:$0xff]  ;;  %584 = vmatmul.mubr.f32.vlgmr.msra.gmra.mrb[0].mxu0 %v3751_v3 }
  0x27   :  { %v191_v55 = vmax.f32 %v125_v46, %v175_v47  ;;  %v2593_v63 = vld [vmem:[%s5867_s0 + $0x198] sm:$0xff]  ;;  %v192_v2 = vmax.f32 %v126_v56, %v176_v57  ;;  %v2562_v7 = vld [vmem:[%s5867_s0 + $0xa0] sm:$0xff]  ;;  %v3490_v10 = vpack.c.bf16 %v433_v54, %v432_v53  ;;  %v434_v12 = vld [vmem:[%s5866_s1 + $0x210] sm:$0xff] }
  0x28   :  { %v451_v1 = vld [vmem:[%s5866_s1 + $0x298] sm:$0xff]  ;;  %v177_v5 = vmax.f32 %v2577_v62, %v2593_v63  ;;  %v2578_v8 = vld [vmem:[%s5867_s0 + $0x120] sm:$0xff]  ;;  %v128_v15 = vmax.f32 %v95_v6, %v2562_v7  ;;  %v96_v17 = vld [vmem:[%s5867_s0 + $0x28] sm:$0xff]  ;;  %3489 = vmatprep.subr.bf16.mxu0 %v3488_v60 }
  0x29   :  { %208 = vst.msk [vmem:[#allocation2 + $0x21] sm:$0xff] %vm206_vm1, %v191_v55  ;;  %v2594_v9 = vld [vmem:[%s5867_s0 + $0x1a0] sm:$0xff]  ;;  %209 = vst.msk [vmem:[#allocation2 + $0x31] sm:$0xff] %vm206_vm1, %v192_v2  ;;  %v435_v13 = vld [vmem:[%s5866_s1 + $0x218] sm:$0xff]  ;;  %v3492_v21 = vpack.c.bf16 %v451_v1, %v450_v0  ;;  %3491 = vmatpush3.bf16.msra.mxu0 %v3490_v10 }
  0x2a   :  { %v255_v11 = vld [vmem:[#allocation2 + $0x2] sm:$0xff]  ;;  %v193_v14 = vmax.f32 %v127_v4, %v177_v5  ;;  %v178_v16 = vmax.f32 %v2578_v8, %v2594_v9  ;;  %v97_v27 = vld [vmem:[%s5867_s0 + $0x30] sm:$0xff]  ;;  %v3494_v32 = vpack.c.bf16 %v435_v13, %v434_v12  ;;  %v455_v44 = vld [vmem:[%s5866_s1 + $0x2b8] sm:$0xff] }
  0x2b   :  { %v2563_v18 = vld [vmem:[%s5867_s0 + $0xa8] sm:$0xff]  ;;  %v452_v22 = vld [vmem:[%s5866_s1 + $0x2a0] sm:$0xff]  ;;  %v2564_v34 = vld [vmem:[%s5867_s0 + $0xb0] sm:$0xff]  ;;  %3493 = vmatprep.subr.bf16.mxu0 %v3492_v21 }
  0x2c   :  { %v2579_v19 = vld [vmem:[%s5867_s0 + $0x128] sm:$0xff]  ;;  %210 = vst.msk [vmem:[#allocation2 + $0x41] sm:$0xff] %vm206_vm1, %v193_v14  ;;  %v194_v24 = vmax.f32 %v128_v15, %v178_v16  ;;  %v129_v25 = vmax.f32 %v96_v17, %v2563_v18  ;;  %v436_v30 = vld [vmem:[%s5866_s1 + $0x220] sm:$0xff]  ;;  %v2580_v35 = vld [vmem:[%s5867_s0 + $0x130] sm:$0xff]  ;;  %v130_v41 = vmax.f32 %v97_v27, %v2564_v34 }
  0x2d   :  { %v2595_v20 = vld [vmem:[%s5867_s0 + $0x1a8] sm:$0xff]  ;;  %v271_v28 = vld [vmem:[#allocation2 + $0x10] sm:$0xff]  ;;  %v98_v45 = vld [vmem:[%s5867_s0 + $0x38] sm:$0xff]  ;;  %3495 = vmatpush3.bf16.msra.mxu0 %v3494_v32 }
  0x2e   :  { %v453_v23 = vld [vmem:[%s5866_s1 + $0x2a8] sm:$0xff]  ;;  %v179_v26 = vmax.f32 %v2579_v19, %v2595_v20  ;;  %v4185_v29 = vld [vmem:[#allocation2 + $0x11] sm:$0xff]  ;;  %728 = vmatprep.mubr.f32.mxu1 %v271_v28  ;;  %211 = vst.msk [vmem:[#allocation2 + $0x51] sm:$0xff] %vm206_vm1, %v194_v24  ;;  %v480_v59 = vld [vmem:[%s5866_s1 + $0x380] sm:$0xff] }
  0x2f   :  { %v437_v31 = vld [vmem:[%s5866_s1 + $0x228] sm:$0xff]  ;;  %v2596_v36 = vld [vmem:[%s5867_s0 + $0x1b0] sm:$0xff]  ;;  %729 = vmatmul.mubr.f32.vlgmr.msra.gmra.mrb[0].mxu1 %v255_v11  ;;  %588 = vmatprep.mubr.f32.mxu0 %v4185_v29  ;;  %v3496_v39 = vpack.c.bf16 %v453_v23, %v452_v22  ;;  %v2565_v49 = vld [vmem:[%s5867_s0 + $0xb8] sm:$0xff] }
  0x30   :  { %v195_v33 = vmax.f32 %v129_v25, %v179_v26  ;;  %v4204_v37 = vld [vmem:[#allocation2 + $0x20] sm:$0xff]  ;;  %v454_v40 = vld [vmem:[%s5866_s1 + $0x2b0] sm:$0xff]  ;;  %v180_v42 = vmax.f32 %v2580_v35, %v2596_v36  ;;  %589 = vmatmul.mubr.f32.gmra.mrb[2].mxu0 %v271_v28  ;;  %v3498_v48 = vpack.c.bf16 %v437_v31, %v436_v30  ;;  %v2581_v50 = vld [vmem:[%s5867_s0 + $0x138] sm:$0xff]  ;;  %v131_v56 = vmax.f32 %v98_v45, %v2565_v49 }
  0x31   :  { %v4206_v38 = vld [vmem:[#allocation2 + $0x21] sm:$0xff]  ;;  %733 = vmatprep.mubr.f32.mxu1 %v4204_v37  ;;  %v4212_v43 = vld [vmem:[#allocation2 + $0x12] sm:$0xff]  ;;  %3497 = vmatprep.subr.bf16.mxu0 %v3496_v39  ;;  %v3500_v53 = vpack.c.bf16 %v455_v44, %v454_v40 }
  0x32   :  { %212 = vst.msk [vmem:[#allocation2 + $0x61] sm:$0xff] %vm206_vm1, %v195_v33  ;;  %v4221_v46 = vld [vmem:[#allocation2 + $0x30] sm:$0xff]  ;;  %v196_v47 = vmax.f32 %v130_v41, %v180_v42  ;;  %593 = vmatprep.mubr.f32.mxu0 %v4206_v38  ;;  %v2597_v51 = vld [vmem:[%s5867_s0 + $0x1b8] sm:$0xff]  ;;  %v4244_v58 = vld [vmem:[#allocation2 + $0x22] sm:$0xff]  ;;  %3499 = vmatpush3.bf16.msra.mxu0 %v3498_v48 }
  0x33   :  { %734 = vmatmul.mubr.f32.gmra.mrb[2].mxu1 %v4212_v43  ;;  %v4234_v52 = vld [vmem:[#allocation2 + $0x31] sm:$0xff]  ;;  %v181_v57 = vmax.f32 %v2581_v50, %v2597_v51  ;;  %v481_v60 = vld [vmem:[%s5866_s1 + $0x388] sm:$0xff]  ;;  %v4253_v61 = vld [vmem:[#allocation2 + $0x40] sm:$0xff]  ;;  %3501 = vmatprep.subr.bf16.mxu0 %v3500_v53 }
  0x34   :  { %213 = vst.msk [vmem:[#allocation2 + $0x71] sm:$0xff] %vm206_vm1, %v196_v47  ;;  %v438_v54 = vld [vmem:[%s5866_s1 + $0x230] sm:$0xff]  ;;  %v439_v55 = vld [vmem:[%s5866_s1 + $0x238] sm:$0xff]  ;;  %738 = vmatprep.mubr.f32.mxu1 %v4221_v46  ;;  %594 = vmatmul.mubr.f32.gmra.mrb[4].mxu0 %v4204_v37  ;;  %v3520_v63 = vpack.c.bf16 %v481_v60, %v480_v59  ;;  %v464_v1 = vld [vmem:[%s5866_s1 + $0x300] sm:$0xff] }
  0x35   :  { %v197_v62 = vmax.f32 %v131_v56, %v181_v57  ;;  %598 = vmatprep.mubr.f32.mxu0 %v4234_v52  ;;  %v3502_v0 = vpack.c.bf16 %v439_v55, %v438_v54  ;;  %v465_v2 = vld [vmem:[%s5866_s1 + $0x308] sm:$0xff]  ;;  %v456_v4 = vld [vmem:[%s5866_s1 + $0x2c0] sm:$0xff]  ;;  %v4266_v5 = vld [vmem:[#allocation2 + $0x32] sm:$0xff] }
  0x36   :  { %v4268_v6 = vld [vmem:[#allocation2 + $0x41] sm:$0xff]  ;;  %v4270_v7 = vld [vmem:[#allocation2 + $0x50] sm:$0xff]  ;;  %v3522_v8 = vpack.c.bf16 %v465_v2, %v464_v1  ;;  %3521 = vmatprep.subr.bf16.mxu1 %v3520_v63  ;;  %v483_v32 = vld [vmem:[%s5866_s1 + $0x398] sm:$0xff] }
  0x37   :  { %739 = vmatmul.mubr.f32.gmra.mrb[4].mxu1 %v4244_v58  ;;  %214 = vst.msk [vmem:[#allocation2 + $0x81] sm:$0xff] %vm206_vm1, %v197_v62  ;;  %v457_v9 = vld [vmem:[%s5866_s1 + $0x2c8] sm:$0xff]  ;;  %v99_v10 = vld [vmem:[%s5867_s0 + $0x40] sm:$0xff]  ;;  %v4296_v18 = vld [vmem:[#allocation2 + $0x51] sm:$0xff]  ;;  %3503 = vmatpush3.bf16.msra.mxu0 %v3502_v0 }
  0x38   :  { %743 = vmatprep.mubr.f32.mxu1 %v4253_v61  ;;  %v2566_v11 = vld [vmem:[%s5867_s0 + $0xc0] sm:$0xff]  ;;  %599 = vmatmul.mubr.f32.gmra.mrb[6].mxu0 %v4221_v46  ;;  %v3504_v12 = vpack.c.bf16 %v457_v9, %v456_v4  ;;  %v441_v21 = vld [vmem:[%s5866_s1 + $0x248] sm:$0xff]  ;;  %v482_v31 = vld [vmem:[%s5866_s1 + $0x390] sm:$0xff] }
  0x39   :  { %3523 = vmatpush3.bf16.msra.mxu1 %v3522_v8  ;;  %v132_v13 = vmax.f32 %v99_v10, %v2566_v11  ;;  %v2582_v14 = vld [vmem:[%s5867_s0 + $0x140] sm:$0xff]  ;;  %603 = vmatprep.mubr.f32.mxu0 %v4268_v6  ;;  %v100_v22 = vld [vmem:[%s5867_s0 + $0x48] sm:$0xff]  ;;  %v466_v33 = vld [vmem:[%s5866_s1 + $0x310] sm:$0xff]  ;;  %v3524_v36 = vpack.c.bf16 %v483_v32, %v482_v31 }
  0x3a   :  { %v2598_v15 = vld [vmem:[%s5867_s0 + $0x1c0] sm:$0xff]  ;;  %3505 = vmatprep.subr.bf16.mxu0 %v3504_v12  ;;  %v2567_v25 = vld [vmem:[%s5867_s0 + $0xc8] sm:$0xff]  ;;  %v4328_v34 = vld [vmem:[#allocation2 + $0x52] sm:$0xff] }
  0x3b   :  { %v440_v16 = vld [vmem:[%s5866_s1 + $0x240] sm:$0xff]  ;;  %v182_v19 = vmax.f32 %v2582_v14, %v2598_v15  ;;  %744 = vmatmul.mubr.f32.gmra.mrb[6].mxu1 %v4266_v5  ;;  %v2583_v26 = vld [vmem:[%s5867_s0 + $0x148] sm:$0xff]  ;;  %v133_v28 = vmax.f32 %v100_v22, %v2567_v25  ;;  %v467_v39 = vld [vmem:[%s5866_s1 + $0x318] sm:$0xff]  ;;  %3525 = vmatprep.subr.bf16.mxu1 %v3524_v36 }
  0x3c   :  { %v4294_v17 = vld [vmem:[#allocation2 + $0x42] sm:$0xff]  ;;  %748 = vmatprep.mubr.f32.mxu1 %v4270_v7  ;;  %v3506_v24 = vpack.c.bf16 %v441_v21, %v440_v16  ;;  %604 = vmatmul.mubr.f32.gmra.mrb[8].mxu0 %v4253_v61  ;;  %v458_v40 = vld [vmem:[%s5866_s1 + $0x2d0] sm:$0xff]  ;;  %v3526_v44 = vpack.c.bf16 %v467_v39, %v466_v33  ;;  %v459_v45 = vld [vmem:[%s5866_s1 + $0x2d8] sm:$0xff] }
  0x3d   :  { %v4299_v20 = vld [vmem:[#allocation2 + $0x60] sm:$0xff]  ;;  %v198_v23 = vmax.f32 %v132_v13, %v182_v19  ;;  %v2599_v27 = vld [vmem:[%s5867_s0 + $0x1c8] sm:$0xff]  ;;  %608 = vmatprep.mubr.f32.mxu0 %v4296_v18  ;;  %v4340_v41 = vld [vmem:[#allocation2 + $0x70] sm:$0xff]  ;;  %v3508_v49 = vpack.c.bf16 %v459_v45, %v458_v40 }
  0x3e   :  { %v183_v30 = vmax.f32 %v2583_v26, %v2599_v27  ;;  %v4330_v35 = vld [vmem:[#allocation2 + $0x61] sm:$0xff]  ;;  %3507 = vmatpush3.bf16.msra.mxu0 %v3506_v24  ;;  %v101_v47 = vld [vmem:[%s5867_s0 + $0x50] sm:$0xff]  ;;  %3527 = vmatpush3.bf16.msra.mxu1 %v3526_v44  ;;  %v443_v57 = vld [vmem:[%s5866_s1 + $0x258] sm:$0xff] }
  0x3f   :  { %215 = vst.msk [vmem:[#allocation2 + $0xb1] sm:$0xff] %vm206_vm1, %v198_v23  ;;  %749 = vmatmul.mubr.f32.gmra.mrb[8].mxu1 %v4294_v17  ;;  %v2568_v48 = vld [vmem:[%s5867_s0 + $0xd0] sm:$0xff]  ;;  %v484_v59 = vld [vmem:[%s5866_s1 + $0x3a0] sm:$0xff]  ;;  %v485_v60 = vld [vmem:[%s5866_s1 + $0x3a8] sm:$0xff]  ;;  %3509 = vmatprep.subr.bf16.mxu0 %v3508_v49 }
  0x40   :  { %v199_v42 = vmax.f32 %v133_v28, %v183_v30  ;;  %753 = vmatprep.mubr.f32.mxu1 %v4299_v20  ;;  %v134_v50 = vmax.f32 %v101_v47, %v2568_v48  ;;  %v2584_v51 = vld [vmem:[%s5867_s0 + $0x150] sm:$0xff]  ;;  %609 = vmatmul.mubr.f32.gmra.mrb[10].mxu0 %v4270_v7  ;;  %v4375_v62 = vld [vmem:[#allocation2 + $0x62] sm:$0xff]  ;;  %v3528_v0 = vpack.c.bf16 %v485_v60, %v484_v59  ;;  %v102_v4 = vld [vmem:[%s5867_s0 + $0x58] sm:$0xff] }
  0x41   :  { %v2600_v53 = vld [vmem:[%s5867_s0 + $0x1d0] sm:$0xff]  ;;  %613 = vmatprep.mubr.f32.mxu0 %v4330_v35  ;;  %v468_v1 = vld [vmem:[%s5866_s1 + $0x320] sm:$0xff]  ;;  %v469_v2 = vld [vmem:[%s5866_s1 + $0x328] sm:$0xff] }
  0x42   :  { %v442_v54 = vld [vmem:[%s5866_s1 + $0x250] sm:$0xff]  ;;  %216 = vst.msk [vmem:[#allocation2 + $0xc1] sm:$0xff] %vm206_vm1, %v199_v42  ;;  %v184_v56 = vmax.f32 %v2584_v51, %v2600_v53  ;;  %v3530_v9 = vpack.c.bf16 %v469_v2, %v468_v1  ;;  %v2569_v10 = vld [vmem:[%s5867_s0 + $0xd8] sm:$0xff]  ;;  %v4407_v21 = vld [vmem:[#allocation2 + $0x80] sm:$0xff]  ;;  %3529 = vmatprep.subr.bf16.mxu1 %v3528_v0 }
  0x43   :  { %v4362_v55 = vld [vmem:[#allocation2 + $0x71] sm:$0xff]  ;;  %v3510_v63 = vpack.c.bf16 %v443_v57, %v442_v54  ;;  %754 = vmatmul.mubr.f32.gmra.mrb[10].mxu1 %v4328_v34  ;;  %v135_v13 = vmax.f32 %v102_v4, %v2569_v10  ;;  %v247_v22 = vld [vmem:[#allocation2 + $0xa1] sm:$0xff] }
  0x44   :  { %v200_v8 = vmax.f32 %v134_v50, %v184_v56  ;;  %v2585_v11 = vld [vmem:[%s5867_s0 + $0x158] sm:$0xff]  ;;  %758 = vmatprep.mubr.f32.mxu1 %v4340_v41  ;;  %v486_v15 = vld [vmem:[%s5866_s1 + $0x3b0] sm:$0xff]  ;;  %614 = vmatmul.mubr.f32.gmra.mrb[12].mxu0 %v4299_v20  ;;  %v460_v26 = vld [vmem:[%s5866_s1 + $0x2e0] sm:$0xff] }
  0x45   :  { %v2601_v12 = vld [vmem:[%s5867_s0 + $0x1d8] sm:$0xff]  ;;  %3511 = vmatpush3.bf16.msra.mxu0 %v3510_v63  ;;  %v470_v19 = vld [vmem:[%s5866_s1 + $0x330] sm:$0xff]  ;;  %618 = vmatprep.mubr.f32.mxu0 %v4362_v55  ;;  %v461_v27 = vld [vmem:[%s5866_s1 + $0x2e8] sm:$0xff] }
  0x46   :  { %v185_v14 = vmax.f32 %v2585_v11, %v2601_v12  ;;  %v487_v16 = vld [vmem:[%s5866_s1 + $0x3b8] sm:$0xff]  ;;  %217 = vst.msk [vmem:[#allocation2 + $0xd1] sm:$0xff] %vm206_vm1, %v200_v8  ;;  %3531 = vmatpush3.bf16.msra.mxu1 %v3530_v9  ;;  %v3512_v30 = vpack.c.bf16 %v461_v27, %v460_v26  ;;  %v103_v31 = vld [vmem:[%s5867_s0 + $0x60] sm:$0xff]  ;;  %v279_v39 = vld [vmem:[#allocation2 + $0xb0] sm:$0xff] }
  0x47   :  { %v3532_v23 = vpack.c.bf16 %v487_v16, %v486_v15  ;;  %v471_v25 = vld [vmem:[%s5866_s1 + $0x338] sm:$0xff]  ;;  %759 = vmatmul.mubr.f32.gmra.mrb[12].mxu1 %v4375_v62  ;;  %v2570_v32 = vld [vmem:[%s5867_s0 + $0xe0] sm:$0xff]  ;;  %v445_v47 = vld [vmem:[%s5866_s1 + $0x268] sm:$0xff] }
  0x48   :  { %v201_v24 = vmax.f32 %v135_v13, %v185_v14  ;;  %v3534_v28 = vpack.c.bf16 %v471_v25, %v470_v19  ;;  %v2586_v33 = vld [vmem:[%s5867_s0 + $0x160] sm:$0xff]  ;;  %763 = vmatprep.mubr.f32.mxu1 %v4407_v21  ;;  %v4431_v36 = vld [vmem:[#allocation2 + $0x72] sm:$0xff]  ;;  %v136_v40 = vmax.f32 %v103_v31, %v2570_v32  ;;  %619 = vmatmul.mubr.f32.gmra.mrb[14].mxu0 %v4340_v41  ;;  %v489_v51 = vld [vmem:[%s5866_s1 + $0x3c8] sm:$0xff] }
  0x49   :  { %3533 = vmatprep.subr.bf16.mxu1 %v3532_v23  ;;  %v4435_v42 = vld [vmem:[#allocation2 + $0xb1] sm:$0xff]  ;;  %3513 = vmatprep.subr.bf16.mxu0 %v3512_v30  ;;  %v2602_v44 = vld [vmem:[%s5867_s0 + $0x1e0] sm:$0xff]  ;;  %v473_v56 = vld [vmem:[%s5866_s1 + $0x348] sm:$0xff] }
  0x4a   :  { %218 = vst.msk [vmem:[#allocation2 + $0xe1] sm:$0xff] %vm206_vm1, %v201_v24  ;;  %v444_v45 = vld [vmem:[%s5866_s1 + $0x260] sm:$0xff]  ;;  %623 = vmatprep.mubr.f32.mxu0 %v247_v22  ;;  %3535 = vmatpush3.bf16.msra.mxu1 %v3534_v28  ;;  %v186_v48 = vmax.f32 %v2586_v33, %v2602_v44  ;;  %v104_v57 = vld [vmem:[%s5867_s0 + $0x68] sm:$0xff]  ;;  %v490_v9 = vld [vmem:[%s5866_s1 + $0x3d0] sm:$0xff] }
  0x4b   :  { %v3514_v49 = vpack.c.bf16 %v445_v47, %v444_v45  ;;  %v488_v50 = vld [vmem:[%s5866_s1 + $0x3c0] sm:$0xff]  ;;  %764 = vmatmul.mubr.f32.gmra.mrb[14].mxu1 %v4431_v36  ;;  %v2571_v59 = vld [vmem:[%s5867_s0 + $0xe8] sm:$0xff]  ;;  %v474_v11 = vld [vmem:[%s5866_s1 + $0x350] sm:$0xff] }
  0x4c   :  { %v472_v53 = vld [vmem:[%s5866_s1 + $0x340] sm:$0xff]  ;;  %v3536_v54 = vpack.c.bf16 %v489_v51, %v488_v50  ;;  %768 = vmatprep.mubr.f32.mxu1 %v279_v39  ;;  %v202_v0 = vmax.f32 %v136_v40, %v186_v48  ;;  %v137_v2 = vmax.f32 %v104_v57, %v2571_v59  ;;  %624 = vmatmul.mubr.f32.gmra.mrb[16].mxu0 %v3751_v3  ;;  %v2587_v4 = vld [vmem:[%s5867_s0 + $0x168] sm:$0xff]  ;;  %v491_v3 = vld [vmem:[%s5866_s1 + $0x3d8] sm:$0xff] }
  0x4d   :  { %v263_v60 = vld [vmem:[#allocation2 + $0xa2] sm:$0xff]  ;;  %3515 = vmatpush3.bf16.msra.mxu0 %v3514_v49  ;;  %v3538_v1 = vpack.c.bf16 %v473_v56, %v472_v53  ;;  %628 = vmatprep.mubr.f32.mxu0 %v4435_v42  ;;  %v475_v12 = vld [vmem:[%s5866_s1 + $0x358] sm:$0xff]  ;;  %v4492_v15 = vld [vmem:[#allocation2 + $0xd0] sm:$0xff]  ;;  %v3540_v16 = vpack.c.bf16 %v491_v3, %v490_v9 }
  0x4e   :  { %v4465_v63 = vld [vmem:[#allocation2 + $0xc0] sm:$0xff]  ;;  %3537 = vmatprep.subr.bf16.mxu1 %v3536_v54  ;;  %v2603_v8 = vld [vmem:[%s5867_s0 + $0x1e8] sm:$0xff]  ;;  %219 = vst.msk [vmem:[#allocation2 + $0xf1] sm:$0xff] %vm206_vm1, %v202_v0  ;;  %v4488_v13 = vld [vmem:[#allocation2 + $0xb2] sm:$0xff]  ;;  %v3542_v19 = vpack.c.bf16 %v475_v12, %v474_v11 }
  0x4f   :  { %3539 = vmatpush3.bf16.msra.mxu1 %v3538_v1  ;;  %v187_v10 = vmax.f32 %v2587_v4, %v2603_v8  ;;  %v4490_v14 = vld [vmem:[#allocation2 + $0xc1] sm:$0xff]  ;;  %v462_v23 = vld [vmem:[%s5866_s1 + $0x2f0] sm:$0xff]  ;;  %v463_v24 = vld [vmem:[%s5866_s1 + $0x2f8] sm:$0xff] }
  0x50   :  { %769 = vmatmul.mubr.f32.gmra.mrb[16].mxu1 %v263_v60  ;;  %v105_v25 = vld [vmem:[%s5867_s0 + $0x70] sm:$0xff]  ;;  %629 = vmatmul.mubr.f32.gmra.mrb[18].mxu0 %v279_v39  ;;  %v3516_v27 = vpack.c.bf16 %v463_v24, %v462_v23  ;;  %v4516_v32 = vld [vmem:[#allocation2 + $0xc2] sm:$0xff]  ;;  %v447_v44 = vld [vmem:[%s5866_s1 + $0x278] sm:$0xff] }
  0x51   :  { %773 = vmatprep.mubr.f32.mxu1 %v4465_v63  ;;  %v203_v22 = vmax.f32 %v137_v2, %v187_v10  ;;  %v4504_v26 = vld [vmem:[#allocation2 + $0xd1] sm:$0xff]  ;;  %3541 = vmatprep.subr.bf16.mxu1 %v3540_v16  ;;  %v492_v45 = vld [vmem:[%s5866_s1 + $0x3e0] sm:$0xff]  ;;  %v493_v48 = vld [vmem:[%s5866_s1 + $0x3e8] sm:$0xff] }
  0x52   :  { %v2572_v28 = vld [vmem:[%s5867_s0 + $0xf0] sm:$0xff]  ;;  %633 = vmatprep.mubr.f32.mxu0 %v4490_v14  ;;  %3517 = vmatprep.subr.bf16.mxu0 %v3516_v27  ;;  %v476_v49 = vld [vmem:[%s5866_s1 + $0x360] sm:$0xff]  ;;  %v477_v50 = vld [vmem:[%s5866_s1 + $0x368] sm:$0xff]  ;;  %v3544_v53 = vpack.c.bf16 %v493_v48, %v492_v45 }
  0x53   :  { %v2588_v30 = vld [vmem:[%s5867_s0 + $0x170] sm:$0xff]  ;;  %220 = vst.msk [vmem:[#allocation2 + $0x101] sm:$0xff] %vm206_vm1, %v203_v22  ;;  %3543 = vmatpush3.bf16.msra.mxu1 %v3542_v19  ;;  %v138_v33 = vmax.f32 %v105_v25, %v2572_v28  ;;  %v3546_v54 = vpack.c.bf16 %v477_v50, %v476_v49  ;;  %v106_v56 = vld [vmem:[%s5867_s0 + $0x78] sm:$0xff]  ;;  %v4549_v60 = vld [vmem:[#allocation2 + $0xe0] sm:$0xff] }
  0x54   :  { %v2604_v31 = vld [vmem:[%s5867_s0 + $0x1f0] sm:$0xff]  ;;  %774 = vmatmul.mubr.f32.gmra.mrb[18].mxu1 %v4488_v13  ;;  %v2573_v57 = vld [vmem:[%s5867_s0 + $0xf8] sm:$0xff]  ;;  %634 = vmatmul.mubr.f32.gmra.mrb[20].mxu0 %v4465_v63  ;;  %v4551_v0 = vld [vmem:[#allocation2 + $0xe1] sm:$0xff] }
  0x55   :  { %v188_v39 = vmax.f32 %v2588_v30, %v2604_v31  ;;  %v446_v40 = vld [vmem:[%s5866_s1 + $0x270] sm:$0xff]  ;;  %778 = vmatprep.mubr.f32.mxu1 %v4492_v15  ;;  %v2589_v59 = vld [vmem:[%s5867_s0 + $0x178] sm:$0xff]  ;;  %v139_v1 = vmax.f32 %v106_v56, %v2573_v57  ;;  %638 = vmatprep.mubr.f32.mxu0 %v4504_v26  ;;  %v496_v12 = vld [vmem:[%s5866_s1 + $0x400] sm:$0xff] }
  0x56   :  { %v3518_v47 = vpack.c.bf16 %v447_v44, %v446_v40  ;;  %v2605_v2 = vld [vmem:[%s5867_s0 + $0x1f8] sm:$0xff]  ;;  %v494_v4 = vld [vmem:[%s5866_s1 + $0x3f0] sm:$0xff]  ;;  %3545 = vmatprep.subr.bf16.mxu1 %v3544_v53  ;;  %v497_v22 = vld [vmem:[%s5866_s1 + $0x408] sm:$0xff] }
  0x57   :  { %v204_v51 = vmax.f32 %v138_v33, %v188_v39  ;;  %v495_v8 = vld [vmem:[%s5866_s1 + $0x3f8] sm:$0xff]  ;;  %v189_v9 = vmax.f32 %v2589_v59, %v2605_v2  ;;  %v478_v3 = vld [vmem:[%s5866_s1 + $0x370] sm:$0xff]  ;;  %3547 = vmatpush3.bf16.msra.mxu1 %v3546_v54  ;;  %v3552_v25 = vpack.c.bf16 %v497_v22, %v496_v12  ;;  %v4589_v28 = vld [vmem:[#allocation2 + $0xe2] sm:$0xff] }
  0x58   :  { %3519 = vmatpush3.bf16.msra.mxu0 %v3518_v47  ;;  %779 = vmatmul.mubr.f32.gmra.mrb[20].mxu1 %v4516_v32  ;;  %v3548_v10 = vpack.c.bf16 %v495_v8, %v494_v4  ;;  %v479_v11 = vld [vmem:[%s5866_s1 + $0x378] sm:$0xff]  ;;  %v4581_v23 = vld [vmem:[#allocation2 + $0xf0] sm:$0xff]  ;;  %v501_v53 = vld [vmem:[%s5866_s1 + $0x428] sm:$0xff] }
  0x59   :  { %221 = vst.msk [vmem:[#allocation2 + $0x111] sm:$0xff] %vm206_vm1, %v204_v51  ;;  %783 = vmatprep.mubr.f32.mxu1 %v4549_v60  ;;  %v4575_v16 = vld [vmem:[#allocation2 + $0xd2] sm:$0xff]  ;;  %v3550_v19 = vpack.c.bf16 %v479_v11, %v478_v3  ;;  %639 = vmatmul.mubr.f32.gmra.mrb[22].mxu0 %v4492_v15  ;;  %v205_v24 = vmax.f32 %v139_v1, %v189_v9  ;;  %v500_v51 = vld [vmem:[%s5866_s1 + $0x420] sm:$0xff]  ;;  %v505_v57 = vld [vmem:[%s5866_s1 + $0x448] sm:$0xff] }
  0x5a   :  { %3549 = vmatprep.subr.bf16.mxu1 %v3548_v10  ;;  %643 = vmatprep.mubr.f32.mxu0 %v4551_v0  ;;  %v4585_v27 = vld [vmem:[#allocation2 + $0xf1] sm:$0xff]  ;;  %v4592_v30 = vld [vmem:[#allocation2 + $0x100] sm:$0xff]  ;;  %v509_v1 = vld [vmem:[%s5866_s1 + $0x468] sm:$0xff] }
  0x5b   :  { %222 = vst.msk [vmem:[#allocation2 + $0x121] sm:$0xff] %vm206_vm1, %v205_v24  ;;  %3553 = vmatprep.subr.bf16.mxu0 %v3552_v25  ;;  %3551 = vmatpush3.bf16.msra.mxu1 %v3550_v19  ;;  %v4596_v31 = vld [vmem:[#allocation2 + $0x101] sm:$0xff]  ;;  %v4599_v33 = vld [vmem:[#allocation2 + $0xf2] sm:$0xff] }
  0x5c   :  { %784 = vmatmul.mubr.f32.gmra.mrb[22].mxu1 %v4575_v16  ;;  %v4609_v44 = vld [vmem:[#allocation2 + $0x102] sm:$0xff]  ;;  %v498_v48 = vld [vmem:[%s5866_s1 + $0x410] sm:$0xff]  ;;  %v499_v49 = vld [vmem:[%s5866_s1 + $0x418] sm:$0xff] }
  0x5d   :  { %788 = vmatprep.mubr.f32.mxu1 %v4581_v23  ;;  %644 = vmatmul.mubr.f32.gmra.mrb[24].mxu0 %v4549_v60  ;;  %v3556_v50 = vpack.c.bf16 %v499_v49, %v498_v48  ;;  %v502_v54 = vld [vmem:[%s5866_s1 + $0x430] sm:$0xff]  ;;  %v503_v56 = vld [vmem:[%s5866_s1 + $0x438] sm:$0xff] }
  0x5e   :  { %648 = vmatprep.mubr.f32.mxu0 %v4585_v27  ;;  %v507_v59 = vld [vmem:[%s5866_s1 + $0x458] sm:$0xff] }
  0x5f   :  { %v511_v2 = vld [vmem:[%s5866_s1 + $0x478] sm:$0xff] }
  0x60   :  { %789 = vmatmul.mubr.f32.gmra.mrb[24].mxu1 %v4589_v28  ;;  %v4602_v39 = vld [vmem:[#allocation2 + $0x110] sm:$0xff] }
  0x61   :  { %793 = vmatprep.mubr.f32.mxu1 %v4592_v30  ;;  %649 = vmatmul.mubr.f32.gmra.mrb[26].mxu0 %v4581_v23  ;;  %v4606_v40 = vld [vmem:[#allocation2 + $0x111] sm:$0xff] }
  0x62   :  { %653 = vmatprep.mubr.f32.mxu0 %v4596_v31  ;;  %v4612_v45 = vld [vmem:[#allocation2 + $0x120] sm:$0xff]  ;;  %v4617_v47 = vld [vmem:[#allocation2 + $0x112] sm:$0xff] }
  0x63   :  { %v343_v8 = vld [vmem:[#allocation2 + $0x91] sm:$0xff] }
  0x64   :  { %794 = vmatmul.mubr.f32.gmra.mrb[26].mxu1 %v4599_v33 }
  0x65   :  { %798 = vmatprep.mubr.f32.mxu1 %v4602_v39  ;;  %654 = vmatmul.mubr.f32.gmra.mrb[28].mxu0 %v4592_v30 }
  0x66   :  { %658 = vmatprep.mubr.f32.mxu0 %v4606_v40 }
  0x68   :  { %799 = vmatmul.mubr.f32.gmra.mrb[28].mxu1 %v4609_v44 }
  0x69   :  { %803 = vmatprep.mubr.f32.mxu1 %v4612_v45  ;;  %659 = vmatmul.mubr.f32.gmra.mrb[30].mxu0 %v4602_v39 }
  0x6a   :  { %873 = vmatprep.mubr.f32.mxu0 %v4212_v43  ;;  %v3560_v43 = vpack.c.bf16 %v501_v53, %v500_v51 }
  0x6c   :  { %804 = vmatmul.mubr.f32.gmra.mrb[30].mxu1 %v4617_v47 }
  0x6d   :  { %1018 = vmatprep.mubr.f32.mxu1 %v4206_v38  ;;  %874 = vmatmul.mubr.f32.vlgmr.msra.gmra.mrb[32].mxu0 %v4185_v29  ;;  %v3564_v29 = vpack.c.bf16 %v503_v56, %v502_v54 }
  0x6e   :  { %3555 = vmatpush3.bf16.msra.mxu0 %v3552_v25  ;;  %878 = vmatprep.mubr.f32.mxu0 %v4244_v58 }
  0x6f   :  { %3557 = vmatprep.subr.bf16.mxu0 %v3556_v50 }
  0x70   :  { %1019 = vmatmul.mubr.f32.vlgmr.msra.gmra.mrb[32].mxu1 %v4204_v37  ;;  %v504_v37 = vld [vmem:[%s5866_s1 + $0x440] sm:$0xff] }
  0x71   :  { %1023 = vmatprep.mubr.f32.mxu1 %v4234_v52  ;;  %879 = vmatmul.mubr.f32.gmra.mrb[34].mxu0 %v4206_v38  ;;  %v3568_v38 = vpack.c.bf16 %v505_v57, %v504_v37 }
  0x72   :  { %883 = vmatprep.mubr.f32.mxu0 %v4266_v5  ;;  %3559 = vmatpush3.bf16.msra.mxu0 %v3556_v50 }
  0x73   :  { %3561 = vmatprep.subr.bf16.mxu0 %v3560_v43 }
  0x74   :  { %1024 = vmatmul.mubr.f32.gmra.mrb[34].mxu1 %v4221_v46  ;;  %v506_v46 = vld [vmem:[%s5866_s1 + $0x450] sm:$0xff] }
  0x75   :  { %1028 = vmatprep.mubr.f32.mxu1 %v4268_v6  ;;  %884 = vmatmul.mubr.f32.gmra.mrb[36].mxu0 %v4234_v52  ;;  %v3572_v52 = vpack.c.bf16 %v507_v59, %v506_v46 }
  0x76   :  { %888 = vmatprep.mubr.f32.mxu0 %v4294_v17  ;;  %3563 = vmatpush3.bf16.msra.mxu0 %v3560_v43 }
  0x77   :  { %3565 = vmatprep.subr.bf16.mxu0 %v3564_v29 }
  0x78   :  { %1029 = vmatmul.mubr.f32.gmra.mrb[36].mxu1 %v4253_v61  ;;  %v508_v61 = vld [vmem:[%s5866_s1 + $0x460] sm:$0xff] }
  0x79   :  { %1033 = vmatprep.mubr.f32.mxu1 %v4296_v18  ;;  %889 = vmatmul.mubr.f32.gmra.mrb[38].mxu0 %v4268_v6  ;;  %v3576_v6 = vpack.c.bf16 %v509_v1, %v508_v61 }
  0x7a   :  { %893 = vmatprep.mubr.f32.mxu0 %v4328_v34  ;;  %3567 = vmatpush3.bf16.msra.mxu0 %v3564_v29 }
  0x7b   :  { %3569 = vmatprep.subr.bf16.mxu0 %v3568_v38 }
  0x7c   :  { %1034 = vmatmul.mubr.f32.gmra.mrb[38].mxu1 %v4270_v7  ;;  %v510_v7 = vld [vmem:[%s5866_s1 + $0x470] sm:$0xff] }
  0x7d   :  { %1038 = vmatprep.mubr.f32.mxu1 %v4330_v35  ;;  %894 = vmatmul.mubr.f32.gmra.mrb[40].mxu0 %v4296_v18  ;;  %v342_v18 = vld [vmem:[#allocation2 + $0x81] sm:$0xff]  ;;  %v3580_v4 = vpack.c.bf16 %v511_v2, %v510_v7 }
  0x7e   :  { %898 = vmatprep.mubr.f32.mxu0 %v4375_v62  ;;  %3571 = vmatpush3.bf16.msra.mxu0 %v3568_v38  ;;  %v1549_v2 = vld [vmem:[%s5869_s5 + $0x80] sm:$0xff] }
  0x7f   :  { %3573 = vmatprep.subr.bf16.mxu0 %v3572_v52 }
  0x80   :  { %1039 = vmatmul.mubr.f32.gmra.mrb[40].mxu1 %v4299_v20  ;;  %v310_v20 = vld [vmem:[#allocation2 + $0x82] sm:$0xff] }
  0x81   :  { %1043 = vmatprep.mubr.f32.mxu1 %v4362_v55  ;;  %899 = vmatmul.mubr.f32.gmra.mrb[42].mxu0 %v4330_v35  ;;  %v4691_v35 = vld [vmem:[#allocation2] sm:$0xff] }
  0x82   :  { %903 = vmatprep.mubr.f32.mxu0 %v4431_v36  ;;  %3575 = vmatpush3.bf16.msra.mxu0 %v3572_v52 }
  0x83   :  { %3577 = vmatprep.subr.bf16.mxu0 %v3576_v6 }
  0x84   :  { %1044 = vmatmul.mubr.f32.gmra.mrb[42].mxu1 %v4340_v41  ;;  %v350_v41 = vld [vmem:[#allocation2 + $0x121] sm:$0xff] }
  0x85   :  { %1048 = vmatprep.mubr.f32.mxu1 %v342_v18  ;;  %904 = vmatmul.mubr.f32.gmra.mrb[44].mxu0 %v4362_v55  ;;  %v318_v55 = vld [vmem:[#allocation2 + $0x122] sm:$0xff] }
  0x86   :  { %908 = vmatprep.mubr.f32.mxu0 %v310_v20  ;;  %3579 = vmatpush3.bf16.msra.mxu0 %v3576_v6 }
  0x87   :  { %3581 = vmatprep.subr.bf16.mxu0 %v3580_v4 }
  0x88   :  { %1049 = vmatmul.mubr.f32.gmra.mrb[44].mxu1 %v4407_v21  ;;  %v351_v21 = vld [vmem:[#allocation2 + $0x131] sm:$0xff] }
  0x89   :  { %1053 = vmatprep.mubr.f32.mxu1 %v343_v8  ;;  %909 = vmatmul.mubr.f32.gmra.mrb[46].mxu0 %v342_v18  ;;  %v1550_v18 = vld [vmem:[%s5869_s5 + $0x88] sm:$0xff] }
  0x8a   :  { %913 = vmatprep.mubr.f32.mxu0 %v4488_v13  ;;  %3583 = vmatpush3.bf16.msra.mxu0 %v3580_v4  ;;  %v3584_v4 = vpack.c.bf16 %v1550_v18, %v1549_v2 }
  0x8c   :  { %1054 = vmatmul.mubr.f32.gmra.mrb[46].mxu1 %v4691_v35  ;;  %3585 = vmatprep.subr.bf16.mxu1 %v3584_v4 }
  0x8d   :  { %1058 = vmatprep.mubr.f32.mxu1 %v4490_v14  ;;  %914 = vmatmul.mubr.f32.gmra.mrb[48].mxu0 %v4435_v42  ;;  %v359_v42 = vld [vmem:[#allocation2 + $0x92] sm:$0xff] }
  0x8e   :  { %918 = vmatprep.mubr.f32.mxu0 %v4516_v32 }
  0x90   :  { %1059 = vmatmul.mubr.f32.gmra.mrb[48].mxu1 %v4465_v63 }
  0x91   :  { %1063 = vmatprep.mubr.f32.mxu1 %v4504_v26  ;;  %919 = vmatmul.mubr.f32.gmra.mrb[50].mxu0 %v4490_v14 }
  0x92   :  { %923 = vmatprep.mubr.f32.mxu0 %v4575_v16 }
  0x94   :  { %1064 = vmatmul.mubr.f32.gmra.mrb[50].mxu1 %v4492_v15 }
  0x95   :  { %1068 = vmatprep.mubr.f32.mxu1 %v4551_v0  ;;  %924 = vmatmul.mubr.f32.gmra.mrb[52].mxu0 %v4504_v26 }
  0x96   :  { %928 = vmatprep.mubr.f32.mxu0 %v4589_v28 }
  0x98   :  { %1069 = vmatmul.mubr.f32.gmra.mrb[52].mxu1 %v4549_v60 }
  0x99   :  { %1073 = vmatprep.mubr.f32.mxu1 %v4585_v27  ;;  %929 = vmatmul.mubr.f32.gmra.mrb[54].mxu0 %v4551_v0 }
  0x9a   :  { %933 = vmatprep.mubr.f32.mxu0 %v4599_v33 }
  0x9c   :  { %1074 = vmatmul.mubr.f32.gmra.mrb[54].mxu1 %v4581_v23 }
  0x9d   :  { %1078 = vmatprep.mubr.f32.mxu1 %v4596_v31  ;;  %934 = vmatmul.mubr.f32.gmra.mrb[56].mxu0 %v4585_v27 }
  0x9e   :  { %938 = vmatprep.mubr.f32.mxu0 %v4609_v44 }
  0xa0   :  { %1079 = vmatmul.mubr.f32.gmra.mrb[56].mxu1 %v4592_v30 }
  0xa1   :  { %1083 = vmatprep.mubr.f32.mxu1 %v4606_v40  ;;  %939 = vmatmul.mubr.f32.gmra.mrb[58].mxu0 %v4596_v31 }
  0xa2   :  { %943 = vmatprep.mubr.f32.mxu0 %v4617_v47 }
  0xa4   :  { %1084 = vmatmul.mubr.f32.gmra.mrb[58].mxu1 %v4602_v39 }
  0xa5   :  { %1088 = vmatprep.mubr.f32.mxu1 %v350_v41  ;;  %944 = vmatmul.mubr.f32.gmra.mrb[60].mxu0 %v4606_v40 }
  0xa6   :  { %948 = vmatprep.mubr.f32.mxu0 %v318_v55 }
  0xa8   :  { %1089 = vmatmul.mubr.f32.gmra.mrb[60].mxu1 %v4612_v45 }
  0xa9   :  { %1093 = vmatprep.mubr.f32.mxu1 %v351_v21  ;;  %949 = vmatmul.mubr.f32.gmra.mrb[62].mxu0 %v350_v41  ;;  %v1533_v21 = vld [vmem:[%s5869_s5] sm:$0xff] }
  0xaa   :  { %3344 = vmatprep.mubr.f32.mxu0 %v4244_v58  ;;  %v367_v58 = vld [vmem:[#allocation2 + $0x132] sm:$0xff] }
  0xac   :  { %1094 = vmatmul.mubr.f32.gmra.mrb[62].mxu1 %v4691_v35 }
  0xad   :  { %3345 = vmatmul.mubr.f32.vlgmr.msra.gmra.mrb[64].mxu0 %v4266_v5 }
  0xae   :  { %3347 = vmatprep.mubr.f32.mxu0 %v4294_v17  ;;  %v4736_v17 = vld [vmem:[%s5868_s2] ss:$0 sm:$0xff] }
  0xb1   :  { %3348 = vmatmul.mubr.f32.gmra.mrb[66].mxu0 %v4328_v34 }
  0xb2   :  { %3350 = vmatprep.mubr.f32.mxu0 %v4375_v62 }
  0xb5   :  { %3351 = vmatmul.mubr.f32.gmra.mrb[68].mxu0 %v4431_v36 }
  0xb6   :  { %3353 = vmatprep.mubr.f32.mxu0 %v310_v20 }
  0xb9   :  { %3354 = vmatmul.mubr.f32.gmra.mrb[70].mxu0 %v359_v42  ;;  %v1534_v42 = vld [vmem:[%s5869_s5 + $0x8] sm:$0xff] }
  0xba   :  { %3356 = vmatprep.mubr.f32.mxu0 %v4516_v32 }
  0xbd   :  { %3357 = vmatmul.mubr.f32.gmra.mrb[72].mxu0 %v4575_v16 }
  0xbe   :  { %3359 = vmatprep.mubr.f32.mxu0 %v4589_v28 }
  0xc1   :  { %3360 = vmatmul.mubr.f32.gmra.mrb[74].mxu0 %v4599_v33 }
  0xc2   :  { %3362 = vmatprep.mubr.f32.mxu0 %v4609_v44 }
  0xc5   :  { %3363 = vmatmul.mubr.f32.gmra.mrb[76].mxu0 %v4617_v47 }
  0xc6   :  { %3365 = vmatprep.mubr.f32.mxu0 %v318_v55 }
  0xc9   :  { %3366 = vmatmul.mubr.f32.gmra.mrb[78].mxu0 %v367_v58 }
  0xf9   :  { %v2640_v5 = vpop.f32.mrb[0].mxu0 }
  0xfa   :  { %v2641_v34 = vpop.f32.mrb[1].mxu0 }
  0xfb   :  { %v2642_v62 = vadd.f32 %v2641_v34, %v2640_v5  ;;  %v3586_v5 = vpack.c.bf16 %v1534_v42, %v1533_v21 }
  0xfd   :  { %v586_v13 = vadd.f32 %v2642_v62, %v4736_v17  ;;  %3587 = vmatpush3.bf16.msra.mxu1 %v3586_v5 }
 0x102   :  { %v2720_v36 = vpop.f32.mrb[0].mxu1 }
 0x103   :  { %v2721_v63 = vpop.f32.mrb[1].mxu1  ;;  %v2643_v15 = vpop.f32.mrb[2].mxu0 }
 0x104   :  { %v2722_v14 = vadd.f32 %v2721_v63, %v2720_v36  ;;  %v2644_v26 = vpop.f32.mrb[3].mxu0 }
 0x105   :  { %v2645_v60 = vadd.f32 %v2644_v26, %v2643_v15 }
 0x106   :  { %v4739_v32 = vadd.f32 %v2722_v14, %v586_v13  ;;  %v2723_v0 = vpop.f32.mrb[2].mxu1 }
 0x107   :  { %v2724_v9 = vpop.f32.mrb[3].mxu1  ;;  %v591_v10 = vadd.f32 %v2645_v60, %v4736_v17  ;;  %v2646_v11 = vpop.f32.mrb[4].mxu0  ;;  %v1551_v60 = vld [vmem:[%s5869_s5 + $0x90] sm:$0xff] }
 0x108   :  { %v2725_v3 = vadd.f32 %v2724_v9, %v2723_v0  ;;  %v2647_v12 = vpop.f32.mrb[5].mxu0  ;;  %v1552_v0 = vld [vmem:[%s5869_s5 + $0x98] sm:$0xff] }
 0x109   :  { %v2648_v19 = vadd.f32 %v2647_v12, %v2646_v11  ;;  %v3588_v11 = vpack.c.bf16 %v1552_v0, %v1551_v60 }
 0x10a   :  { %v4742_v16 = vadd.f32 %v2725_v3, %v591_v10  ;;  %v2726_v22 = vpop.f32.mrb[4].mxu1 }
 0x10b   :  { %v2727_v23 = vpop.f32.mrb[5].mxu1  ;;  %v596_v24 = vadd.f32 %v2648_v19, %v4736_v17  ;;  %v2649_v27 = vpop.f32.mrb[6].mxu0  ;;  %3589 = vmatprep.subr.bf16.mxu1 %v3588_v11  ;;  %v1566_v11 = vld [vmem:[%s5869_s5 + $0x108] sm:$0xff] }
 0x10c   :  { %v2728_v25 = vadd.f32 %v2727_v23, %v2726_v22  ;;  %v2650_v28 = vpop.f32.mrb[7].mxu0 }
 0x10d   :  { %v2651_v31 = vadd.f32 %v2650_v28, %v2649_v27 }
 0x10e   :  { %v4745_v30 = vadd.f32 %v2728_v25, %v596_v24  ;;  %v2729_v33 = vpop.f32.mrb[6].mxu1 }
 0x10f   :  { %v2730_v39 = vpop.f32.mrb[7].mxu1  ;;  %v601_v40 = vadd.f32 %v2651_v31, %v4736_v17  ;;  %v2652_v45 = vpop.f32.mrb[8].mxu0 }
 0x110   :  { %v2731_v44 = vadd.f32 %v2730_v39, %v2729_v33  ;;  %v2653_v47 = vpop.f32.mrb[9].mxu0 }
 0x111   :  { %v2654_v49 = vadd.f32 %v2653_v47, %v2652_v45 }
 0x112   :  { %v4748_v48 = vadd.f32 %v2731_v44, %v601_v40  ;;  %v2732_v50 = vpop.f32.mrb[8].mxu1 }
 0x113   :  { %v2733_v51 = vpop.f32.mrb[9].mxu1  ;;  %v606_v53 = vadd.f32 %v2654_v49, %v4736_v17  ;;  %v2655_v54 = vpop.f32.mrb[10].mxu0 }
 0x114   :  { %v2734_v43 = vadd.f32 %v2733_v51, %v2732_v50  ;;  %v2656_v56 = vpop.f32.mrb[11].mxu0 }
 0x115   :  { %v2657_v37 = vadd.f32 %v2656_v56, %v2655_v54 }
 0x116   :  { %v4751_v29 = vadd.f32 %v2734_v43, %v606_v53  ;;  %v2735_v57 = vpop.f32.mrb[10].mxu1 }
 0x117   :  { %v2736_v38 = vpop.f32.mrb[11].mxu1  ;;  %v611_v46 = vadd.f32 %v2657_v37, %v4736_v17  ;;  %v2658_v52 = vpop.f32.mrb[12].mxu0 }
 0x118   :  { %v2737_v59 = vadd.f32 %v2736_v38, %v2735_v57  ;;  %v2659_v61 = vpop.f32.mrb[13].mxu0 }
 0x119   :  { %v2660_v6 = vadd.f32 %v2659_v61, %v2658_v52  ;;  %v1535_v61 = vld [vmem:[%s5869_s5 + $0x10] sm:$0xff] }
 0x11a   :  { %v4754_v1 = vadd.f32 %v2737_v59, %v611_v46  ;;  %v2738_v7 = vpop.f32.mrb[12].mxu1 }
 0x11b   :  { %v2739_v20 = vpop.f32.mrb[13].mxu1  ;;  %v616_v8 = vadd.f32 %v2660_v6, %v4736_v17  ;;  %v2661_v55 = vpop.f32.mrb[14].mxu0  ;;  %v1536_v6 = vld [vmem:[%s5869_s5 + $0x18] sm:$0xff] }
 0x11c   :  { %v2740_v41 = vadd.f32 %v2739_v20, %v2738_v7  ;;  %v2662_v58 = vpop.f32.mrb[15].mxu0  ;;  %v3590_v2 = vpack.c.bf16 %v1536_v6, %v1535_v61 }
 0x11d   :  { %v2663_v62 = vadd.f32 %v2662_v58, %v2661_v55  ;;  %v1554_v55 = vld [vmem:[%s5869_s5 + $0xa8] sm:$0xff] }
 0x11e   :  { %v4769_v34 = vadd.f32 %v2740_v41, %v616_v8  ;;  %v2741_v36 = vpop.f32.mrb[14].mxu1  ;;  %3591 = vmatpush3.bf16.msra.mxu1 %v3590_v2  ;;  %v1553_v41 = vld [vmem:[%s5869_s5 + $0xa0] sm:$0xff] }
 0x11f   :  { %v2742_v63 = vpop.f32.mrb[15].mxu1  ;;  %v621_v13 = vadd.f32 %v2663_v62, %v4736_v17  ;;  %v2664_v15 = vpop.f32.mrb[16].mxu0  ;;  %v3592_v5 = vpack.c.bf16 %v1554_v55, %v1553_v41  ;;  %v1537_v62 = vld [vmem:[%s5869_s5 + $0x20] sm:$0xff]  ;;  %v1586_v55 = vld [vmem:[%s5869_s5 + $0x1a8] sm:$0xff] }
 0x120   :  { %v2743_v14 = vadd.f32 %v2742_v63, %v2741_v36  ;;  %v2665_v26 = vpop.f32.mrb[17].mxu0  ;;  %v1538_v36 = vld [vmem:[%s5869_s5 + $0x28] sm:$0xff]  ;;  %v1541_v2 = vld [vmem:[%s5869_s5 + $0x40] sm:$0xff] }
 0x121   :  { %v2666_v10 = vadd.f32 %v2665_v26, %v2664_v15  ;;  %v1582_v15 = vld [vmem:[%s5869_s5 + $0x188] sm:$0xff]  ;;  %3593 = vmatprep.subr.bf16.mxu1 %v3592_v5  ;;  %v1585_v41 = vld [vmem:[%s5869_s5 + $0x1a0] sm:$0xff] }
 0x122   :  { %v4778_v9 = vadd.f32 %v2743_v14, %v621_v13  ;;  %v3594_v13 = vpack.c.bf16 %v1538_v36, %v1537_v62  ;;  %v1581_v14 = vld [vmem:[%s5869_s5 + $0x180] sm:$0xff]  ;;  %v3624_v5 = vpack.c.bf16 %v1586_v55, %v1585_v41  ;;  %v1570_v36 = vld [vmem:[%s5869_s5 + $0x128] sm:$0xff]  ;;  %v1563_v41 = vld [vmem:[%s5869_s5 + $0xf0] sm:$0xff] }
 0x123   :  { %v2744_v3 = vpop.f32.mrb[16].mxu1  ;;  %v626_v19 = vadd.f32 %v2666_v10, %v4736_v17  ;;  %v2667_v23 = vpop.f32.mrb[18].mxu0  ;;  %v3616_v10 = vpack.c.bf16 %v1582_v15, %v1581_v14  ;;  %v1569_v62 = vld [vmem:[%s5869_s5 + $0x120] sm:$0xff]  ;;  %v1560_v14 = vld [vmem:[%s5869_s5 + $0xd8] sm:$0xff] }
 0x124   :  { %v2745_v12 = vpop.f32.mrb[17].mxu1  ;;  %v2668_v24 = vpop.f32.mrb[19].mxu0  ;;  %3595 = vmatpush3.bf16.msra.mxu1 %v3594_v13  ;;  %v1559_v13 = vld [vmem:[%s5869_s5 + $0xd0] sm:$0xff]  ;;  %v3626_v15 = vpack.c.bf16 %v1570_v36, %v1569_v62  ;;  %v1564_v55 = vld [vmem:[%s5869_s5 + $0xf8] sm:$0xff] }
 0x125   :  { %v2746_v22 = vadd.f32 %v2745_v12, %v2744_v3  ;;  %v2669_v27 = vadd.f32 %v2668_v24, %v2667_v23  ;;  %v1565_v3 = vld [vmem:[%s5869_s5 + $0x100] sm:$0xff]  ;;  %3617 = vmatprep.subr.bf16.mxu0 %v3616_v10  ;;  %v3612_v62 = vpack.c.bf16 %v1564_v55, %v1563_v41  ;;  %v1547_v36 = vld [vmem:[%s5869_s5 + $0x70] sm:$0xff] }
 0x126   :  { %v3618_v23 = vpack.c.bf16 %v1566_v11, %v1565_v3  ;;  %v3604_v3 = vpack.c.bf16 %v1560_v14, %v1559_v13  ;;  %v1543_v11 = vld [vmem:[%s5869_s5 + $0x50] sm:$0xff] }
 0x127   :  { %v4781_v25 = vadd.f32 %v2746_v22, %v626_v19  ;;  %v2747_v28 = vpop.f32.mrb[18].mxu1  ;;  %v631_v33 = vadd.f32 %v2669_v27, %v4736_v17  ;;  %v2670_v40 = vpop.f32.mrb[20].mxu0  ;;  %v1555_v19 = vld [vmem:[%s5869_s5 + $0xb0] sm:$0xff]  ;;  %v1556_v22 = vld [vmem:[%s5869_s5 + $0xb8] sm:$0xff] }
 0x128   :  { %v2748_v31 = vpop.f32.mrb[19].mxu1  ;;  %v2671_v44 = vpop.f32.mrb[21].mxu0  ;;  %3619 = vmatpush3.bf16.msra.mxu0 %v3618_v23  ;;  %v1587_v23 = vld [vmem:[%s5869_s5 + $0x1b0] sm:$0xff] }
 0x129   :  { %v2749_v39 = vadd.f32 %v2748_v31, %v2747_v28  ;;  %v2672_v47 = vadd.f32 %v2671_v44, %v2670_v40  ;;  %v3596_v31 = vpack.c.bf16 %v1556_v22, %v1555_v19  ;;  %v1591_v14 = vld [vmem:[%s5869_s5 + $0x1d0] sm:$0xff] }
 0x12b   :  { %v4784_v45 = vadd.f32 %v2749_v39, %v631_v33  ;;  %v2750_v49 = vpop.f32.mrb[20].mxu1  ;;  %v636_v51 = vadd.f32 %v2672_v47, %v4736_v17  ;;  %v1539_v33 = vld [vmem:[%s5869_s5 + $0x30] sm:$0xff]  ;;  %v1540_v39 = vld [vmem:[%s5869_s5 + $0x38] sm:$0xff]  ;;  %3597 = vmatprep.subr.bf16.mxu1 %v3596_v31 }
 0x12c   :  { %v2751_v50 = vpop.f32.mrb[21].mxu1  ;;  %v2673_v43 = vpop.f32.mrb[22].mxu0  ;;  %v3598_v44 = vpack.c.bf16 %v1540_v39, %v1539_v33  ;;  %v1583_v47 = vld [vmem:[%s5869_s5 + $0x190] sm:$0xff]  ;;  %v1572_v39 = vld [vmem:[%s5869_s5 + $0x138] sm:$0xff] }
 0x12d   :  { %v2752_v53 = vadd.f32 %v2751_v50, %v2750_v49  ;;  %v2674_v54 = vpop.f32.mrb[23].mxu0  ;;  %v1584_v49 = vld [vmem:[%s5869_s5 + $0x198] sm:$0xff]  ;;  %v1571_v33 = vld [vmem:[%s5869_s5 + $0x130] sm:$0xff] }
 0x12e   :  { %v2675_v37 = vadd.f32 %v2674_v54, %v2673_v43  ;;  %v3620_v43 = vpack.c.bf16 %v1584_v49, %v1583_v47  ;;  %v1567_v54 = vld [vmem:[%s5869_s5 + $0x110] sm:$0xff]  ;;  %3599 = vmatpush3.bf16.msra.mxu1 %v3598_v44  ;;  %v1561_v44 = vld [vmem:[%s5869_s5 + $0xe0] sm:$0xff]  ;;  %v1562_v47 = vld [vmem:[%s5869_s5 + $0xe8] sm:$0xff]  ;;  %v3630_v49 = vpack.c.bf16 %v1572_v39, %v1571_v33 }
 0x12f   :  { %v4787_v56 = vadd.f32 %v2752_v53, %v636_v51  ;;  %v2753_v57 = vpop.f32.mrb[22].mxu1  ;;  %v1593_v33 = vld [vmem:[%s5869_s5 + $0x1e0] sm:$0xff]  ;;  %v1594_v39 = vld [vmem:[%s5869_s5 + $0x1e8] sm:$0xff] }
 0x130   :  { %v2754_v38 = vpop.f32.mrb[23].mxu1  ;;  %v641_v46 = vadd.f32 %v2675_v37, %v4736_v17  ;;  %v2676_v52 = vpop.f32.mrb[24].mxu0  ;;  %v1568_v37 = vld [vmem:[%s5869_s5 + $0x118] sm:$0xff]  ;;  %3621 = vmatprep.subr.bf16.mxu0 %v3620_v43 }
 0x131   :  { %v2755_v59 = vadd.f32 %v2754_v38, %v2753_v57  ;;  %v2677_v7 = vpop.f32.mrb[25].mxu0  ;;  %v1557_v38 = vld [vmem:[%s5869_s5 + $0xc0] sm:$0xff] }
 0x132   :  { %v2678_v20 = vadd.f32 %v2677_v7, %v2676_v52 }
 0x133   :  { %v4796_v18 = vadd.f32 %v2755_v59, %v641_v46  ;;  %v2756_v4 = vpop.f32.mrb[24].mxu1  ;;  %v1558_v46 = vld [vmem:[%s5869_s5 + $0xc8] sm:$0xff]  ;;  %v3622_v59 = vpack.c.bf16 %v1568_v37, %v1567_v54  ;;  %v3608_v54 = vpack.c.bf16 %v1562_v47, %v1561_v44  ;;  %v1545_v37 = vld [vmem:[%s5869_s5 + $0x60] sm:$0xff] }
 0x134   :  { %v2757_v8 = vpop.f32.mrb[25].mxu1  ;;  %v646_v21 = vadd.f32 %v2678_v20, %v4736_v17  ;;  %v2679_v58 = vpop.f32.mrb[26].mxu0  ;;  %v3600_v7 = vpack.c.bf16 %v1558_v46, %v1557_v38  ;;  %v1542_v20 = vld [vmem:[%s5869_s5 + $0x48] sm:$0xff] }
 0x135   :  { %v2758_v42 = vadd.f32 %v2757_v8, %v2756_v4  ;;  %v2680_v63 = vpop.f32.mrb[27].mxu0  ;;  %v3602_v8 = vpack.c.bf16 %v1542_v20, %v1541_v2  ;;  %3623 = vmatpush3.bf16.msra.mxu0 %v3622_v59  ;;  %v1589_v59 = vld [vmem:[%s5869_s5 + $0x1c0] sm:$0xff]  ;;  %v1574_v20 = vld [vmem:[%s5869_s5 + $0x148] sm:$0xff] }
 0x136   :  { %v2681_v60 = vadd.f32 %v2680_v63, %v2679_v58  ;;  %3601 = vmatprep.subr.bf16.mxu1 %v3600_v7  ;;  %3625 = vmatprep.subr.bf16.mxu0 %v3624_v5  ;;  %v1573_v2 = vld [vmem:[%s5869_s5 + $0x140] sm:$0xff] }
 0x137   :  { %v4817_v26 = vadd.f32 %v2758_v42, %v646_v21  ;;  %v2759_v0 = vpop.f32.mrb[26].mxu1  ;;  %3603 = vmatpush3.bf16.msra.mxu1 %v3602_v8  ;;  %v3634_v8 = vpack.c.bf16 %v1574_v20, %v1573_v2  ;;  %v1597_v20 = vld [vmem:[%s5869_s5 + $0x200] sm:$0xff] }
 0x138   :  { %v2760_v12 = vpop.f32.mrb[27].mxu1  ;;  %v651_v24 = vadd.f32 %v2681_v60, %v4736_v17  ;;  %v2682_v28 = vpop.f32.mrb[28].mxu0  ;;  %3605 = vmatprep.subr.bf16.mxu1 %v3604_v3 }
 0x139   :  { %v2761_v27 = vadd.f32 %v2760_v12, %v2759_v0  ;;  %v2683_v40 = vpop.f32.mrb[29].mxu0  ;;  %v1544_v12 = vld [vmem:[%s5869_s5 + $0x58] sm:$0xff]  ;;  %3627 = vmatpush3.bf16.msra.mxu0 %v3626_v15 }
 0x13a   :  { %v2684_v51 = vadd.f32 %v2683_v40, %v2682_v28  ;;  %v3606_v22 = vpack.c.bf16 %v1544_v12, %v1543_v11  ;;  %v1575_v11 = vld [vmem:[%s5869_s5 + $0x150] sm:$0xff]  ;;  %v1576_v12 = vld [vmem:[%s5869_s5 + $0x158] sm:$0xff] }
 0x13b   :  { %v4844_v50 = vadd.f32 %v2761_v27, %v651_v24  ;;  %v2762_v53 = vpop.f32.mrb[28].mxu1 }
 0x13c   :  { %v2763_v57 = vpop.f32.mrb[29].mxu1  ;;  %v656_v52 = vadd.f32 %v2684_v51, %v4736_v17  ;;  %v2685_v6 = vpop.f32.mrb[30].mxu0  ;;  %3607 = vmatpush3.bf16.msra.mxu1 %v3606_v22  ;;  %v3638_v22 = vpack.c.bf16 %v1576_v12, %v1575_v11 }
 0x13d   :  { %v2764_v61 = vadd.f32 %v2763_v57, %v2762_v53  ;;  %v2686_v4 = vpop.f32.mrb[31].mxu0  ;;  %v1546_v57 = vld [vmem:[%s5869_s5 + $0x68] sm:$0xff]  ;;  %3609 = vmatprep.subr.bf16.mxu1 %v3608_v54  ;;  %v1595_v54 = vld [vmem:[%s5869_s5 + $0x1f0] sm:$0xff] }
 0x13e   :  { %v2687_v42 = vadd.f32 %v2686_v4, %v2685_v6  ;;  %v3610_v46 = vpack.c.bf16 %v1546_v57, %v1545_v37  ;;  %v1596_v37 = vld [vmem:[%s5869_s5 + $0x1f8] sm:$0xff]  ;;  %v1613_v57 = vld [vmem:[%s5869_s5 + $0x280] sm:$0xff] }
 0x13f   :  { %v4871_v21 = vadd.f32 %v2764_v61, %v656_v52  ;;  %v2765_v58 = vpop.f32.mrb[30].mxu1 }
 0x140   :  { %v2766_v63 = vpop.f32.mrb[31].mxu1  ;;  %v661_v60 = vadd.f32 %v2687_v42, %v4736_v17  ;;  %v2800_v10 = vpop.f32.mrb[32].mxu0  ;;  %v1588_v17 = vld [vmem:[%s5869_s5 + $0x1b8] sm:$0xff]  ;;  %3611 = vmatpush3.bf16.msra.mxu1 %v3610_v46 }
 0x141   :  { %v2767_v0 = vadd.f32 %v2766_v63, %v2765_v58  ;;  %v2801_v19 = vpop.f32.mrb[33].mxu0  ;;  %v3628_v31 = vpack.c.bf16 %v1588_v17, %v1587_v23  ;;  %v1548_v63 = vld [vmem:[%s5869_s5 + $0x78] sm:$0xff]  ;;  %3613 = vmatprep.subr.bf16.mxu1 %v3612_v62 }
 0x142   :  { %v2802_v27 = vadd.f32 %v2801_v19, %v2800_v10  ;;  %v3614_v15 = vpack.c.bf16 %v1548_v63, %v1547_v36 }
 0x143   :  { %v4898_v24 = vadd.f32 %v2767_v0, %v661_v60  ;;  %v2880_v28 = vpop.f32.mrb[32].mxu1  ;;  %3629 = vmatprep.subr.bf16.mxu0 %v3628_v31 }
 0x144   :  { %v2881_v40 = vpop.f32.mrb[33].mxu1  ;;  %v876_v51 = vadd.f32 %v2802_v27, %v4739_v32  ;;  %v2803_v43 = vpop.f32.mrb[34].mxu0  ;;  %3631 = vmatpush3.bf16.msra.mxu0 %v3630_v49  ;;  %v1590_v32 = vld [vmem:[%s5869_s5 + $0x1c8] sm:$0xff]  ;;  %3615 = vmatpush3.bf16.msra.mxu1 %v3614_v15  ;;  %v1577_v49 = vld [vmem:[%s5869_s5 + $0x160] sm:$0xff] }
 0x145   :  { %v2882_v53 = vadd.f32 %v2881_v40, %v2880_v28  ;;  %v2804_v38 = vpop.f32.mrb[35].mxu0  ;;  %v3632_v7 = vpack.c.bf16 %v1590_v32, %v1589_v59  ;;  %v1405_v28 = vld [vmem:[#allocation2 + $0x1] sm:$0xff] }
 0x146   :  { %v2805_v52 = vadd.f32 %v2804_v38, %v2803_v43  ;;  %1748 = vmatprep.mubr.f32.mxu1 %v1405_v28  ;;  %v1614_v32 = vld [vmem:[%s5869_s5 + $0x288] sm:$0xff]  ;;  %v1615_v28 = vld [vmem:[%s5869_s5 + $0x290] sm:$0xff] }
 0x147   :  { %v2883_v61 = vpop.f32.mrb[34].mxu1  ;;  %v4925_v6 = vadd.f32 %v2882_v53, %v876_v51  ;;  %3633 = vmatprep.subr.bf16.mxu0 %v3632_v7  ;;  %v1578_v51 = vld [vmem:[%s5869_s5 + $0x168] sm:$0xff]  ;;  %1749 = vmatmul.mubr.f32.vlgmr.msra.gmra.mrb[64].mxu1 %v4691_v35  ;;  %v3644_v35 = vpack.c.bf16 %v1596_v37, %v1595_v54  ;;  %v3648_v2 = vpack.c.bf16 %v1614_v32, %v1613_v57 }
 0x148   :  { %v2884_v4 = vpop.f32.mrb[35].mxu1  ;;  %v881_v42 = vadd.f32 %v2805_v52, %v4742_v16  ;;  %v2806_v5 = vpop.f32.mrb[36].mxu0  ;;  %3635 = vmatpush3.bf16.msra.mxu0 %v3634_v8  ;;  %v1592_v16 = vld [vmem:[%s5869_s5 + $0x1d8] sm:$0xff]  ;;  %v3642_v43 = vpack.c.bf16 %v1578_v51, %v1577_v49  ;;  %v1579_v52 = vld [vmem:[%s5869_s5 + $0x170] sm:$0xff] }
 0x149   :  { %v2885_v58 = vadd.f32 %v2884_v4, %v2883_v61  ;;  %v2807_v13 = vpop.f32.mrb[37].mxu0  ;;  %v3636_v3 = vpack.c.bf16 %v1592_v16, %v1591_v14  ;;  %v1580_v61 = vld [vmem:[%s5869_s5 + $0x178] sm:$0xff]  ;;  %v1598_v4 = vld [vmem:[%s5869_s5 + $0x208] sm:$0xff]  ;;  %3649 = vmatprep.subr.bf16.mxu1 %v3648_v2 }
 0x14a   :  { %v2808_v60 = vadd.f32 %v2807_v13, %v2806_v5 }
 0x14b   :  { %v2886_v0 = vpop.f32.mrb[36].mxu1  ;;  %v4952_v10 = vadd.f32 %v2885_v58, %v881_v42  ;;  %3637 = vmatprep.subr.bf16.mxu0 %v3636_v3  ;;  %v3650_v42 = vpack.c.bf16 %v1598_v4, %v1597_v20 }
 0x14c   :  { %v2887_v19 = vpop.f32.mrb[37].mxu1  ;;  %v886_v23 = vadd.f32 %v2808_v60, %v4745_v30  ;;  %v2809_v27 = vpop.f32.mrb[38].mxu0  ;;  %3639 = vmatpush3.bf16.msra.mxu0 %v3638_v22  ;;  %v3640_v30 = vpack.c.bf16 %v1594_v39, %v1593_v33  ;;  %v1599_v39 = vld [vmem:[%s5869_s5 + $0x210] sm:$0xff] }
 0x14d   :  { %v2888_v17 = vadd.f32 %v2887_v19, %v2886_v0  ;;  %v2810_v31 = vpop.f32.mrb[39].mxu0  ;;  %3651 = vmatpush3.bf16.msra.mxu1 %v3650_v42 }
 0x14e   :  { %v2811_v40 = vadd.f32 %v2810_v31, %v2809_v27  ;;  %3641 = vmatprep.subr.bf16.mxu0 %v3640_v30 }
 0x14f   :  { %v2889_v44 = vpop.f32.mrb[38].mxu1  ;;  %v4967_v47 = vadd.f32 %v2888_v17, %v886_v23 }
 0x150   :  { %v2890_v53 = vpop.f32.mrb[39].mxu1  ;;  %v891_v38 = vadd.f32 %v2811_v40, %v4748_v48  ;;  %v2812_v59 = vpop.f32.mrb[40].mxu0  ;;  %3643 = vmatpush3.bf16.msra.mxu0 %v3642_v43  ;;  %v3646_v48 = vpack.c.bf16 %v1580_v61, %v1579_v52  ;;  %v1617_v61 = vld [vmem:[%s5869_s5 + $0x2a0] sm:$0xff] }
 0x151   :  { %v2891_v46 = vadd.f32 %v2890_v53, %v2889_v44  ;;  %v2813_v7 = vpop.f32.mrb[41].mxu0  ;;  %3645 = vmatprep.subr.bf16.mxu0 %v3644_v35 }
 0x152   :  { %v2814_v8 = vadd.f32 %v2813_v7, %v2812_v59 }
 0x153   :  { %v2892_v41 = vpop.f32.mrb[40].mxu1  ;;  %v5001_v55 = vadd.f32 %v2891_v46, %v891_v38 }
 0x154   :  { %v2893_v58 = vpop.f32.mrb[41].mxu1  ;;  %v896_v5 = vadd.f32 %v2814_v8, %v4751_v29  ;;  %v2815_v36 = vpop.f32.mrb[42].mxu0  ;;  %3647 = vmatpush3.bf16.msra.mxu0 %v3646_v48  ;;  %v1601_v48 = vld [vmem:[%s5869_s5 + $0x220] sm:$0xff] }
 0x155   :  { %v2894_v62 = vadd.f32 %v2893_v58, %v2892_v41  ;;  %v2816_v63 = vpop.f32.mrb[43].mxu0 }
 0x156   :  { %v2817_v13 = vadd.f32 %v2816_v63, %v2815_v36 }
 0x157   :  { %v2895_v14 = vpop.f32.mrb[42].mxu1  ;;  %v5004_v16 = vadd.f32 %v2894_v62, %v896_v5 }
 0x158   :  { %v2896_v15 = vpop.f32.mrb[43].mxu1  ;;  %v901_v60 = vadd.f32 %v2817_v13, %v4754_v1  ;;  %v2818_v3 = vpop.f32.mrb[44].mxu0  ;;  %v1616_v1 = vld [vmem:[%s5869_s5 + $0x298] sm:$0xff] }
 0x159   :  { %v2897_v0 = vadd.f32 %v2896_v15, %v2895_v14  ;;  %v2819_v11 = vpop.f32.mrb[45].mxu0  ;;  %v3652_v33 = vpack.c.bf16 %v1616_v1, %v1615_v28 }
 0x15a   :  { %v2820_v12 = vadd.f32 %v2819_v11, %v2818_v3  ;;  %v1619_v11 = vld [vmem:[%s5869_s5 + $0x2b0] sm:$0xff] }
 0x15b   :  { %v2898_v19 = vpop.f32.mrb[44].mxu1  ;;  %v5007_v22 = vadd.f32 %v2897_v0, %v901_v60  ;;  %3653 = vmatprep.subr.bf16.mxu1 %v3652_v33 }
 0x15c   :  { %v2899_v29 = vpop.f32.mrb[45].mxu1  ;;  %v906_v23 = vadd.f32 %v2820_v12, %v4769_v34  ;;  %v2821_v27 = vpop.f32.mrb[46].mxu0  ;;  %v1600_v34 = vld [vmem:[%s5869_s5 + $0x218] sm:$0xff] }
 0x15d   :  { %v2900_v17 = vadd.f32 %v2899_v29, %v2898_v19  ;;  %v2822_v31 = vpop.f32.mrb[47].mxu0  ;;  %v3654_v49 = vpack.c.bf16 %v1600_v34, %v1599_v39  ;;  %v1603_v29 = vld [vmem:[%s5869_s5 + $0x230] sm:$0xff] }
 0x15e   :  { %v2823_v40 = vadd.f32 %v2822_v31, %v2821_v27 }
 0x15f   :  { %v2901_v44 = vpop.f32.mrb[46].mxu1  ;;  %v5022_v30 = vadd.f32 %v2900_v17, %v906_v23  ;;  %3655 = vmatpush3.bf16.msra.mxu1 %v3654_v49 }
 0x160   :  { %v2902_v51 = vpop.f32.mrb[47].mxu1  ;;  %v911_v53 = vadd.f32 %v2823_v40, %v4778_v9  ;;  %v2824_v54 = vpop.f32.mrb[48].mxu0  ;;  %v1618_v9 = vld [vmem:[%s5869_s5 + $0x2a8] sm:$0xff]  ;;  %v1645_v40 = vld [vmem:[%s5869_s5 + $0x380] sm:$0xff] }
 0x161   :  { %v2903_v43 = vadd.f32 %v2902_v51, %v2901_v44  ;;  %v2825_v37 = vpop.f32.mrb[49].mxu0  ;;  %v3656_v2 = vpack.c.bf16 %v1618_v9, %v1617_v61  ;;  %v1646_v44 = vld [vmem:[%s5869_s5 + $0x388] sm:$0xff] }
 0x162   :  { %v2826_v57 = vadd.f32 %v2825_v37, %v2824_v54 }
 0x163   :  { %v2904_v38 = vpop.f32.mrb[48].mxu1  ;;  %v5025_v46 = vadd.f32 %v2903_v43, %v911_v53  ;;  %3657 = vmatprep.subr.bf16.mxu1 %v3656_v2  ;;  %v3680_v43 = vpack.c.bf16 %v1646_v44, %v1645_v40  ;;  %v1625_v44 = vld [vmem:[%s5869_s5 + $0x2e0] sm:$0xff] }
 0x164   :  { %v2905_v59 = vpop.f32.mrb[49].mxu1  ;;  %v916_v35 = vadd.f32 %v2826_v57, %v4781_v25  ;;  %v2827_v52 = vpop.f32.mrb[50].mxu0  ;;  %v1602_v25 = vld [vmem:[%s5869_s5 + $0x228] sm:$0xff] }
 0x165   :  { %v2906_v32 = vadd.f32 %v2905_v59, %v2904_v38  ;;  %v2828_v7 = vpop.f32.mrb[51].mxu0  ;;  %v3658_v41 = vpack.c.bf16 %v1602_v25, %v1601_v48  ;;  %3681 = vmatprep.subr.bf16.mxu0 %v3680_v43  ;;  %v1621_v38 = vld [vmem:[%s5869_s5 + $0x2c0] sm:$0xff]  ;;  %v1622_v59 = vld [vmem:[%s5869_s5 + $0x2c8] sm:$0xff] }
 0x166   :  { %v2829_v20 = vadd.f32 %v2828_v7, %v2827_v52  ;;  %v1605_v52 = vld [vmem:[%s5869_s5 + $0x240] sm:$0xff]  ;;  %v1610_v43 = vld [vmem:[%s5869_s5 + $0x268] sm:$0xff] }
 0x167   :  { %v2907_v4 = vpop.f32.mrb[50].mxu1  ;;  %v5040_v8 = vadd.f32 %v2906_v32, %v916_v35  ;;  %3659 = vmatpush3.bf16.msra.mxu1 %v3658_v41  ;;  %v3664_v32 = vpack.c.bf16 %v1622_v59, %v1621_v38 }
 0x168   :  { %v2908_v42 = vpop.f32.mrb[51].mxu1  ;;  %v921_v58 = vadd.f32 %v2829_v20, %v4784_v45  ;;  %v2830_v62 = vpop.f32.mrb[52].mxu0  ;;  %v1620_v45 = vld [vmem:[%s5869_s5 + $0x2b8] sm:$0xff] }
 0x169   :  { %v2909_v5 = vadd.f32 %v2908_v42, %v2907_v4  ;;  %v2831_v36 = vpop.f32.mrb[53].mxu0  ;;  %v3660_v19 = vpack.c.bf16 %v1620_v45, %v1619_v11 }
 0x16a   :  { %v2832_v63 = vadd.f32 %v2831_v36, %v2830_v62 }
 0x16b   :  { %v2910_v13 = vpop.f32.mrb[52].mxu1  ;;  %v5043_v14 = vadd.f32 %v2909_v5, %v921_v58  ;;  %3661 = vmatprep.subr.bf16.mxu1 %v3660_v19 }
 0x16c   :  { %v2911_v15 = vpop.f32.mrb[53].mxu1  ;;  %v926_v60 = vadd.f32 %v2832_v63, %v4787_v56  ;;  %v2833_v3 = vpop.f32.mrb[54].mxu0  ;;  %v1604_v56 = vld [vmem:[%s5869_s5 + $0x238] sm:$0xff] }
 0x16d   :  { %v2912_v0 = vadd.f32 %v2911_v15, %v2910_v13  ;;  %v2834_v12 = vpop.f32.mrb[55].mxu0  ;;  %v3662_v28 = vpack.c.bf16 %v1604_v56, %v1603_v29  ;;  %v1623_v15 = vld [vmem:[%s5869_s5 + $0x2d0] sm:$0xff] }
 0x16e   :  { %v2835_v23 = vadd.f32 %v2834_v12, %v2833_v3  ;;  %v1607_v3 = vld [vmem:[%s5869_s5 + $0x250] sm:$0xff] }
 0x16f   :  { %v2913_v17 = vpop.f32.mrb[54].mxu1  ;;  %v5058_v27 = vadd.f32 %v2912_v0, %v926_v60  ;;  %3663 = vmatpush3.bf16.msra.mxu1 %v3662_v28 }
 0x170   :  { %v2914_v1 = vpop.f32.mrb[55].mxu1  ;;  %v931_v31 = vadd.f32 %v2835_v23, %v4796_v18  ;;  %v2836_v39 = vpop.f32.mrb[56].mxu0  ;;  %3665 = vmatprep.subr.bf16.mxu1 %v3664_v32 }
 0x171   :  { %v2915_v33 = vadd.f32 %v2914_v1, %v2913_v17  ;;  %v2837_v34 = vpop.f32.mrb[57].mxu0 }
 0x172   :  { %v2838_v49 = vadd.f32 %v2837_v34, %v2836_v39 }
 0x173   :  { %v2916_v51 = vpop.f32.mrb[56].mxu1  ;;  %v5067_v53 = vadd.f32 %v2915_v33, %v931_v31 }
 0x174   :  { %v2917_v54 = vpop.f32.mrb[57].mxu1  ;;  %v936_v18 = vadd.f32 %v2838_v49, %v4817_v26  ;;  %v2839_v57 = vpop.f32.mrb[58].mxu0  ;;  %v1606_v26 = vld [vmem:[%s5869_s5 + $0x248] sm:$0xff] }
 0x175   :  { %v2918_v37 = vadd.f32 %v2917_v54, %v2916_v51  ;;  %v2840_v35 = vpop.f32.mrb[59].mxu0  ;;  %v3666_v2 = vpack.c.bf16 %v1606_v26, %v1605_v52 }
 0x176   :  { %v2841_v61 = vadd.f32 %v2840_v35, %v2839_v57 }
 0x177   :  { %v2919_v9 = vpop.f32.mrb[58].mxu1  ;;  %v5082_v7 = vadd.f32 %v2918_v37, %v936_v18  ;;  %3667 = vmatpush3.bf16.msra.mxu1 %v3666_v2 }
 0x178   :  { %v2920_v48 = vpop.f32.mrb[59].mxu1  ;;  %v941_v25 = vadd.f32 %v2841_v61, %v4844_v50  ;;  %v2842_v4 = vpop.f32.mrb[60].mxu0  ;;  %v1624_v50 = vld [vmem:[%s5869_s5 + $0x2d8] sm:$0xff] }
 0x179   :  { %v2921_v20 = vadd.f32 %v2920_v48, %v2919_v9  ;;  %v2843_v41 = vpop.f32.mrb[61].mxu0  ;;  %v3668_v0 = vpack.c.bf16 %v1624_v50, %v1623_v15 }
 0x17a   :  { %v2844_v42 = vadd.f32 %v2843_v41, %v2842_v4  ;;  %v1627_v41 = vld [vmem:[%s5869_s5 + $0x2f0] sm:$0xff] }
 0x17b   :  { %v2922_v58 = vpop.f32.mrb[60].mxu1  ;;  %v5085_v5 = vadd.f32 %v2921_v20, %v941_v25  ;;  %3669 = vmatprep.subr.bf16.mxu1 %v3668_v0 }
 0x17c   :  { %v2923_v62 = vpop.f32.mrb[61].mxu1  ;;  %v946_v36 = vadd.f32 %v2844_v42, %v4871_v21  ;;  %v2845_v13 = vpop.f32.mrb[62].mxu0  ;;  %v1608_v21 = vld [vmem:[%s5869_s5 + $0x258] sm:$0xff] }
 0x17d   :  { %v2924_v63 = vadd.f32 %v2923_v62, %v2922_v58  ;;  %v2846_v60 = vpop.f32.mrb[63].mxu0  ;;  %v3670_v19 = vpack.c.bf16 %v1608_v21, %v1607_v3  ;;  %v1628_v42 = vld [vmem:[%s5869_s5 + $0x2f8] sm:$0xff] }
 0x17e   :  { %v2847_v11 = vadd.f32 %v2846_v60, %v2845_v13  ;;  %v3676_v62 = vpack.c.bf16 %v1628_v42, %v1627_v41 }
 0x17f   :  { %v2925_v45 = vpop.f32.mrb[62].mxu1  ;;  %v5100_v12 = vadd.f32 %v2924_v63, %v946_v36  ;;  %3671 = vmatpush3.bf16.msra.mxu1 %v3670_v19  ;;  %v1611_v36 = vld [vmem:[%s5869_s5 + $0x270] sm:$0xff]  ;;  %v1612_v63 = vld [vmem:[%s5869_s5 + $0x278] sm:$0xff] }
 0x180   :  { %v2926_v29 = vpop.f32.mrb[63].mxu1  ;;  %v951_v56 = vadd.f32 %v2847_v11, %v4898_v24  ;;  %v3346_v17 = vpop.f32.mrb[64].mxu0  ;;  %v1626_v24 = vld [vmem:[%s5869_s5 + $0x2e8] sm:$0xff]  ;;  %v3678_v0 = vpack.c.bf16 %v1612_v63, %v1611_v36 }
 0x181   :  { %v2927_v23 = vadd.f32 %v2926_v29, %v2925_v45  ;;  %v1171_v28 = vadd.f32 %v3346_v17, %v4952_v10  ;;  %v1165_v1 = vpop.f32.mrb[65].mxu0  ;;  %v3672_v51 = vpack.c.bf16 %v1626_v24, %v1625_v44 }
 0x182   :  { %v1166_v31 = vadd.f32 %v1165_v1, %v4925_v6  ;;  %v1609_v6 = vld [vmem:[%s5869_s5 + $0x260] sm:$0xff] }
 0x183   :  { %v5105_v33 = vadd.f32 %v2927_v23, %v951_v56  ;;  %v5107_v39 = vmax.f32 %v1171_v28, 0.0  ;;  %3673 = vmatprep.subr.bf16.mxu1 %v3672_v51 }
 0x184   :  { %v5109_v34 = vmax.f32 %v1166_v31, 0.0  ;;  %v3349_v40 = vpop.f32.mrb[66].mxu0 }
 0x185   :  { %v1181_v10 = vadd.f32 %v3349_v40, %v5001_v55  ;;  %v1175_v49 = vpop.f32.mrb[67].mxu0  ;;  %v1283_v54 = vmul.f32 %v5107_v39, %v5107_v39  ;;  %v3674_v55 = vpack.c.bf16 %v1610_v43, %v1609_v6 }
 0x186   :  { %v1282_v18 = vmul.f32 %v5109_v34, %v5109_v34  ;;  %v1176_v37 = vadd.f32 %v1175_v49, %v4967_v47  ;;  %v1260_v57 = vadd.f32 %v5107_v39, %v5109_v34 }
 0x187   :  { %v5131_v38 = vmax.f32 %v1181_v10, 0.0  ;;  %3675 = vmatpush3.bf16.msra.mxu1 %v3674_v55  ;;  %v1661_v10 = vld [vmem:[%s5869_s5 + $0x400] sm:$0xff] }
 0x188   :  { %v5133_v59 = vmax.f32 %v1176_v37, 0.0  ;;  %v3352_v35 = vpop.f32.mrb[68].mxu0  ;;  %v1298_v26 = vadd.f32 %v1283_v54, %v1282_v18  ;;  %3677 = vmatprep.subr.bf16.mxu1 %v3676_v62 }
 0x189   :  { %v1191_v32 = vadd.f32 %v3352_v35, %v5007_v22  ;;  %v1185_v52 = vpop.f32.mrb[69].mxu0  ;;  %v1285_v48 = vmul.f32 %v5131_v38, %v5131_v38 }
 0x18a   :  { %v1261_v61 = vadd.f32 %v1260_v57, %v5133_v59  ;;  %v1284_v47 = vmul.f32 %v5133_v59, %v5133_v59  ;;  %v1186_v9 = vadd.f32 %v1185_v52, %v5004_v16 }
 0x18b   :  { %v5140_v2 = vmax.f32 %v1191_v32, 0.0  ;;  %3679 = vmatpush3.bf16.msra.mxu1 %v3678_v0 }
 0x18c   :  { %v1299_v25 = vadd.f32 %v1298_v26, %v1284_v47  ;;  %v5144_v20 = vmax.f32 %v1186_v9, 0.0  ;;  %v1262_v22 = vadd.f32 %v1261_v61, %v5131_v38  ;;  %v3355_v4 = vpop.f32.mrb[70].mxu0 }
 0x18d   :  { %v1201_v16 = vadd.f32 %v3355_v4, %v5025_v46  ;;  %v1195_v58 = vpop.f32.mrb[71].mxu0  ;;  %v1287_v46 = vmul.f32 %v5140_v2, %v5140_v2 }
 0x18e   :  { %v1263_v13 = vadd.f32 %v1262_v22, %v5144_v20  ;;  %v1286_v15 = vmul.f32 %v5144_v20, %v5144_v20  ;;  %v1300_v50 = vadd.f32 %v1299_v25, %v1285_v48  ;;  %v1196_v60 = vadd.f32 %v1195_v58, %v5022_v30 }
 0x18f   :  { %v5166_v21 = vmax.f32 %v1201_v16, 0.0 }
 0x190   :  { %v1301_v3 = vadd.f32 %v1300_v50, %v1286_v15  ;;  %v5168_v11 = vmax.f32 %v1196_v60, 0.0  ;;  %v1264_v45 = vadd.f32 %v1263_v13, %v5140_v2  ;;  %v3358_v19 = vpop.f32.mrb[72].mxu0 }
 0x191   :  { %v1211_v29 = vadd.f32 %v3358_v19, %v5043_v14  ;;  %v1205_v56 = vpop.f32.mrb[73].mxu0  ;;  %v1289_v31 = vmul.f32 %v5166_v21, %v5166_v21 }
 0x192   :  { %v1265_v23 = vadd.f32 %v1264_v45, %v5168_v11  ;;  %v1288_v30 = vmul.f32 %v5168_v11, %v5168_v11  ;;  %v1302_v17 = vadd.f32 %v1301_v3, %v1287_v46  ;;  %v1206_v28 = vadd.f32 %v1205_v56, %v5040_v8  ;;  %v1662_v8 = vld [vmem:[%s5869_s5 + $0x408] sm:$0xff] }
 0x193   :  { %v5176_v1 = vmax.f32 %v1211_v29, 0.0  ;;  %v5196_v55 = vpack.c.bf16 %v1662_v8, %v1661_v10 }
 0x194   :  { %v1303_v40 = vadd.f32 %v1302_v17, %v1288_v30  ;;  %v5180_v44 = vmax.f32 %v1206_v28, 0.0  ;;  %v1266_v14 = vadd.f32 %v1265_v23, %v5166_v21  ;;  %v3361_v24 = vpop.f32.mrb[74].mxu0 }
 0x195   :  { %v1221_v49 = vadd.f32 %v3361_v24, %v5067_v53  ;;  %v1215_v51 = vpop.f32.mrb[75].mxu0  ;;  %v1291_v37 = vmul.f32 %v5176_v1, %v5176_v1  ;;  %3713 = vmatprep.subr.bf16.mxu1 %v5196_v55 }
 0x196   :  { %v1267_v6 = vadd.f32 %v1266_v14, %v5180_v44  ;;  %v1290_v43 = vmul.f32 %v5180_v44, %v5180_v44  ;;  %v1304_v54 = vadd.f32 %v1303_v40, %v1289_v31  ;;  %v1216_v18 = vadd.f32 %v1215_v51, %v5058_v27 }
 0x197   :  { %v5198_v53 = vmax.f32 %v1221_v49, 0.0 }
 0x198   :  { %v1305_v57 = vadd.f32 %v1304_v54, %v1290_v43  ;;  %v5200_v35 = vmax.f32 %v1216_v18, 0.0  ;;  %v1268_v32 = vadd.f32 %v1267_v6, %v5176_v1  ;;  %v3364_v52 = vpop.f32.mrb[76].mxu0 }
 0x199   :  { %v1231_v26 = vadd.f32 %v3364_v52, %v5085_v5  ;;  %v1225_v61 = vpop.f32.mrb[77].mxu0  ;;  %v1293_v22 = vmul.f32 %v5198_v53, %v5198_v53 }
 0x19a   :  { %v1269_v27 = vadd.f32 %v1268_v32, %v5200_v35  ;;  %v1292_v47 = vmul.f32 %v5200_v35, %v5200_v35  ;;  %v1306_v9 = vadd.f32 %v1305_v57, %v1291_v37  ;;  %v1226_v48 = vadd.f32 %v1225_v61, %v5082_v7  ;;  %v1322_v32 = vld [vmem:[%s5870_s3] sm:$0x1] }
 0x19b   :  { %v5209_v25 = vmax.f32 %v1231_v26, 0.0  ;;  %v1330_v37 = vlaneseq }
 0x19c   :  { %v1307_v4 = vadd.f32 %v1306_v9, %v1292_v47  ;;  %v5213_v41 = vmax.f32 %v1226_v48, 0.0  ;;  %v1270_v5 = vadd.f32 %v1269_v27, %v5198_v53  ;;  %v3367_v42 = vpop.f32.mrb[78].mxu0  ;;  %v1326_v27 = vld [vmem:[%s5871_s4] sm:$0x1] }
 0x19d   :  { %v1241_v16 = vadd.f32 %v3367_v42, %v5105_v33  ;;  %v1235_v58 = vpop.f32.mrb[79].mxu0  ;;  %v1295_v13 = vmul.f32 %v5209_v25, %v5209_v25  ;;  %v1331_v57 = vshrl.u32 %v1330_v37, 7 }
 0x19e   :  { %v1271_v62 = vadd.f32 %v1270_v5, %v5213_v41  ;;  %v1294_v36 = vmul.f32 %v5213_v41, %v5213_v41  ;;  %v1308_v7 = vadd.f32 %v1307_v4, %v1293_v22  ;;  %v1236_v63 = vadd.f32 %v1235_v58, %v5100_v12 }
 0x19f   :  { %v5223_v50 = vmax.f32 %v1241_v16, 0.0  ;;  %v5232_v52 = vsub.s32 0, %v1331_v57 }
 0x1a0   :  { %v1309_v15 = vadd.f32 %v1308_v7, %v1294_v36  ;;  %v1258_v60 = vmax.f32 %v1236_v63, 0.0  ;;  %v1272_v46 = vadd.f32 %v1271_v62, %v5209_v25 }
 0x1a1   :  { %v1297_v45 = vmul.f32 %v5223_v50, %v5223_v50 }
 0x1a2   :  { %v1273_v0 = vadd.f32 %v1272_v46, %v1258_v60  ;;  %v1296_v33 = vmul.f32 %v1258_v60, %v1258_v60  ;;  %v1310_v3 = vadd.f32 %v1309_v15, %v1295_v13 }
 0x1a4   :  { %v1274_v19 = vadd.f32 %v1273_v0, %v5223_v50  ;;  %v1311_v29 = vadd.f32 %v1310_v3, %v1296_v33 }
 0x1a6   :  { %v1275_v56 = vrot.slane %v1274_v19, 4  ;;  %v1312_v12 = vadd.f32 %v1311_v29, %v1297_v45  ;;  %v1630_v29 = vld [vmem:[%s5869_s5 + $0x308] sm:$0xff] }
 0x1a8   :  { %v1276_v23 = vadd.f32 %v1275_v56, %v1274_v19  ;;  %v1313_v30 = vrot.slane %v1312_v12, 4  ;;  %v1629_v19 = vld [vmem:[%s5869_s5 + $0x300] sm:$0xff]  ;;  %v1647_v56 = vld [vmem:[%s5869_s5 + $0x390] sm:$0xff] }
 0x1aa   :  { %v1277_v17 = vrot.slane %v1276_v23, 2  ;;  %v1314_v28 = vadd.f32 %v1313_v30, %v1312_v12  ;;  %v1648_v12 = vld [vmem:[%s5869_s5 + $0x398] sm:$0xff]  ;;  %v3682_v30 = vpack.c.bf16 %v1630_v29, %v1629_v19  ;;  %v1641_v29 = vld [vmem:[%s5869_s5 + $0x360] sm:$0xff] }
 0x1ac   :  { %v1278_v31 = vadd.f32 %v1277_v17, %v1276_v23  ;;  %v1315_v40 = vrot.slane %v1314_v28, 2  ;;  %v1421_v23 = vld [vmem:[#allocation2 + $0x2] sm:$0xff] }
 0x1ae   :  { %v1279_v14 = vrot.slane %v1278_v31, 1  ;;  %v1316_v24 = vadd.f32 %v1315_v40, %v1314_v28  ;;  %v3684_v28 = vpack.c.bf16 %v1648_v12, %v1647_v56  ;;  %v1632_v40 = vld [vmem:[%s5869_s5 + $0x318] sm:$0xff]  ;;  %v1642_v56 = vld [vmem:[%s5869_s5 + $0x368] sm:$0xff] }
 0x1b0   :  { %v1280_v10 = vadd.f32 %v1279_v14, %v1278_v31  ;;  %v1317_v49 = vrot.slane %v1316_v24, 1  ;;  %v1631_v31 = vld [vmem:[%s5869_s5 + $0x310] sm:$0xff]  ;;  %v1649_v14 = vld [vmem:[%s5869_s5 + $0x3a0] sm:$0xff] }
 0x1b2   :  { %v1281_v51 = vmul.f32 0.0078125, %v1280_v10  ;;  %v1318_v8 = vadd.f32 %v1317_v49, %v1316_v24  ;;  %v1650_v24 = vld [vmem:[%s5869_s5 + $0x3a8] sm:$0xff]  ;;  %v3686_v49 = vpack.c.bf16 %v1632_v40, %v1631_v31  ;;  %v3706_v31 = vpack.c.bf16 %v1642_v56, %v1641_v29  ;;  %v1672_v56 = vld [vmem:[%s5869_s5 + $0x458] sm:$0xff] }
 0x1b3   :  { %v1670_v29 = vld [vmem:[%s5869_s5 + $0x448] sm:$0xff] }
 0x1b4   :  { %v1319_v6 = vmul.f32 0.0078125, %v1318_v8  ;;  %v1320_v43 = vmul.f32 %v1281_v51, %v1281_v51  ;;  %v1633_v8 = vld [vmem:[%s5869_s5 + $0x320] sm:$0xff] }
 0x1b6   :  { %v1321_v54 = vsub.f32 %v1319_v6, %v1320_v43  ;;  %v1634_v6 = vld [vmem:[%s5869_s5 + $0x328] sm:$0xff] }
 0x1b7   :  { %v3690_v57 = vpack.c.bf16 %v1634_v6, %v1633_v8  ;;  %v5444_v6 = vld [vmem:[#allocation2] sm:$0xff] }
 0x1b8   :  { %v1323_v18 = vadd.f32 1e-05, %v1321_v54  ;;  %v1651_v54 = vld [vmem:[%s5869_s5 + $0x3b0] sm:$0xff] }
 0x1ba   :  { %3745 = vrsqrt.f32 %v1323_v18  ;;  %v1652_v18 = vld [vmem:[%s5869_s5 + $0x3b8] sm:$0xff] }
 0x1c4   :  { %v3746_v26 = vpop.eup %3745 }
 0x1c5   :  { %v1325_v61 = vmul.f32 %v3746_v26, %v1322_v32  ;;  %v3692_v32 = vpack.c.bf16 %v1652_v18, %v1651_v54  ;;  %v1635_v26 = vld [vmem:[%s5869_s5 + $0x330] sm:$0xff] }
 0x1c7   :  { %v1327_v47 = vmul.f32 %v1325_v61, %v1281_v51  ;;  %v1333_v9 = vrot.slane %v1325_v61, %v5232_v52  ;;  %v3688_v51 = vpack.c.bf16 %v1650_v24, %v1649_v14  ;;  %v1636_v61 = vld [vmem:[%s5869_s5 + $0x338] sm:$0xff]  ;;  %v1643_v14 = vld [vmem:[%s5869_s5 + $0x370] sm:$0xff] }
 0x1c8   :  { %v1644_v24 = vld [vmem:[%s5869_s5 + $0x378] sm:$0xff] }
 0x1c9   :  { %v1328_v48 = vsub.f32 %v1326_v27, %v1327_v47  ;;  %v1349_v22 = vmul.f32 %v1333_v9, %v1258_v60  ;;  %v1335_v4 = vmul.f32 %v1333_v9, %v5109_v34  ;;  %v1336_v5 = vmul.f32 %v1333_v9, %v5107_v39  ;;  %v1653_v47 = vld [vmem:[%s5869_s5 + $0x3c0] sm:$0xff] }
 0x1ca   :  { %v1337_v42 = vmul.f32 %v1333_v9, %v5133_v59  ;;  %v1338_v16 = vmul.f32 %v1333_v9, %v5131_v38  ;;  %v1339_v58 = vmul.f32 %v1333_v9, %v5144_v20  ;;  %v1340_v62 = vmul.f32 %v1333_v9, %v5140_v2 }
 0x1cb   :  { %v1355_v36 = vrot.slane %v1328_v48, %v5232_v52  ;;  %v1341_v7 = vmul.f32 %v1333_v9, %v5168_v11  ;;  %v1342_v63 = vmul.f32 %v1333_v9, %v5166_v21  ;;  %v1343_v13 = vmul.f32 %v1333_v9, %v5180_v44 }
 0x1cc   :  { %v1344_v34 = vmul.f32 %v1333_v9, %v5176_v1  ;;  %v1345_v39 = vmul.f32 %v1333_v9, %v5200_v35  ;;  %v1346_v59 = vmul.f32 %v1333_v9, %v5198_v53  ;;  %v1347_v38 = vmul.f32 %v1333_v9, %v5213_v41 }
 0x1cd   :  { %v5252_v15 = vadd.f32 %v1355_v36, %v1349_v22  ;;  %v5254_v20 = vadd.f32 %v1355_v36, %v1335_v4  ;;  %v5256_v2 = vadd.f32 %v1355_v36, %v1336_v5  ;;  %v5258_v60 = vadd.f32 %v1355_v36, %v1337_v42  ;;  %v1637_v5 = vld [vmem:[%s5869_s5 + $0x340] sm:$0xff]  ;;  %v1638_v42 = vld [vmem:[%s5869_s5 + $0x348] sm:$0xff] }
 0x1ce   :  { %v5260_v11 = vadd.f32 %v1355_v36, %v1338_v16  ;;  %v5262_v21 = vadd.f32 %v1355_v36, %v1339_v58  ;;  %v5264_v44 = vadd.f32 %v1355_v36, %v1340_v62  ;;  %v5266_v1 = vadd.f32 %v1355_v36, %v1341_v7  ;;  %v1655_v58 = vld [vmem:[%s5869_s5 + $0x3d0] sm:$0xff]  ;;  %v1656_v62 = vld [vmem:[%s5869_s5 + $0x3d8] sm:$0xff] }
 0x1cf   :  { %1387 = vst [vmem:[#allocation2 + $0x111] sm:$0xff] %v5252_v15  ;;  %1373 = vst [vmem:[#allocation2 + $0x11] sm:$0xff] %v5254_v20  ;;  %1753 = vmatprep.mubr.f32.mxu1 %v5254_v20  ;;  %v5273_v53 = vadd.f32 %v1355_v36, %v1342_v63  ;;  %v5275_v35 = vadd.f32 %v1355_v36, %v1343_v13  ;;  %v5277_v41 = vadd.f32 %v1355_v36, %v1344_v34  ;;  %v1639_v13 = vld [vmem:[%s5869_s5 + $0x350] sm:$0xff]  ;;  %v1640_v34 = vld [vmem:[%s5869_s5 + $0x358] sm:$0xff] }
 0x1d0   :  { %1374 = vst [vmem:[#allocation2 + $0x21] sm:$0xff] %v5256_v2  ;;  %1375 = vst [vmem:[#allocation2 + $0x31] sm:$0xff] %v5258_v60  ;;  %v5279_v46 = vadd.f32 %v1355_v36, %v1345_v39  ;;  %v5285_v0 = vadd.f32 %v1355_v36, %v1346_v59  ;;  %v5287_v33 = vadd.f32 %v1355_v36, %v1347_v38  ;;  %v1657_v59 = vld [vmem:[%s5869_s5 + $0x3e0] sm:$0xff]  ;;  %v1658_v38 = vld [vmem:[%s5869_s5 + $0x3e8] sm:$0xff] }
 0x1d1   :  { %1376 = vst [vmem:[#allocation2 + $0x41] sm:$0xff] %v5260_v11  ;;  %1377 = vst [vmem:[#allocation2 + $0x51] sm:$0xff] %v5262_v21  ;;  %v1348_v3 = vmul.f32 %v1333_v9, %v5209_v25  ;;  %v1350_v45 = vmul.f32 %v1333_v9, %v5223_v50  ;;  %v1654_v9 = vld [vmem:[%s5869_s5 + $0x3c8] sm:$0xff]  ;;  %v3694_v22 = vpack.c.bf16 %v1636_v61, %v1635_v26 }
 0x1d2   :  { %1378 = vst [vmem:[#allocation2 + $0x61] sm:$0xff] %v5264_v44  ;;  %1379 = vst [vmem:[#allocation2 + $0x71] sm:$0xff] %v5266_v1  ;;  %v3696_v4 = vpack.c.bf16 %v1654_v9, %v1653_v47  ;;  %v3698_v7 = vpack.c.bf16 %v1638_v42, %v1637_v5  ;;  %v3700_v63 = vpack.c.bf16 %v1656_v62, %v1655_v58 }
 0x1d3   :  { %1380 = vst [vmem:[#allocation2 + $0x81] sm:$0xff] %v5273_v53  ;;  %1381 = vst [vmem:[#allocation2 + $0xb1] sm:$0xff] %v5275_v35  ;;  %v5303_v25 = vadd.f32 %v1355_v36, %v1348_v3  ;;  %v5305_v50 = vadd.f32 %v1355_v36, %v1350_v45  ;;  %v3702_v45 = vpack.c.bf16 %v1640_v34, %v1639_v13  ;;  %v1664_v13 = vld [vmem:[%s5869_s5 + $0x418] sm:$0xff] }
 0x1d4   :  { %1382 = vst [vmem:[#allocation2 + $0xc1] sm:$0xff] %v5277_v41  ;;  %1383 = vst [vmem:[#allocation2 + $0xd1] sm:$0xff] %v5279_v46  ;;  %v3704_v19 = vpack.c.bf16 %v1658_v38, %v1657_v59  ;;  %v3710_v8 = vpack.c.bf16 %v1644_v24, %v1643_v14  ;;  %v1665_v38 = vld [vmem:[%s5869_s5 + $0x420] sm:$0xff]  ;;  %v1508_v14 = vld [vmem:[#allocation2 + $0x91] sm:$0xff] }
 0x1d5   :  { %1384 = vst [vmem:[#allocation2 + $0xe1] sm:$0xff] %v5285_v0  ;;  %1385 = vst [vmem:[#allocation2 + $0xf1] sm:$0xff] %v5287_v33 }
 0x1d6   :  { %1386 = vst [vmem:[#allocation2 + $0x101] sm:$0xff] %v5303_v25  ;;  %1388 = vst [vmem:[#allocation2 + $0x121] sm:$0xff] %v5305_v50  ;;  %v1437_v17 = vld [vmem:[#allocation2 + $0x10] sm:$0xff] }
 0x1d7   :  { %1893 = vmatprep.mubr.f32.mxu0 %v1437_v17  ;;  %1754 = vmatmul.mubr.f32.gmra.mrb[66].mxu1 %v1437_v17  ;;  %v5328_v10 = vld [vmem:[#allocation2 + $0x20] sm:$0xff]  ;;  %v5338_v43 = vld [vmem:[#allocation2 + $0x12] sm:$0xff] }
 0x1d8   :  { %1894 = vmatmul.mubr.f32.vlgmr.msra.gmra.mrb[80].mxu0 %v1421_v23  ;;  %1758 = vmatprep.mubr.f32.mxu1 %v5256_v2  ;;  %v5348_v37 = vld [vmem:[#allocation2 + $0x30] sm:$0xff]  ;;  %v5358_v27 = vld [vmem:[#allocation2 + $0x22] sm:$0xff] }
 0x1d9   :  { %1898 = vmatprep.mubr.f32.mxu0 %v5328_v10  ;;  %3683 = vmatpush3.bf16.msra.mxu0 %v3682_v30  ;;  %v5368_v48 = vld [vmem:[#allocation2 + $0x40] sm:$0xff]  ;;  %v5378_v16 = vld [vmem:[#allocation2 + $0x32] sm:$0xff] }
 0x1da   :  { %3685 = vmatprep.subr.bf16.mxu0 %v3684_v28  ;;  %v5388_v36 = vld [vmem:[#allocation2 + $0x50] sm:$0xff]  ;;  %v5398_v39 = vld [vmem:[#allocation2 + $0x42] sm:$0xff]  ;;  %v1660_v30 = vld [vmem:[%s5869_s5 + $0x3f8] sm:$0xff] }
 0x1db   :  { %1759 = vmatmul.mubr.f32.gmra.mrb[68].mxu1 %v5328_v10  ;;  %v5408_v3 = vld [vmem:[#allocation2 + $0x60] sm:$0xff]  ;;  %v5418_v12 = vld [vmem:[#allocation2 + $0x52] sm:$0xff] }
 0x1dc   :  { %1899 = vmatmul.mubr.f32.gmra.mrb[82].mxu0 %v5338_v43  ;;  %1763 = vmatprep.mubr.f32.mxu1 %v5258_v60  ;;  %v1659_v23 = vld [vmem:[%s5869_s5 + $0x3f0] sm:$0xff]  ;;  %v1413_v28 = vld [vmem:[#allocation2 + $0xa1] sm:$0xff] }
 0x1dd   :  { %1903 = vmatprep.mubr.f32.mxu0 %v5348_v37  ;;  %3687 = vmatpush3.bf16.msra.mxu0 %v3686_v49  ;;  %v5428_v17 = vld [vmem:[#allocation2 + $0x70] sm:$0xff]  ;;  %v3708_v40 = vpack.c.bf16 %v1660_v30, %v1659_v23  ;;  %v5438_v49 = vld [vmem:[#allocation2 + $0x62] sm:$0xff] }
 0x1de   :  { %3689 = vmatprep.subr.bf16.mxu0 %v3688_v51  ;;  %v5441_v51 = vld [vmem:[#allocation2 + $0x80] sm:$0xff]  ;;  %v5447_v54 = vld [vmem:[#allocation2 + $0x72] sm:$0xff] }
 0x1df   :  { %1764 = vmatmul.mubr.f32.gmra.mrb[70].mxu1 %v5348_v37  ;;  %v1445_v18 = vld [vmem:[#allocation2 + $0xb0] sm:$0xff]  ;;  %v5464_v47 = vld [vmem:[#allocation2 + $0xc2] sm:$0xff] }
 0x1e0   :  { %1904 = vmatmul.mubr.f32.gmra.mrb[84].mxu0 %v5358_v27  ;;  %1768 = vmatprep.mubr.f32.mxu1 %v5260_v11  ;;  %v5456_v26 = vld [vmem:[#allocation2 + $0xb2] sm:$0xff]  ;;  %v5468_v9 = vld [vmem:[#allocation2 + $0xe0] sm:$0xff] }
 0x1e1   :  { %1908 = vmatprep.mubr.f32.mxu0 %v5368_v48  ;;  %3691 = vmatpush3.bf16.msra.mxu0 %v3690_v57  ;;  %v1429_v57 = vld [vmem:[#allocation2 + $0xa2] sm:$0xff]  ;;  %v5460_v61 = vld [vmem:[#allocation2 + $0xd0] sm:$0xff] }
 0x1e2   :  { %3693 = vmatprep.subr.bf16.mxu0 %v3692_v32  ;;  %v5452_v32 = vld [vmem:[#allocation2 + $0xc0] sm:$0xff]  ;;  %v5488_v58 = vld [vmem:[#allocation2 + $0xf2] sm:$0xff] }
 0x1e3   :  { %1769 = vmatmul.mubr.f32.gmra.mrb[72].mxu1 %v5368_v48  ;;  %v5480_v5 = vld [vmem:[#allocation2 + $0xe2] sm:$0xff]  ;;  %v5492_v62 = vld [vmem:[#allocation2 + $0x110] sm:$0xff] }
 0x1e4   :  { %1909 = vmatmul.mubr.f32.gmra.mrb[86].mxu0 %v5378_v16  ;;  %1773 = vmatprep.mubr.f32.mxu1 %v5262_v21  ;;  %v5484_v42 = vld [vmem:[#allocation2 + $0x100] sm:$0xff]  ;;  %v5509_v59 = vld [vmem:[#allocation2 + $0x112] sm:$0xff] }
 0x1e5   :  { %1913 = vmatprep.mubr.f32.mxu0 %v5388_v36  ;;  %3695 = vmatpush3.bf16.msra.mxu0 %v3694_v22  ;;  %v5472_v22 = vld [vmem:[#allocation2 + $0xd2] sm:$0xff]  ;;  %v5505_v34 = vld [vmem:[#allocation2 + $0x120] sm:$0xff] }
 0x1e6   :  { %3697 = vmatprep.subr.bf16.mxu0 %v3696_v4  ;;  %v5476_v4 = vld [vmem:[#allocation2 + $0xf0] sm:$0xff] }
 0x1e7   :  { %1774 = vmatmul.mubr.f32.gmra.mrb[74].mxu1 %v5388_v36 }
 0x1e8   :  { %1914 = vmatmul.mubr.f32.gmra.mrb[88].mxu0 %v5398_v39  ;;  %1778 = vmatprep.mubr.f32.mxu1 %v5264_v44 }
 0x1e9   :  { %1918 = vmatprep.mubr.f32.mxu0 %v5408_v3  ;;  %3699 = vmatpush3.bf16.msra.mxu0 %v3698_v7  ;;  %v5496_v7 = vld [vmem:[#allocation2 + $0x102] sm:$0xff] }
 0x1ea   :  { %3701 = vmatprep.subr.bf16.mxu0 %v3700_v63  ;;  %v1663_v63 = vld [vmem:[%s5869_s5 + $0x410] sm:$0xff] }
 0x1eb   :  { %1779 = vmatmul.mubr.f32.gmra.mrb[76].mxu1 %v5408_v3 }
 0x1ec   :  { %1919 = vmatmul.mubr.f32.gmra.mrb[90].mxu0 %v5418_v12  ;;  %1783 = vmatprep.mubr.f32.mxu1 %v5266_v1 }
 0x1ed   :  { %1923 = vmatprep.mubr.f32.mxu0 %v5428_v17  ;;  %3703 = vmatpush3.bf16.msra.mxu0 %v3702_v45  ;;  %v1666_v45 = vld [vmem:[%s5869_s5 + $0x428] sm:$0xff] }
 0x1ee   :  { %3705 = vmatprep.subr.bf16.mxu0 %v3704_v19  ;;  %v1668_v19 = vld [vmem:[%s5869_s5 + $0x438] sm:$0xff] }
 0x1ef   :  { %1784 = vmatmul.mubr.f32.gmra.mrb[78].mxu1 %v5428_v17 }
 0x1f0   :  { %1924 = vmatmul.mubr.f32.gmra.mrb[92].mxu0 %v5438_v49  ;;  %1788 = vmatprep.mubr.f32.mxu1 %v1413_v28  ;;  %v1674_v28 = vld [vmem:[%s5869_s5 + $0x468] sm:$0xff] }
 0x1f1   :  { %1928 = vmatprep.mubr.f32.mxu0 %v5441_v51  ;;  %3707 = vmatpush3.bf16.msra.mxu0 %v3706_v31 }
 0x1f2   :  { %3709 = vmatprep.subr.bf16.mxu0 %v3708_v40  ;;  %v1676_v40 = vld [vmem:[%s5869_s5 + $0x478] sm:$0xff] }
 0x1f3   :  { %1789 = vmatmul.mubr.f32.gmra.mrb[80].mxu1 %v5444_v6 }
 0x1f4   :  { %1929 = vmatmul.mubr.f32.gmra.mrb[94].mxu0 %v5447_v54  ;;  %1793 = vmatprep.mubr.f32.mxu1 %v5275_v35 }
 0x1f5   :  { %1933 = vmatprep.mubr.f32.mxu0 %v1445_v18  ;;  %3711 = vmatpush3.bf16.msra.mxu0 %v3710_v8 }
 0x1f7   :  { %1794 = vmatmul.mubr.f32.gmra.mrb[82].mxu1 %v1445_v18 }
 0x1f8   :  { %1934 = vmatmul.mubr.f32.gmra.mrb[96].mxu0 %v1429_v57  ;;  %1798 = vmatprep.mubr.f32.mxu1 %v5277_v41 }
 0x1f9   :  { %1938 = vmatprep.mubr.f32.mxu0 %v5452_v32 }
 0x1fb   :  { %1799 = vmatmul.mubr.f32.gmra.mrb[84].mxu1 %v5452_v32 }
 0x1fc   :  { %1939 = vmatmul.mubr.f32.gmra.mrb[98].mxu0 %v5456_v26  ;;  %1803 = vmatprep.mubr.f32.mxu1 %v5279_v46 }
 0x1fd   :  { %1943 = vmatprep.mubr.f32.mxu0 %v5460_v61 }
 0x1ff   :  { %1804 = vmatmul.mubr.f32.gmra.mrb[86].mxu1 %v5460_v61 }
 0x200   :  { %1944 = vmatmul.mubr.f32.gmra.mrb[100].mxu0 %v5464_v47  ;;  %1808 = vmatprep.mubr.f32.mxu1 %v5285_v0 }
 0x201   :  { %1948 = vmatprep.mubr.f32.mxu0 %v5468_v9 }
 0x203   :  { %1809 = vmatmul.mubr.f32.gmra.mrb[88].mxu1 %v5468_v9 }
 0x204   :  { %1949 = vmatmul.mubr.f32.gmra.mrb[102].mxu0 %v5472_v22  ;;  %1813 = vmatprep.mubr.f32.mxu1 %v5287_v33 }
 0x205   :  { %1953 = vmatprep.mubr.f32.mxu0 %v5476_v4 }
 0x207   :  { %1814 = vmatmul.mubr.f32.gmra.mrb[90].mxu1 %v5476_v4 }
 0x208   :  { %1954 = vmatmul.mubr.f32.gmra.mrb[104].mxu0 %v5480_v5  ;;  %1818 = vmatprep.mubr.f32.mxu1 %v5303_v25 }
 0x209   :  { %1958 = vmatprep.mubr.f32.mxu0 %v5484_v42 }
 0x20b   :  { %1819 = vmatmul.mubr.f32.gmra.mrb[92].mxu1 %v5484_v42 }
 0x20c   :  { %1959 = vmatmul.mubr.f32.gmra.mrb[106].mxu0 %v5488_v58  ;;  %1823 = vmatprep.mubr.f32.mxu1 %v5252_v15  ;;  %v3716_v15 = vpack.c.bf16 %v1664_v13, %v1663_v63 }
 0x20d   :  { %1963 = vmatprep.mubr.f32.mxu0 %v5492_v62 }
 0x20f   :  { %1824 = vmatmul.mubr.f32.gmra.mrb[94].mxu1 %v5492_v62 }
 0x210   :  { %1964 = vmatmul.mubr.f32.gmra.mrb[108].mxu0 %v5496_v7  ;;  %2038 = vmatprep.mubr.f32.mxu1 %v5338_v43  ;;  %v3720_v43 = vpack.c.bf16 %v1666_v45, %v1665_v38 }
 0x211   :  { %1968 = vmatprep.mubr.f32.mxu0 %v5505_v34 }
 0x213   :  { %2039 = vmatmul.mubr.f32.vlgmr.msra.gmra.mrb[96].mxu1 %v5254_v20  ;;  %v1667_v20 = vld [vmem:[%s5869_s5 + $0x430] sm:$0xff] }
 0x214   :  { %1969 = vmatmul.mubr.f32.gmra.mrb[110].mxu0 %v5509_v59  ;;  %2043 = vmatprep.mubr.f32.mxu1 %v5358_v27 }
 0x215   :  { %2183 = vmatprep.mubr.f32.mxu0 %v5256_v2  ;;  %3715 = vmatpush3.bf16.msra.mxu1 %v5196_v55  ;;  %v3724_v55 = vpack.c.bf16 %v1668_v19, %v1667_v20 }
 0x216   :  { %3717 = vmatprep.subr.bf16.mxu1 %v3716_v15 }
 0x217   :  { %2044 = vmatmul.mubr.f32.gmra.mrb[98].mxu1 %v5256_v2  ;;  %v1669_v2 = vld [vmem:[%s5869_s5 + $0x440] sm:$0xff] }
 0x218   :  { %2184 = vmatmul.mubr.f32.vlgmr.msra.gmra.mrb[112].mxu0 %v5328_v10  ;;  %2048 = vmatprep.mubr.f32.mxu1 %v5378_v16  ;;  %v3728_v10 = vpack.c.bf16 %v1670_v29, %v1669_v2 }
 0x219   :  { %2188 = vmatprep.mubr.f32.mxu0 %v5258_v60  ;;  %3719 = vmatpush3.bf16.msra.mxu1 %v3716_v15 }
 0x21a   :  { %3721 = vmatprep.subr.bf16.mxu1 %v3720_v43 }
 0x21b   :  { %2049 = vmatmul.mubr.f32.gmra.mrb[100].mxu1 %v5258_v60  ;;  %v1671_v60 = vld [vmem:[%s5869_s5 + $0x450] sm:$0xff] }
 0x21c   :  { %2189 = vmatmul.mubr.f32.gmra.mrb[114].mxu0 %v5348_v37  ;;  %2053 = vmatprep.mubr.f32.mxu1 %v5398_v39  ;;  %v2992_v37 = vpop.f32.mrb[64].mxu1  ;;  %v3732_v23 = vpack.c.bf16 %v1672_v56, %v1671_v60 }
 0x21d   :  { %2193 = vmatprep.mubr.f32.mxu0 %v5260_v11  ;;  %3723 = vmatpush3.bf16.msra.mxu1 %v3720_v43  ;;  %v2993_v30 = vpop.f32.mrb[65].mxu1 }
 0x21e   :  { %3725 = vmatprep.subr.bf16.mxu1 %v3724_v55 }
 0x21f   :  { %2054 = vmatmul.mubr.f32.gmra.mrb[102].mxu1 %v5260_v11  ;;  %v1673_v11 = vld [vmem:[%s5869_s5 + $0x460] sm:$0xff] }
 0x220   :  { %2194 = vmatmul.mubr.f32.gmra.mrb[116].mxu0 %v5368_v48  ;;  %2058 = vmatprep.mubr.f32.mxu1 %v5418_v12  ;;  %v5559_v48 = vadd.f32 %v2993_v30, %v2992_v37  ;;  %v3736_v31 = vpack.c.bf16 %v1674_v28, %v1673_v11 }
 0x221   :  { %2198 = vmatprep.mubr.f32.mxu0 %v5262_v21  ;;  %3727 = vmatpush3.bf16.msra.mxu1 %v3724_v55 }
 0x222   :  { %3729 = vmatprep.subr.bf16.mxu1 %v3728_v10 }
 0x223   :  { %2059 = vmatmul.mubr.f32.gmra.mrb[104].mxu1 %v5262_v21  ;;  %v1675_v21 = vld [vmem:[%s5869_s5 + $0x470] sm:$0xff] }
 0x224   :  { %2199 = vmatmul.mubr.f32.gmra.mrb[118].mxu0 %v5388_v36  ;;  %2063 = vmatprep.mubr.f32.mxu1 %v5438_v49  ;;  %v3740_v36 = vpack.c.bf16 %v1676_v40, %v1675_v21 }
 0x225   :  { %2203 = vmatprep.mubr.f32.mxu0 %v5264_v44  ;;  %3731 = vmatpush3.bf16.msra.mxu1 %v3728_v10 }
 0x226   :  { %3733 = vmatprep.subr.bf16.mxu1 %v3732_v23 }
 0x227   :  { %2064 = vmatmul.mubr.f32.gmra.mrb[106].mxu1 %v5264_v44  ;;  %v1476_v44 = vld [vmem:[#allocation2 + $0x82] sm:$0xff] }
 0x228   :  { %2204 = vmatmul.mubr.f32.gmra.mrb[120].mxu0 %v5408_v3  ;;  %2068 = vmatprep.mubr.f32.mxu1 %v5447_v54 }
 0x229   :  { %2208 = vmatprep.mubr.f32.mxu0 %v5266_v1  ;;  %3735 = vmatpush3.bf16.msra.mxu1 %v3732_v23 }
 0x22a   :  { %3737 = vmatprep.subr.bf16.mxu1 %v3736_v31 }
 0x22b   :  { %2069 = vmatmul.mubr.f32.gmra.mrb[108].mxu1 %v5266_v1  ;;  %v1514_v1 = vld [vmem:[#allocation2 + $0x111] sm:$0xff] }
 0x22c   :  { %2209 = vmatmul.mubr.f32.gmra.mrb[122].mxu0 %v5428_v17  ;;  %2073 = vmatprep.mubr.f32.mxu1 %v1476_v44 }
 0x22d   :  { %2213 = vmatprep.mubr.f32.mxu0 %v5273_v53  ;;  %3739 = vmatpush3.bf16.msra.mxu1 %v3736_v31 }
 0x22e   :  { %3741 = vmatprep.subr.bf16.mxu1 %v3740_v36 }
 0x22f   :  { %2074 = vmatmul.mubr.f32.gmra.mrb[110].mxu1 %v5273_v53  ;;  %v1484_v53 = vld [vmem:[#allocation2 + $0x122] sm:$0xff] }
 0x230   :  { %2214 = vmatmul.mubr.f32.gmra.mrb[124].mxu0 %v5441_v51  ;;  %2078 = vmatprep.mubr.f32.mxu1 %v5456_v26 }
 0x231   :  { %2218 = vmatprep.mubr.f32.mxu0 %v1508_v14  ;;  %3743 = vmatpush3.bf16.msra.mxu1 %v3740_v36 }
 0x233   :  { %2079 = vmatmul.mubr.f32.gmra.mrb[112].mxu1 %v5275_v35  ;;  %v1516_v35 = vld [vmem:[#allocation2 + $0x131] sm:$0xff] }
 0x234   :  { %2219 = vmatmul.mubr.f32.gmra.mrb[126].mxu0 %v5444_v6  ;;  %2083 = vmatprep.mubr.f32.mxu1 %v5464_v47 }
 0x235   :  { %2223 = vmatprep.mubr.f32.mxu0 %v5277_v41 }
 0x237   :  { %2084 = vmatmul.mubr.f32.gmra.mrb[114].mxu1 %v5277_v41  ;;  %v1524_v41 = vld [vmem:[#allocation2 + $0x92] sm:$0xff] }
 0x238   :  { %2224 = vmatmul.mubr.f32.gmra.mrb[128].mxu0 %v5452_v32  ;;  %2088 = vmatprep.mubr.f32.mxu1 %v5472_v22 }
 0x239   :  { %2228 = vmatprep.mubr.f32.mxu0 %v5279_v46 }
 0x23b   :  { %2089 = vmatmul.mubr.f32.gmra.mrb[116].mxu1 %v5279_v46  ;;  %v1532_v46 = vld [vmem:[#allocation2 + $0x132] sm:$0xff] }
 0x23c   :  { %2229 = vmatmul.mubr.f32.gmra.mrb[130].mxu0 %v5460_v61  ;;  %2093 = vmatprep.mubr.f32.mxu1 %v5480_v5 }
 0x23d   :  { %2233 = vmatprep.mubr.f32.mxu0 %v5285_v0 }
 0x23f   :  { %2094 = vmatmul.mubr.f32.gmra.mrb[118].mxu1 %v5285_v0  ;;  %v5623_v0 = vld [vmem:[%s5872_s6] ss:$0 sm:$0xff] }
 0x240   :  { %2234 = vmatmul.mubr.f32.gmra.mrb[132].mxu0 %v5468_v9  ;;  %2098 = vmatprep.mubr.f32.mxu1 %v5488_v58 }
 0x241   :  { %2238 = vmatprep.mubr.f32.mxu0 %v5287_v33 }
 0x243   :  { %2099 = vmatmul.mubr.f32.gmra.mrb[120].mxu1 %v5287_v33 }
 0x244   :  { %2239 = vmatmul.mubr.f32.gmra.mrb[134].mxu0 %v5476_v4  ;;  %2103 = vmatprep.mubr.f32.mxu1 %v5496_v7 }
 0x245   :  { %2243 = vmatprep.mubr.f32.mxu0 %v5303_v25 }
 0x247   :  { %2104 = vmatmul.mubr.f32.gmra.mrb[122].mxu1 %v5303_v25 }
 0x248   :  { %2244 = vmatmul.mubr.f32.gmra.mrb[136].mxu0 %v5484_v42  ;;  %2108 = vmatprep.mubr.f32.mxu1 %v5509_v59 }
 0x249   :  { %2248 = vmatprep.mubr.f32.mxu0 %v1514_v1 }
 0x24b   :  { %2109 = vmatmul.mubr.f32.gmra.mrb[124].mxu1 %v1514_v1 }
 0x24c   :  { %2249 = vmatmul.mubr.f32.gmra.mrb[138].mxu0 %v5492_v62  ;;  %2113 = vmatprep.mubr.f32.mxu1 %v1484_v53 }
 0x24d   :  { %2253 = vmatprep.mubr.f32.mxu0 %v5305_v50 }
 0x24f   :  { %2114 = vmatmul.mubr.f32.gmra.mrb[126].mxu1 %v5305_v50 }
 0x250   :  { %2254 = vmatmul.mubr.f32.gmra.mrb[140].mxu0 %v5505_v34  ;;  %3400 = vmatprep.mubr.f32.mxu1 %v5358_v27 }
 0x251   :  { %2258 = vmatprep.mubr.f32.mxu0 %v1516_v35 }
 0x253   :  { %3401 = vmatmul.mubr.f32.vlgmr.msra.gmra.mrb[128].mxu1 %v5378_v16 }
 0x254   :  { %2259 = vmatmul.mubr.f32.gmra.mrb[142].mxu0 %v5444_v6  ;;  %3403 = vmatprep.mubr.f32.mxu1 %v5398_v39  ;;  %v1751_v39 = vadd.f32 %v5559_v48, %v5623_v0 }
 0x257   :  { %3404 = vmatmul.mubr.f32.gmra.mrb[130].mxu1 %v5418_v12 }
 0x258   :  { %3406 = vmatprep.mubr.f32.mxu1 %v5438_v49 }
 0x25b   :  { %3407 = vmatmul.mubr.f32.gmra.mrb[132].mxu1 %v5447_v54 }
 0x25c   :  { %3409 = vmatprep.mubr.f32.mxu1 %v1476_v44 }
 0x25f   :  { %3410 = vmatmul.mubr.f32.gmra.mrb[134].mxu1 %v1524_v41 }
 0x260   :  { %3412 = vmatprep.mubr.f32.mxu1 %v5464_v47 }
 0x263   :  { %3413 = vmatmul.mubr.f32.gmra.mrb[136].mxu1 %v5472_v22 }
 0x264   :  { %3415 = vmatprep.mubr.f32.mxu1 %v5480_v5 }
 0x267   :  { %3416 = vmatmul.mubr.f32.gmra.mrb[138].mxu1 %v5488_v58 }
 0x268   :  { %3418 = vmatprep.mubr.f32.mxu1 %v5496_v7 }
 0x26b   :  { %3419 = vmatmul.mubr.f32.gmra.mrb[140].mxu1 %v5509_v59 }
 0x26c   :  { %3421 = vmatprep.mubr.f32.mxu1 %v1484_v53 }
 0x26f   :  { %3422 = vmatmul.mubr.f32.gmra.mrb[142].mxu1 %v1532_v46 }
 0x2aa   :  { %v2995_v33 = vpop.f32.mrb[66].mxu1 }
 0x2ab   :  { %v3072_v25 = vpop.f32.mrb[80].mxu0  ;;  %v2996_v50 = vpop.f32.mrb[67].mxu1 }
 0x2ac   :  { %v2997_v27 = vadd.f32 %v2996_v50, %v2995_v33  ;;  %v3073_v16 = vpop.f32.mrb[81].mxu0 }
 0x2ad   :  { %v3074_v3 = vadd.f32 %v3073_v16, %v3072_v25 }
 0x2ae   :  { %v2998_v12 = vpop.f32.mrb[68].mxu1  ;;  %v1756_v6 = vadd.f32 %v2997_v27, %v5623_v0 }
 0x2af   :  { %v5627_v17 = vadd.f32 %v3074_v3, %v1751_v39  ;;  %v3075_v24 = vpop.f32.mrb[82].mxu0  ;;  %v2999_v49 = vpop.f32.mrb[69].mxu1 }
 0x2b0   :  { %v3000_v51 = vadd.f32 %v2999_v49, %v2998_v12  ;;  %v3076_v8 = vpop.f32.mrb[83].mxu0 }
 0x2b1   :  { %v3077_v54 = vadd.f32 %v3076_v8, %v3075_v24 }
 0x2b2   :  { %v3001_v18 = vpop.f32.mrb[70].mxu1  ;;  %v1761_v9 = vadd.f32 %v3000_v51, %v5623_v0 }
 0x2b3   :  { %v5630_v57 = vadd.f32 %v3077_v54, %v1756_v6  ;;  %v3078_v32 = vpop.f32.mrb[84].mxu0  ;;  %v3002_v26 = vpop.f32.mrb[71].mxu1 }
 0x2b4   :  { %v3003_v61 = vadd.f32 %v3002_v26, %v3001_v18  ;;  %v3079_v47 = vpop.f32.mrb[85].mxu0 }
 0x2b5   :  { %v3080_v22 = vadd.f32 %v3079_v47, %v3078_v32 }
 0x2b6   :  { %v3004_v4 = vpop.f32.mrb[72].mxu1  ;;  %v1766_v63 = vadd.f32 %v3003_v61, %v5623_v0 }
 0x2b7   :  { %v5633_v5 = vadd.f32 %v3080_v22, %v1761_v9  ;;  %v3081_v42 = vpop.f32.mrb[86].mxu0  ;;  %v3005_v58 = vpop.f32.mrb[73].mxu1 }
 0x2b8   :  { %v3006_v62 = vadd.f32 %v3005_v58, %v3004_v4  ;;  %v3082_v7 = vpop.f32.mrb[87].mxu0 }
 0x2b9   :  { %v3083_v13 = vadd.f32 %v3082_v7, %v3081_v42 }
 0x2ba   :  { %v3007_v34 = vpop.f32.mrb[74].mxu1  ;;  %v1771_v20 = vadd.f32 %v3006_v62, %v5623_v0 }
 0x2bb   :  { %v5636_v15 = vadd.f32 %v3083_v13, %v1766_v63  ;;  %v3084_v59 = vpop.f32.mrb[88].mxu0  ;;  %v3008_v38 = vpop.f32.mrb[75].mxu1 }
 0x2bc   :  { %v3009_v45 = vadd.f32 %v3008_v38, %v3007_v34  ;;  %v3085_v43 = vpop.f32.mrb[89].mxu0 }
 0x2bd   :  { %v3086_v19 = vadd.f32 %v3085_v43, %v3084_v59 }
 0x2be   :  { %v3010_v55 = vpop.f32.mrb[76].mxu1  ;;  %v1776_v37 = vadd.f32 %v3009_v45, %v5623_v0 }
 0x2bf   :  { %v5639_v2 = vadd.f32 %v3086_v19, %v1771_v20  ;;  %v3087_v29 = vpop.f32.mrb[90].mxu0  ;;  %v3011_v10 = vpop.f32.mrb[77].mxu1 }
 0x2c0   :  { %v3012_v60 = vadd.f32 %v3011_v10, %v3010_v55  ;;  %v3088_v56 = vpop.f32.mrb[91].mxu0 }
 0x2c1   :  { %v3089_v23 = vadd.f32 %v3088_v56, %v3087_v29 }
 0x2c2   :  { %v3013_v30 = vpop.f32.mrb[78].mxu1  ;;  %v1781_v40 = vadd.f32 %v3012_v60, %v5623_v0 }
 0x2c3   :  { %v5642_v11 = vadd.f32 %v3089_v23, %v1776_v37  ;;  %v3090_v28 = vpop.f32.mrb[92].mxu0  ;;  %v3014_v48 = vpop.f32.mrb[79].mxu1 }
 0x2c4   :  { %v3015_v31 = vadd.f32 %v3014_v48, %v3013_v30  ;;  %v3091_v21 = vpop.f32.mrb[93].mxu0 }
 0x2c5   :  { %v3092_v36 = vadd.f32 %v3091_v21, %v3090_v28 }
 0x2c6   :  { %v3016_v44 = vpop.f32.mrb[80].mxu1  ;;  %v1786_v46 = vadd.f32 %v3015_v31, %v5623_v0 }
 0x2c7   :  { %v5645_v14 = vadd.f32 %v3092_v36, %v1781_v40  ;;  %v3093_v1 = vpop.f32.mrb[94].mxu0  ;;  %v3017_v53 = vpop.f32.mrb[81].mxu1 }
 0x2c8   :  { %v3018_v35 = vadd.f32 %v3017_v53, %v3016_v44  ;;  %v3094_v41 = vpop.f32.mrb[95].mxu0 }
 0x2c9   :  { %v3095_v33 = vadd.f32 %v3094_v41, %v3093_v1 }
 0x2ca   :  { %v3019_v25 = vpop.f32.mrb[82].mxu1  ;;  %v1791_v12 = vadd.f32 %v3018_v35, %v5623_v0 }
 0x2cb   :  { %v5648_v50 = vadd.f32 %v3095_v33, %v1786_v46  ;;  %v3096_v27 = vpop.f32.mrb[96].mxu0  ;;  %v3020_v16 = vpop.f32.mrb[83].mxu1 }
 0x2cc   :  { %v3021_v39 = vadd.f32 %v3020_v16, %v3019_v25  ;;  %v3097_v3 = vpop.f32.mrb[97].mxu0 }
 0x2cd   :  { %v3098_v24 = vadd.f32 %v3097_v3, %v3096_v27 }
 0x2ce   :  { %v3022_v49 = vpop.f32.mrb[84].mxu1  ;;  %v1796_v32 = vadd.f32 %v3021_v39, %v5623_v0 }
 0x2cf   :  { %v5651_v51 = vadd.f32 %v3098_v24, %v1791_v12  ;;  %v3099_v8 = vpop.f32.mrb[98].mxu0  ;;  %v3023_v6 = vpop.f32.mrb[85].mxu1 }
 0x2d0   :  { %v3024_v54 = vadd.f32 %v3023_v6, %v3022_v49  ;;  %v3100_v18 = vpop.f32.mrb[99].mxu0 }
 0x2d1   :  { %v3101_v26 = vadd.f32 %v3100_v18, %v3099_v8 }
 0x2d2   :  { %v3025_v61 = vpop.f32.mrb[86].mxu1  ;;  %v1801_v58 = vadd.f32 %v3024_v54, %v5623_v0 }
 0x2d3   :  { %v5654_v47 = vadd.f32 %v3101_v26, %v1796_v32  ;;  %v3102_v9 = vpop.f32.mrb[100].mxu0  ;;  %v3026_v22 = vpop.f32.mrb[87].mxu1 }
 0x2d4   :  { %v3027_v4 = vadd.f32 %v3026_v22, %v3025_v61  ;;  %v3103_v42 = vpop.f32.mrb[101].mxu0 }
 0x2d5   :  { %v3104_v62 = vadd.f32 %v3103_v42, %v3102_v9 }
 0x2d6   :  { %v3028_v7 = vpop.f32.mrb[88].mxu1  ;;  %v1806_v45 = vadd.f32 %v3027_v4, %v5623_v0 }
 0x2d7   :  { %v5657_v63 = vadd.f32 %v3104_v62, %v1801_v58  ;;  %v3105_v13 = vpop.f32.mrb[102].mxu0  ;;  %v3029_v34 = vpop.f32.mrb[89].mxu1 }
 0x2d8   :  { %v3030_v59 = vadd.f32 %v3029_v34, %v3028_v7  ;;  %v3106_v38 = vpop.f32.mrb[103].mxu0 }
 0x2d9   :  { %v3107_v43 = vadd.f32 %v3106_v38, %v3105_v13 }
 0x2da   :  { %v3031_v20 = vpop.f32.mrb[90].mxu1  ;;  %v1811_v56 = vadd.f32 %v3030_v59, %v5623_v0 }
 0x2db   :  { %v5660_v19 = vadd.f32 %v3107_v43, %v1806_v45  ;;  %v3108_v55 = vpop.f32.mrb[104].mxu0  ;;  %v3032_v29 = vpop.f32.mrb[91].mxu1 }
 0x2dc   :  { %v3033_v10 = vadd.f32 %v3032_v29, %v3031_v20  ;;  %v3109_v60 = vpop.f32.mrb[105].mxu0 }
 0x2dd   :  { %v3110_v37 = vadd.f32 %v3109_v60, %v3108_v55 }
 0x2de   :  { %v3034_v23 = vpop.f32.mrb[92].mxu1  ;;  %v1816_v40 = vadd.f32 %v3033_v10, %v5623_v0 }
 0x2df   :  { %v5663_v30 = vadd.f32 %v3110_v37, %v1811_v56  ;;  %v3111_v28 = vpop.f32.mrb[106].mxu0  ;;  %v3035_v48 = vpop.f32.mrb[93].mxu1 }
 0x2e0   :  { %v3036_v31 = vadd.f32 %v3035_v48, %v3034_v23  ;;  %v3112_v21 = vpop.f32.mrb[107].mxu0 }
 0x2e1   :  { %v3113_v36 = vadd.f32 %v3112_v21, %v3111_v28 }
 0x2e2   :  { %v3037_v44 = vpop.f32.mrb[94].mxu1  ;;  %v1821_v33 = vadd.f32 %v3036_v31, %v5623_v0 }
 0x2e3   :  { %v5666_v1 = vadd.f32 %v3113_v36, %v1816_v40  ;;  %v3114_v53 = vpop.f32.mrb[108].mxu0  ;;  %v3038_v35 = vpop.f32.mrb[95].mxu1 }
 0x2e4   :  { %v3039_v41 = vadd.f32 %v3038_v35, %v3037_v44  ;;  %v3115_v46 = vpop.f32.mrb[109].mxu0 }
 0x2e5   :  { %v3116_v25 = vadd.f32 %v3115_v46, %v3114_v53 }
 0x2e6   :  { %v3152_v27 = vpop.f32.mrb[96].mxu1  ;;  %v1826_v49 = vadd.f32 %v3039_v41, %v5623_v0 }
 0x2e7   :  { %v5669_v16 = vadd.f32 %v3116_v25, %v1821_v33  ;;  %v3117_v39 = vpop.f32.mrb[110].mxu0  ;;  %v3153_v3 = vpop.f32.mrb[97].mxu1 }
 0x2e8   :  { %v3118_v12 = vpop.f32.mrb[111].mxu0  ;;  %v3154_v24 = vadd.f32 %v3153_v3, %v3152_v27 }
 0x2e9   :  { %v3119_v8 = vadd.f32 %v3118_v12, %v3117_v39 }
 0x2ea   :  { %v2041_v6 = vadd.f32 %v3154_v24, %v5627_v17  ;;  %v3155_v54 = vpop.f32.mrb[98].mxu1 }
 0x2eb   :  { %v5673_v18 = vadd.f32 %v3119_v8, %v1826_v49  ;;  %v3232_v32 = vpop.f32.mrb[112].mxu0  ;;  %v3156_v26 = vpop.f32.mrb[99].mxu1 }
 0x2ec   :  { %v3157_v61 = vadd.f32 %v3156_v26, %v3155_v54  ;;  %v3233_v9 = vpop.f32.mrb[113].mxu0 }
 0x2ed   :  { %v3234_v22 = vadd.f32 %v3233_v9, %v3232_v32 }
 0x2ee   :  { %v2046_v4 = vadd.f32 %v3157_v61, %v5630_v57  ;;  %v3158_v42 = vpop.f32.mrb[100].mxu1 }
 0x2ef   :  { %v3235_v58 = vpop.f32.mrb[114].mxu0  ;;  %v3159_v62 = vpop.f32.mrb[101].mxu1  ;;  %v5676_v7 = vadd.f32 %v3234_v22, %v2041_v6 }
 0x2f0   :  { %v3160_v13 = vadd.f32 %v3159_v62, %v3158_v42  ;;  %v3236_v0 = vpop.f32.mrb[115].mxu0 }
 0x2f1   :  { %v3237_v34 = vadd.f32 %v3236_v0, %v3235_v58 }
 0x2f2   :  { %v2051_v17 = vadd.f32 %v3160_v13, %v5633_v5  ;;  %v3161_v59 = vpop.f32.mrb[102].mxu1 }
 0x2f3   :  { %v3238_v38 = vpop.f32.mrb[116].mxu0  ;;  %v3162_v45 = vpop.f32.mrb[103].mxu1  ;;  %v5679_v43 = vadd.f32 %v3237_v34, %v2046_v4 }
 0x2f4   :  { %v3163_v20 = vadd.f32 %v3162_v45, %v3161_v59  ;;  %v3239_v55 = vpop.f32.mrb[117].mxu0 }
 0x2f5   :  { %v3240_v29 = vadd.f32 %v3239_v55, %v3238_v38 }
 0x2f6   :  { %v2056_v57 = vadd.f32 %v3163_v20, %v5636_v15  ;;  %v3164_v10 = vpop.f32.mrb[104].mxu1 }
 0x2f7   :  { %v3241_v60 = vpop.f32.mrb[118].mxu0  ;;  %v3165_v56 = vpop.f32.mrb[105].mxu1  ;;  %v5682_v37 = vadd.f32 %v3240_v29, %v2051_v17 }
 0x2f8   :  { %v3166_v23 = vadd.f32 %v3165_v56, %v3164_v10  ;;  %v3242_v28 = vpop.f32.mrb[119].mxu0 }
 0x2f9   :  { %v3243_v48 = vadd.f32 %v3242_v28, %v3241_v60 }
 0x2fa   :  { %v2061_v5 = vadd.f32 %v3166_v23, %v5639_v2  ;;  %v3167_v31 = vpop.f32.mrb[106].mxu1 }
 0x2fb   :  { %v3244_v21 = vpop.f32.mrb[120].mxu0  ;;  %v3168_v40 = vpop.f32.mrb[107].mxu1  ;;  %v5685_v36 = vadd.f32 %v3243_v48, %v2056_v57 }
 0x2fc   :  { %v3169_v44 = vadd.f32 %v3168_v40, %v3167_v31  ;;  %v3245_v53 = vpop.f32.mrb[121].mxu0 }
 0x2fd   :  { %v3246_v35 = vadd.f32 %v3245_v53, %v3244_v21 }
 0x2fe   :  { %v2066_v15 = vadd.f32 %v3169_v44, %v5642_v11  ;;  %v3170_v41 = vpop.f32.mrb[108].mxu1 }
 0x2ff   :  { %v3247_v46 = vpop.f32.mrb[122].mxu0  ;;  %v3171_v33 = vpop.f32.mrb[109].mxu1  ;;  %v5688_v25 = vadd.f32 %v3246_v35, %v2061_v5 }
 0x300   :  { %v3172_v27 = vadd.f32 %v3171_v33, %v3170_v41  ;;  %v3248_v39 = vpop.f32.mrb[123].mxu0 }
 0x301   :  { %v3249_v3 = vadd.f32 %v3248_v39, %v3247_v46 }
 0x302   :  { %v2071_v2 = vadd.f32 %v3172_v27, %v5645_v14  ;;  %v3173_v12 = vpop.f32.mrb[110].mxu1 }
 0x303   :  { %v3250_v24 = vpop.f32.mrb[124].mxu0  ;;  %v3174_v49 = vpop.f32.mrb[111].mxu1  ;;  %v5691_v8 = vadd.f32 %v3249_v3, %v2066_v15 }
 0x304   :  { %v3175_v6 = vadd.f32 %v3174_v49, %v3173_v12  ;;  %v3251_v54 = vpop.f32.mrb[125].mxu0 }
 0x305   :  { %v3252_v32 = vadd.f32 %v3251_v54, %v3250_v24 }
 0x306   :  { %v2076_v11 = vadd.f32 %v3175_v6, %v5648_v50  ;;  %v3176_v26 = vpop.f32.mrb[112].mxu1 }
 0x307   :  { %v3253_v61 = vpop.f32.mrb[126].mxu0  ;;  %v3177_v9 = vpop.f32.mrb[113].mxu1  ;;  %v5694_v22 = vadd.f32 %v3252_v32, %v2071_v2 }
 0x308   :  { %v3178_v4 = vadd.f32 %v3177_v9, %v3176_v26  ;;  %v3254_v42 = vpop.f32.mrb[127].mxu0 }
 0x309   :  { %v3255_v58 = vadd.f32 %v3254_v42, %v3253_v61 }
 0x30a   :  { %v2081_v14 = vadd.f32 %v3178_v4, %v5651_v51  ;;  %v3179_v62 = vpop.f32.mrb[114].mxu1 }
 0x30b   :  { %v3256_v13 = vpop.f32.mrb[128].mxu0  ;;  %v3180_v0 = vpop.f32.mrb[115].mxu1  ;;  %v5697_v34 = vadd.f32 %v3255_v58, %v2076_v11 }
 0x30c   :  { %v3181_v17 = vadd.f32 %v3180_v0, %v3179_v62  ;;  %v3257_v59 = vpop.f32.mrb[129].mxu0 }
 0x30d   :  { %v3258_v38 = vadd.f32 %v3257_v59, %v3256_v13 }
 0x30e   :  { %v2086_v50 = vadd.f32 %v3181_v17, %v5654_v47  ;;  %v3182_v45 = vpop.f32.mrb[116].mxu1 }
 0x30f   :  { %v3259_v20 = vpop.f32.mrb[130].mxu0  ;;  %v3183_v55 = vpop.f32.mrb[117].mxu1  ;;  %v5700_v29 = vadd.f32 %v3258_v38, %v2081_v14 }
 0x310   :  { %v3184_v57 = vadd.f32 %v3183_v55, %v3182_v45  ;;  %v3260_v10 = vpop.f32.mrb[131].mxu0 }
 0x311   :  { %v3261_v60 = vadd.f32 %v3260_v10, %v3259_v20 }
 0x312   :  { %v2091_v51 = vadd.f32 %v3184_v57, %v5657_v63  ;;  %v3185_v56 = vpop.f32.mrb[118].mxu1 }
 0x313   :  { %v3262_v23 = vpop.f32.mrb[132].mxu0  ;;  %v3186_v28 = vpop.f32.mrb[119].mxu1  ;;  %v5703_v48 = vadd.f32 %v3261_v60, %v2086_v50 }
 0x314   :  { %v3187_v5 = vadd.f32 %v3186_v28, %v3185_v56  ;;  %v3263_v31 = vpop.f32.mrb[133].mxu0 }
 0x315   :  { %v3264_v21 = vadd.f32 %v3263_v31, %v3262_v23 }
 0x316   :  { %v2096_v47 = vadd.f32 %v3187_v5, %v5660_v19  ;;  %v3188_v40 = vpop.f32.mrb[120].mxu1 }
 0x317   :  { %v3265_v44 = vpop.f32.mrb[134].mxu0  ;;  %v3189_v53 = vpop.f32.mrb[121].mxu1  ;;  %v5706_v35 = vadd.f32 %v3264_v21, %v2091_v51 }
 0x318   :  { %v3190_v15 = vadd.f32 %v3189_v53, %v3188_v40  ;;  %v3266_v41 = vpop.f32.mrb[135].mxu0 }
 0x319   :  { %v3267_v46 = vadd.f32 %v3266_v41, %v3265_v44 }
 0x31a   :  { %v2101_v63 = vadd.f32 %v3190_v15, %v5663_v30  ;;  %v3191_v33 = vpop.f32.mrb[122].mxu1 }
 0x31b   :  { %v3268_v27 = vpop.f32.mrb[136].mxu0  ;;  %v3192_v39 = vpop.f32.mrb[123].mxu1  ;;  %v5709_v3 = vadd.f32 %v3267_v46, %v2096_v47 }
 0x31c   :  { %v3193_v2 = vadd.f32 %v3192_v39, %v3191_v33  ;;  %v3269_v12 = vpop.f32.mrb[137].mxu0 }
 0x31d   :  { %v3270_v24 = vadd.f32 %v3269_v12, %v3268_v27 }
 0x31e   :  { %v2106_v19 = vadd.f32 %v3193_v2, %v5666_v1  ;;  %v3194_v49 = vpop.f32.mrb[124].mxu1 }
 0x31f   :  { %v3271_v6 = vpop.f32.mrb[138].mxu0  ;;  %v3195_v54 = vpop.f32.mrb[125].mxu1  ;;  %v5712_v32 = vadd.f32 %v3270_v24, %v2101_v63 }
 0x320   :  { %v3196_v11 = vadd.f32 %v3195_v54, %v3194_v49  ;;  %v3272_v26 = vpop.f32.mrb[139].mxu0 }
 0x321   :  { %v3273_v61 = vadd.f32 %v3272_v26, %v3271_v6 }
 0x322   :  { %v2111_v30 = vadd.f32 %v3196_v11, %v5669_v16  ;;  %v3197_v9 = vpop.f32.mrb[126].mxu1 }
 0x323   :  { %v3274_v4 = vpop.f32.mrb[140].mxu0  ;;  %v3198_v42 = vpop.f32.mrb[127].mxu1  ;;  %v5715_v58 = vadd.f32 %v3273_v61, %v2106_v19 }
 0x324   :  { %v3199_v14 = vadd.f32 %v3198_v42, %v3197_v9  ;;  %v3275_v62 = vpop.f32.mrb[141].mxu0 }
 0x325   :  { %v3276_v13 = vadd.f32 %v3275_v62, %v3274_v4 }
 0x326   :  { %v2116_v1 = vadd.f32 %v3199_v14, %v5673_v18  ;;  %v3402_v0 = vpop.f32.mrb[128].mxu1 }
 0x327   :  { %v3277_v17 = vpop.f32.mrb[142].mxu0  ;;  %v2336_v59 = vadd.f32 %v3402_v0, %v5679_v43  ;;  %v2330_v38 = vpop.f32.mrb[129].mxu1  ;;  %v5719_v50 = vadd.f32 %v3276_v13, %v2111_v30 }
 0x328   :  { %v3278_v45 = vpop.f32.mrb[143].mxu0  ;;  %v2331_v16 = vadd.f32 %v2330_v38, %v5676_v7 }
 0x329   :  { %v5722_v20 = vmax.f32 %v2336_v59, 0.0  ;;  %v3279_v55 = vadd.f32 %v3278_v45, %v3277_v17 }
 0x32a   :  { %v5724_v57 = vmax.f32 %v2331_v16, 0.0  ;;  %v3405_v10 = vpop.f32.mrb[130].mxu1 }
 0x32b   :  { %v2346_v60 = vadd.f32 %v3405_v10, %v5685_v36  ;;  %v2340_v51 = vpop.f32.mrb[131].mxu1  ;;  %v5727_v18 = vadd.f32 %v3279_v55, %v2116_v1  ;;  %v2448_v43 = vmul.f32 %v5722_v20, %v5722_v20 }
 0x32c   :  { %v2447_v56 = vmul.f32 %v5724_v57, %v5724_v57  ;;  %v2341_v23 = vadd.f32 %v2340_v51, %v5682_v37  ;;  %v2425_v7 = vadd.f32 %v5722_v20, %v5724_v57 }
 0x32d   :  { %v5736_v28 = vmax.f32 %v2346_v60, 0.0 }
 0x32e   :  { %v5738_v5 = vmax.f32 %v2341_v23, 0.0  ;;  %v3408_v31 = vpop.f32.mrb[132].mxu1  ;;  %v2463_v47 = vadd.f32 %v2448_v43, %v2447_v56 }
 0x32f   :  { %v2356_v36 = vadd.f32 %v3408_v31, %v5691_v8  ;;  %v2350_v21 = vpop.f32.mrb[133].mxu1  ;;  %v2450_v15 = vmul.f32 %v5736_v28, %v5736_v28 }
 0x330   :  { %v2426_v40 = vadd.f32 %v2425_v7, %v5738_v5  ;;  %v2449_v44 = vmul.f32 %v5738_v5, %v5738_v5  ;;  %v2351_v53 = vadd.f32 %v2350_v21, %v5688_v25 }
 0x331   :  { %v5745_v37 = vmax.f32 %v2356_v36, 0.0 }
 0x332   :  { %v2464_v41 = vadd.f32 %v2463_v47, %v2449_v44  ;;  %v5749_v46 = vmax.f32 %v2351_v53, 0.0  ;;  %v2427_v63 = vadd.f32 %v2426_v40, %v5736_v28  ;;  %v3411_v8 = vpop.f32.mrb[134].mxu1 }
 0x333   :  { %v2366_v33 = vadd.f32 %v3411_v8, %v5697_v34  ;;  %v2360_v27 = vpop.f32.mrb[135].mxu1  ;;  %v2452_v24 = vmul.f32 %v5745_v37, %v5745_v37 }
 0x334   :  { %v2428_v39 = vadd.f32 %v2427_v63, %v5749_v46  ;;  %v2451_v2 = vmul.f32 %v5749_v46, %v5749_v46  ;;  %v2465_v25 = vadd.f32 %v2464_v41, %v2450_v15  ;;  %v2361_v12 = vadd.f32 %v2360_v27, %v5694_v22 }
 0x335   :  { %v5759_v49 = vmax.f32 %v2366_v33, 0.0 }
 0x336   :  { %v2466_v19 = vadd.f32 %v2465_v25, %v2451_v2  ;;  %v5761_v6 = vmax.f32 %v2361_v12, 0.0  ;;  %v2429_v54 = vadd.f32 %v2428_v39, %v5745_v37  ;;  %v3414_v34 = vpop.f32.mrb[136].mxu1 }
 0x337   :  { %v2376_v11 = vadd.f32 %v3414_v34, %v5703_v48  ;;  %v2370_v26 = vpop.f32.mrb[137].mxu1  ;;  %v2454_v42 = vmul.f32 %v5759_v49, %v5759_v49 }
 0x338   :  { %v2430_v61 = vadd.f32 %v2429_v54, %v5761_v6  ;;  %v2453_v30 = vmul.f32 %v5761_v6, %v5761_v6  ;;  %v2467_v22 = vadd.f32 %v2466_v19, %v2452_v24  ;;  %v2371_v9 = vadd.f32 %v2370_v26, %v5700_v29 }
 0x339   :  { %v5769_v4 = vmax.f32 %v2376_v11, 0.0 }
 0x33a   :  { %v2468_v14 = vadd.f32 %v2467_v22, %v2453_v30  ;;  %v5773_v62 = vmax.f32 %v2371_v9, 0.0  ;;  %v2431_v13 = vadd.f32 %v2430_v61, %v5759_v49  ;;  %v3417_v48 = vpop.f32.mrb[138].mxu1 }
 0x33b   :  { %v2386_v1 = vadd.f32 %v3417_v48, %v5709_v3  ;;  %v2380_v0 = vpop.f32.mrb[139].mxu1  ;;  %v2456_v45 = vmul.f32 %v5769_v4, %v5769_v4 }
 0x33c   :  { %v2432_v17 = vadd.f32 %v2431_v13, %v5773_v62  ;;  %v2455_v59 = vmul.f32 %v5773_v62, %v5773_v62  ;;  %v2469_v29 = vadd.f32 %v2468_v14, %v2454_v42  ;;  %v2381_v38 = vadd.f32 %v2380_v0, %v5706_v35 }
 0x33d   :  { %v5783_v55 = vmax.f32 %v2386_v1, 0.0 }
 0x33e   :  { %v2470_v16 = vadd.f32 %v2469_v29, %v2455_v59  ;;  %v5785_v10 = vmax.f32 %v2381_v38, 0.0  ;;  %v2433_v60 = vadd.f32 %v2432_v17, %v5769_v4  ;;  %v3420_v3 = vpop.f32.mrb[140].mxu1 }
 0x33f   :  { %v2396_v51 = vadd.f32 %v3420_v3, %v5715_v58  ;;  %v2390_v43 = vpop.f32.mrb[141].mxu1  ;;  %v2458_v36 = vmul.f32 %v5783_v55, %v5783_v55  ;;  %v2491_v3 = vld [vmem:[%s5874_s8] sm:$0x1] }
 0x340   :  { %v2434_v56 = vadd.f32 %v2433_v60, %v5785_v10  ;;  %v2457_v23 = vmul.f32 %v5785_v10, %v5785_v10  ;;  %v2471_v35 = vadd.f32 %v2470_v16, %v2456_v45  ;;  %v2391_v7 = vadd.f32 %v2390_v43, %v5712_v32  ;;  %v2487_v45 = vld [vmem:[%s5873_s7] sm:$0x1] }
 0x341   :  { %v2422_v31 = vmax.f32 %v2396_v51, 0.0 }
 0x342   :  { %v2472_v21 = vadd.f32 %v2471_v35, %v2457_v23  ;;  %v2421_v47 = vmax.f32 %v2391_v7, 0.0  ;;  %v2435_v40 = vadd.f32 %v2434_v56, %v5783_v55  ;;  %v3423_v44 = vpop.f32.mrb[142].mxu1 }
 0x343   :  { %v2406_v58 = vadd.f32 %v3423_v44, %v5727_v18  ;;  %v2400_v53 = vpop.f32.mrb[143].mxu1  ;;  %v2460_v33 = vmul.f32 %v2422_v31, %v2422_v31 }
 0x344   :  { %v2436_v15 = vadd.f32 %v2435_v40, %v2421_v47  ;;  %v2459_v41 = vmul.f32 %v2421_v47, %v2421_v47  ;;  %v2473_v63 = vadd.f32 %v2472_v21, %v2458_v36  ;;  %v2401_v8 = vadd.f32 %v2400_v53, %v5719_v50 }
 0x345   :  { %v2424_v32 = vmax.f32 %v2406_v58, 0.0 }
 0x346   :  { %v2474_v27 = vadd.f32 %v2473_v63, %v2459_v41  ;;  %v2423_v39 = vmax.f32 %v2401_v8, 0.0  ;;  %v2437_v2 = vadd.f32 %v2436_v15, %v2422_v31 }
 0x347   :  { %v2462_v19 = vmul.f32 %v2424_v32, %v2424_v32 }
 0x348   :  { %v2438_v25 = vadd.f32 %v2437_v2, %v2423_v39  ;;  %v2461_v12 = vmul.f32 %v2423_v39, %v2423_v39  ;;  %v2475_v24 = vadd.f32 %v2474_v27, %v2460_v33 }
 0x34a   :  { %v2439_v54 = vadd.f32 %v2438_v25, %v2424_v32  ;;  %v2476_v34 = vadd.f32 %v2475_v24, %v2461_v12 }
 0x34c   :  { %v2440_v11 = vrot.slane %v2439_v54, 4  ;;  %v2477_v26 = vadd.f32 %v2476_v34, %v2462_v19 }
 0x34e   :  { %v2441_v18 = vadd.f32 %v2440_v11, %v2439_v54  ;;  %v2478_v61 = vrot.slane %v2477_v26, 4 }
 0x350   :  { %v2442_v30 = vrot.slane %v2441_v18, 2  ;;  %v2479_v22 = vadd.f32 %v2478_v61, %v2477_v26 }
 0x352   :  { %v2443_v9 = vadd.f32 %v2442_v30, %v2441_v18  ;;  %v2480_v42 = vrot.slane %v2479_v22, 2 }
 0x354   :  { %v2444_v50 = vrot.slane %v2443_v9, 1  ;;  %v2481_v14 = vadd.f32 %v2480_v42, %v2479_v22 }
 0x356   :  { %v2445_v13 = vadd.f32 %v2444_v50, %v2443_v9  ;;  %v2482_v48 = vrot.slane %v2481_v14, 1 }
 0x358   :  { %v2446_v1 = vmul.f32 0.0078125, %v2445_v13  ;;  %v2483_v0 = vadd.f32 %v2482_v48, %v2481_v14 }
 0x35a   :  { %v2484_v17 = vmul.f32 0.0078125, %v2483_v0  ;;  %v2485_v59 = vmul.f32 %v2446_v1, %v2446_v1 }
 0x35c   :  { %v2486_v29 = vsub.f32 %v2484_v17, %v2485_v59 }
 0x35e   :  { %v2488_v38 = vadd.f32 1e-05, %v2486_v29 }
 0x360   :  { %3747 = vrsqrt.f32 %v2488_v38 }
 0x36a   :  { %v3748_v16 = vpop.eup %3747 }
 0x36b   :  { %v2490_v60 = vmul.f32 %v3748_v16, %v2487_v45 }
 0x36d   :  { %v2492_v51 = vmul.f32 %v2490_v60, %v2446_v1  ;;  %v2498_v43 = vrot.slane %v2490_v60, %v5232_v52 }
 0x36f   :  { %v2493_v56 = vsub.f32 %v2491_v3, %v2492_v51  ;;  %v2502_v23 = vmul.f32 %v2498_v43, %v5738_v5  ;;  %v2503_v35 = vmul.f32 %v2498_v43, %v5736_v28  ;;  %v2504_v7 = vmul.f32 %v2498_v43, %v5749_v46 }
 0x370   :  { %v2505_v36 = vmul.f32 %v2498_v43, %v5745_v37  ;;  %v2506_v21 = vmul.f32 %v2498_v43, %v5761_v6  ;;  %v2507_v40 = vmul.f32 %v2498_v43, %v5759_v49  ;;  %v2508_v44 = vmul.f32 %v2498_v43, %v5773_v62 }
 0x371   :  { %v2509_v58 = vmul.f32 %v2498_v43, %v5769_v4  ;;  %v2510_v53 = vmul.f32 %v2498_v43, %v5785_v10  ;;  %v2511_v15 = vmul.f32 %v2498_v43, %v5783_v55  ;;  %v2512_v41 = vmul.f32 %v2498_v43, %v2421_v47 }
 0x372   :  { %v2513_v5 = vmul.f32 %v2498_v43, %v2422_v31  ;;  %v2514_v63 = vmul.f32 %v2498_v43, %v2423_v39  ;;  %v2500_v28 = vmul.f32 %v2498_v43, %v5724_v57  ;;  %v2501_v46 = vmul.f32 %v2498_v43, %v5722_v20 }
 0x373   :  { %v2515_v37 = vmul.f32 %v2498_v43, %v2424_v32  ;;  %v2520_v6 = vrot.slane %v2493_v56, %v5232_v52 }
 0x375   :  { %v2522_v8 = vadd.f32 %v2520_v6, %v2500_v28  ;;  %v2523_v49 = vadd.f32 %v2520_v6, %v2501_v46  ;;  %v2524_v33 = vadd.f32 %v2520_v6, %v2502_v23  ;;  %v2525_v62 = vadd.f32 %v2520_v6, %v2503_v35 }
 0x376   :  { %v2526_v27 = vadd.f32 %v2520_v6, %v2504_v7  ;;  %v2527_v4 = vadd.f32 %v2520_v6, %v2505_v36  ;;  %v2528_v2 = vadd.f32 %v2520_v6, %v2506_v21  ;;  %v2529_v10 = vadd.f32 %v2520_v6, %v2507_v40 }
 0x377   :  { %v2530_v25 = vadd.f32 %v2520_v6, %v2508_v44  ;;  %v2531_v55 = vadd.f32 %v2520_v6, %v2509_v58  ;;  %v2532_v47 = vadd.f32 %v2520_v6, %v2510_v53  ;;  %v2533_v31 = vadd.f32 %v2520_v6, %v2511_v15  ;;  %2538 = vst [vmem:[%s5875_s9] sm:$0xff] %v2522_v8 }
 0x378   :  { %2539 = vst [vmem:[%s5875_s9 + $0x8] sm:$0xff] %v2523_v49  ;;  %2540 = vst [vmem:[%s5875_s9 + $0x10] sm:$0xff] %v2524_v33  ;;  %v2534_v52 = vadd.f32 %v2520_v6, %v2512_v41  ;;  %v2535_v20 = vadd.f32 %v2520_v6, %v2513_v5  ;;  %v2536_v57 = vadd.f32 %v2520_v6, %v2514_v63 }
 0x379   :  { %2541 = vst [vmem:[%s5875_s9 + $0x18] sm:$0xff] %v2525_v62  ;;  %v2537_v32 = vadd.f32 %v2520_v6, %v2515_v37  ;;  %2542 = vst [vmem:[%s5875_s9 + $0x20] sm:$0xff] %v2526_v27 }
 0x37a   :  { %2543 = vst [vmem:[%s5875_s9 + $0x28] sm:$0xff] %v2527_v4  ;;  %2544 = vst [vmem:[%s5875_s9 + $0x30] sm:$0xff] %v2528_v2 }
 0x37b   :  { %2545 = vst [vmem:[%s5875_s9 + $0x38] sm:$0xff] %v2529_v10  ;;  %2546 = vst [vmem:[%s5875_s9 + $0x40] sm:$0xff] %v2530_v25 }
 0x37c   :  { %2547 = vst [vmem:[%s5875_s9 + $0x48] sm:$0xff] %v2531_v55  ;;  %2548 = vst [vmem:[%s5875_s9 + $0x50] sm:$0xff] %v2532_v47 }
 0x37d   :  { %2549 = vst [vmem:[%s5875_s9 + $0x58] sm:$0xff] %v2533_v31  ;;  %2550 = vst [vmem:[%s5875_s9 + $0x60] sm:$0xff] %v2534_v52 }
 0x37e   :  { %2551 = vst [vmem:[%s5875_s9 + $0x68] sm:$0xff] %v2535_v20  ;;  %2552 = vst [vmem:[%s5875_s9 + $0x70] sm:$0xff] %v2536_v57 }
 0x37f   :  { %2553 = vst [vmem:[%s5875_s9 + $0x78] sm:$0xff] %v2537_v32 }

</bundles_post_ra>
